<compile_context>
chip_gen: v7x
topology: tpu7x:2x2x1
jax: 0.10.0
libtpu: 0.0.40
codegen_flags: <defaults>
</compile_context>

<pallas_src>
import functools

import jax
import jax.numpy as jnp
from jax.experimental import pallas as pl
from jax.experimental.pallas import tpu as pltpu


_ROW_VMEM_BUDGET = 8 * 1024 * 1024  # bytes for the double-buffered row-tiled streams


# ----------------------------------------------------------------------------
# Pallas kernel: fused partial-conv matmul + mask renorm + (folded BN) + activation
# ----------------------------------------------------------------------------
def _pconv_kernel(xp_ref, msum_ref, w_ref, const_ref, out_ref, mvalid_ref,
                  *, slide_winsize, act):
    patches = xp_ref[...]                                   # (tm, K) bf16, im2col(x*mask)
    w = w_ref[...]                                          # (K, Cout) bf16, BN-folded
    raw = jnp.dot(patches, w, preferred_element_type=jnp.float32)   # (tm, Cout) f32 on MXU

    msum = msum_ref[...]                                    # (tm, 1) f32 window mask sum
    valid = (msum > 0.0).astype(jnp.float32)                # (tm, 1)
    denom = jnp.where(msum > 0.0, msum, 1.0)
    ratio = slide_winsize * pl.reciprocal(denom, approx=True) * valid   # EUP divide

    bias = const_ref[0:1, :]                                # (1, Cout)  bias * bn_scale
    shift = const_ref[1:2, :]                               # (1, Cout)  bn_shift
    out = raw * ratio + bias * valid + shift                # holes -> shift (== BN(0))

    if act == "relu":
        out = jnp.maximum(out, 0.0)
    elif act == "leaky":
        out = jnp.where(out > 0.0, out, 0.01 * out)         # nn.LeakyReLU() default slope

    out_ref[...] = out
    mvalid_ref[...] = valid                                 # single column; broadcast in glue


def _choose_tm(M, K, Cout):
    """Largest row tile (multiple of 8, dividing M if possible) within a VMEM budget,
    capped so the grid has >= 2 programs when M allows it (v7x megacore)."""
    per_row = 2 * (2 * K + 4 + 4 * Cout + 4)          # double-buffered in/out bytes per row
    cap = max(8, (_ROW_VMEM_BUDGET // per_row) // 8 * 8)
    if M < 16:
        return M
    tm = min(cap, max(8, ((M // 2) // 8) * 8))
    t = tm
    while t >= 8:
        if M % t == 0:
            return t
        t -= 8
    return min(tm, M)


def pconv_layer(branches, layer_params, *, stride, act):
    """Partial conv over concatenated branches.

    branches: list of (x, mask) NHWC pairs; mask has 1 channel (uniform across the
    branch's channels, which is exact for propagated partial-conv masks) or the same
    channel count as x. Returns (out NHWC, new_mask (N,Ho,Wo,1))."""
    w = layer_params["w"]                  # (KH, KW, Cin, Cout)
    KH, KW, Cin, Cout = w.shape
    scale, shift = layer_params["scale"], layer_params["shift"]

    # Fold eval-mode BatchNorm into the conv.
    wmat = (w * scale).reshape(KH * KW * Cin, Cout).astype(jnp.bfloat16)
    const = jnp.stack([layer_params["b"] * scale, shift], axis=0)       # (2, Cout) f32

    # Build x*mask (per-channel) and the channel-weighted 1-channel mask sum.
    xs, mws = [], []
    for x, mk in branches:
        xs.append(x * mk)                                              # broadcast if 1-ch mask
        if mk.shape[-1] == 1:
            mws.append(float(x.shape[-1]) * mk)
        else:
            mws.append(jnp.sum(mk, axis=-1, keepdims=True))
    xm = xs[0] if len(xs) == 1 else jnp.concatenate(xs, axis=-1)        # (N, H, W, Cin)
    mw = mws[0]
    for extra in mws[1:]:
        mw = mw + extra                                                 # (N, H, W, 1)
    assert xm.shape[-1] == Cin

    N, H, W, _ = xm.shape
    ph, pw = KH // 2, KW // 2
    Ho = (H + 2 * ph - KH) // stride + 1
    Wo = (W + 2 * pw - KW) // stride + 1
    M = N * Ho * Wo
    K = KH * KW * Cin
    slide_winsize = float(K)

    xp = jnp.pad(xm, ((0, 0), (ph, ph), (pw, pw), (0, 0)))
    mp = jnp.pad(mw, ((0, 0), (ph, ph), (pw, pw), (0, 0)))

    # im2col for x*mask ((kh,kw) outer, cin inner -> matches w.reshape(K, Cout));
    # msum accumulated alongside (no full mask im2col streamed to the kernel).
    cols, msum = [], None
    for kh in range(KH):
        for kw in range(KW):
            cols.append(xp[:, kh:kh + stride * Ho:stride, kw:kw + stride * Wo:stride, :])
            msl = mp[:, kh:kh + stride * Ho:stride, kw:kw + stride * Wo:stride, :]
            msum = msl if msum is None else msum + msl
    patches = jnp.concatenate(cols, axis=-1).reshape(M, K).astype(jnp.bfloat16)
    msum = msum.reshape(M, 1).astype(jnp.float32)

    tm = _choose_tm(M, K, Cout)
    grid_m = pl.cdiv(M, tm)
    Mp = grid_m * tm
    if Mp != M:
        patches = jnp.pad(patches, ((0, Mp - M), (0, 0)))
        msum = jnp.pad(msum, ((0, Mp - M), (0, 0)))

    kern = functools.partial(_pconv_kernel, slide_winsize=slide_winsize, act=act)
    out, mvalid = pl.pallas_call(
        kern,
        out_shape=(jax.ShapeDtypeStruct((Mp, Cout), jnp.float32),
                   jax.ShapeDtypeStruct((Mp, 1), jnp.float32)),
        grid=(grid_m,),
        in_specs=[
            pl.BlockSpec((tm, K), lambda i: (i, 0)),
            pl.BlockSpec((tm, 1), lambda i: (i, 0)),
            pl.BlockSpec((K, Cout), lambda i: (0, 0)),
            pl.BlockSpec((2, Cout), lambda i: (0, 0)),
        ],
        out_specs=(
            pl.BlockSpec((tm, Cout), lambda i: (i, 0)),
            pl.BlockSpec((tm, 1), lambda i: (i, 0)),
        ),
        compiler_params=pltpu.CompilerParams(
            dimension_semantics=("parallel",),
            vmem_limit_bytes=32 * 1024 * 1024),
    )(patches, msum, wmat, const)

    out = out[:M].reshape(N, Ho, Wo, Cout)
    new_mask = mvalid[:M].reshape(N, Ho, Wo, 1)
    return out, new_mask


# ----------------------------------------------------------------------------
# Parameter construction (deterministic, mirrors CRAINet.__init__ structure)
# ----------------------------------------------------------------------------
def _make_layer(key, cin, cout, kh, kw, bn, bias):
    kw_, kb_ = jax.random.split(key)
    w = jax.random.normal(kw_, (kh, kw, cin, cout), jnp.float32) * jnp.sqrt(2.0 / (kh * kw * cin))
    b = (jax.random.normal(kb_, (cout,), jnp.float32) * 0.01) if bias else jnp.zeros((cout,), jnp.float32)
    if bn:
        gamma = 1.0 + 0.01 * jnp.arange(cout, dtype=jnp.float32)
        beta = 0.01 * jnp.arange(cout, dtype=jnp.float32)
        rmean = jnp.zeros((cout,), jnp.float32)
        rvar = jnp.ones((cout,), jnp.float32)
        scale = gamma / jnp.sqrt(rvar + 1e-5)
        shift = beta - rmean * scale
    else:
        scale = jnp.ones((cout,), jnp.float32)
        shift = jnp.zeros((cout,), jnp.float32)
    return dict(w=w, b=b, scale=scale, shift=shift)


def init_crainet_params(key, in_channels=1, out_channels=1,
                        enc_dec_layers=2, pool_layers=1, conv_factor=16):
    net_depth = enc_dec_layers + pool_layers
    enc_cfgs, dec_cfgs = [], []
    for i in range(net_depth):
        if i < enc_dec_layers:
            cin = in_channels if i == 0 else conv_factor // (2 ** (enc_dec_layers - i))
            cout = conv_factor // (2 ** (enc_dec_layers - i - 1))
            kernel, bn = (5, 5), (i != 0)
        else:
            cin, cout, kernel, bn = conv_factor, conv_factor, (3, 3), True
        enc_cfgs.append(dict(cin=cin, cout=cout, kernel=kernel, bn=bn))
    h_ch = enc_cfgs[-1]["cout"]
    for i in range(net_depth):
        skip_ch = enc_cfgs[net_depth - i - 1]["cin"]
        if i == net_depth - 1:
            cout, bn, bias = out_channels, False, True
        else:
            cout = enc_cfgs[net_depth - i - 2]["cout"]
            bn, bias = True, False
        dec_cfgs.append(dict(cin=h_ch + skip_ch, cout=cout, kernel=(3, 3), bn=bn, bias=bias))
        h_ch = cout

    keys = jax.random.split(key, 2 * net_depth)
    enc, dec = [], []
    for i, c in enumerate(enc_cfgs):
        enc.append(_make_layer(keys[i], c["cin"], c["cout"], *c["kernel"], bn=c["bn"], bias=False))
    for i, c in enumerate(dec_cfgs):
        dec.append(_make_layer(keys[net_depth + i], c["cin"], c["cout"], *c["kernel"],
                               bn=c["bn"], bias=c["bias"]))
    return dict(enc=enc, dec=dec)


# ----------------------------------------------------------------------------
# CRAINet forward (mirrors the PyTorch forward's loop structure), NHWC internally
# ----------------------------------------------------------------------------
def _to_nhwc(t):
    b, tt, c, h, w = t.shape
    return jnp.transpose(t.reshape(b * tt, c, h, w), (0, 2, 3, 1))


def _to_btchw(t, b, tt):
    n, h, w, c = t.shape
    return jnp.transpose(t, (0, 3, 1, 2)).reshape(b, tt, c, h, w)


@functools.partial(jax.jit, static_argnames=("channel_steps",))
def crainet_forward(params, inp, inp_mask, channel_steps=0):
    # inp, inp_mask: (B, T, C, H, W), matching the PyTorch module's 5-D convention.
    h_index = 2 * channel_steps + 1
    B, T, C, H, W = inp.shape
    net_depth = len(params["enc"])

    x0 = _to_nhwc(inp[:, :, :h_index])
    m0 = _to_nhwc(inp_mask[:, :, :h_index])
    # fusion_input = inp[:, :, h_index:] has 0 channels here -> cat is a no-op, skipped.
    # TODO(synk): cfg.attention fusion branch (AttentionEncoderBlock) not implemented.
    # TODO(synk): ConvLSTM/GRU recurrent states (cfg.lstm_steps / cfg.gru_steps) not implemented.
    # TODO(synk): progstat progress callback is a host-side side effect; omitted.

    hs = [x0]
    hs_mask = [m0]      # masks kept as (N, H, W, 1) (uniform across channels) where possible
    for i in range(net_depth):
        h, hm = pconv_layer([(hs[i], hs_mask[i])], params["enc"][i], stride=2, act="relu")
        hs.append(h)
        hs_mask.append(hm)

    h, h_mask = hs[net_depth], hs_mask[net_depth]
    for i in range(net_depth):
        # nearest-neighbour 2x upsample (DecoderBlock) + skip concat (cfg.skip_layers = 1)
        up = jnp.repeat(jnp.repeat(h, 2, axis=1), 2, axis=2)
        upm = jnp.repeat(jnp.repeat(h_mask, 2, axis=1), 2, axis=2)
        skip, skip_m = hs[net_depth - i - 1], hs_mask[net_depth - i - 1]
        act = None if i == net_depth - 1 else "leaky"
        h, h_mask = pconv_layer([(up, upm), (skip, skip_m)], params["dec"][i],
                                stride=1, act=act)

    # binder = constrain_bounds(None) -> identity scale
    return _to_btchw(h, B, T)


if __name__ == "__main__":
    key = jax.random.PRNGKey(0)
    k_par, k_x, k_m = jax.random.split(key, 3)

    B, T, C, H, W = 2, 1, 1, 16, 16          # (batch, recurrent steps, channels, H, W)
    inp = jax.random.normal(k_x, (B, T, C, H, W), jnp.float32)
    inp_mask = (jax.random.uniform(k_m, (B, T, C, H, W)) > 0.3).astype(jnp.float32)

    params = init_crainet_params(k_par, in_channels=C, out_channels=1,
                                 enc_dec_layers=2, pool_layers=1, conv_factor=16)

    out = crainet_forward(params, inp, inp_mask)
    out = jax.block_until_ready(out)
    assert out.shape == (B, T, 1, H, W)
    assert jnp.all(jnp.isfinite(out))
    print("KERNEL_OK")
</pallas_src>

<mosaic_0001>
module attributes {stable_mosaic.version = 11 : i64} {
  func.func @_pconv_kernel(%arg0: i32, %arg1: memref<64x25xbf16, #tpu.memory_space<vmem>>, %arg2: memref<64x1xf32, #tpu.memory_space<vmem>>, %arg3: memref<25x8xbf16, #tpu.memory_space<vmem>>, %arg4: memref<2x8xf32, #tpu.memory_space<vmem>>, %arg5: memref<64x8xf32, #tpu.memory_space<vmem>>, %arg6: memref<64x1xf32, #tpu.memory_space<vmem>>) attributes {dimension_semantics = [#tpu.dimension_semantics<parallel>], iteration_bounds = array<i64: 2>, scalar_prefetch = 0 : i64, scratch_operands = 0 : i64, tpu.core_type = #tpu.core_type<tc>, window_params = [{transform_indices = @transform_0, window_bounds = array<i64: 64, 25>}, {transform_indices = @transform_1, window_bounds = array<i64: 64, 1>}, {pipeline_mode = #tpu.pipeline_mode<synchronous>, transform_indices = @transform_2, window_bounds = array<i64: 25, 8>}, {pipeline_mode = #tpu.pipeline_mode<synchronous>, transform_indices = @transform_3, window_bounds = array<i64: 2, 8>}, {transform_indices = @transform_4, window_bounds = array<i64: 64, 8>}, {transform_indices = @transform_5, window_bounds = array<i64: 64, 1>}]} {
    %c0 = arith.constant 0 : index
    %c0_0 = arith.constant 0 : index
    %0 = vector.load %arg1[%c0, %c0_0] : memref<64x25xbf16, #tpu.memory_space<vmem>>, vector<64x25xbf16>
    %c0_1 = arith.constant 0 : index
    %c0_2 = arith.constant 0 : index
    %1 = vector.load %arg3[%c0_1, %c0_2] : memref<25x8xbf16, #tpu.memory_space<vmem>>, vector<25x8xbf16>
    %cst = arith.constant dense<0.000000e+00> : vector<64x8xf32>
    %2 = tpu.matmul %0, %1, %cst {dimension_numbers = #tpu.dot_dimension_numbers<[1], [0], [0], [1], [0, 0, 1, 1], [], []>} : vector<64x25xbf16>, vector<25x8xbf16>, vector<64x8xf32> -> vector<64x8xf32>
    %c0_3 = arith.constant 0 : index
    %c0_4 = arith.constant 0 : index
    %3 = vector.load %arg2[%c0_3, %c0_4] : memref<64x1xf32, #tpu.memory_space<vmem>>, vector<64x1xf32>
    %cst_5 = arith.constant 0.000000e+00 : f32
    %4 = vector.broadcast %cst_5 : f32 to vector<64x1xf32>
    %5 = arith.cmpf ogt, %3, %4 : vector<64x1xf32>
    %6 = arith.extui %5 : vector<64x1xi1> to vector<64x1xi32>
    %7 = arith.sitofp %6 : vector<64x1xi32> to vector<64x1xf32>
    %cst_6 = arith.constant 0.000000e+00 : f32
    %8 = vector.broadcast %cst_6 : f32 to vector<64x1xf32>
    %9 = arith.cmpf ogt, %3, %8 : vector<64x1xf32>
    %cst_7 = arith.constant 1.000000e+00 : f32
    %10 = vector.broadcast %cst_7 : f32 to vector<64x1xf32>
    %11 = arith.select %9, %3, %10 : vector<64x1xi1>, vector<64x1xf32>
    %12 = tpu.reciprocal %11 {approx = true} : vector<64x1xf32> -> vector<64x1xf32>
    %cst_8 = arith.constant 2.500000e+01 : f32
    %13 = vector.broadcast %cst_8 : f32 to vector<64x1xf32>
    %14 = arith.mulf %13, %12 : vector<64x1xf32>
    %15 = arith.mulf %14, %7 : vector<64x1xf32>
    %c0_9 = arith.constant 0 : index
    %c0_10 = arith.constant 0 : index
    %16 = vector.load %arg4[%c0_9, %c0_10] : memref<2x8xf32, #tpu.memory_space<vmem>>, vector<1x8xf32>
    %c1 = arith.constant 1 : index
    %c0_11 = arith.constant 0 : index
    %17 = vector.load %arg4[%c1, %c0_11] : memref<2x8xf32, #tpu.memory_space<vmem>>, vector<1x8xf32>
    %18 = vector.broadcast %15 : vector<64x1xf32> to vector<64x8xf32>
    %19 = arith.mulf %2, %18 : vector<64x8xf32>
    %20 = vector.broadcast %16 : vector<1x8xf32> to vector<64x8xf32>
    %21 = vector.broadcast %7 : vector<64x1xf32> to vector<64x8xf32>
    %22 = arith.mulf %20, %21 : vector<64x8xf32>
    %23 = arith.addf %19, %22 : vector<64x8xf32>
    %24 = vector.broadcast %17 : vector<1x8xf32> to vector<64x8xf32>
    %25 = arith.addf %23, %24 : vector<64x8xf32>
    %cst_12 = arith.constant 0.000000e+00 : f32
    %26 = vector.broadcast %cst_12 : f32 to vector<64x8xf32>
    %27 = arith.maximumf %25, %26 : vector<64x8xf32>
    %c0_13 = arith.constant 0 : index
    %c0_14 = arith.constant 0 : index
    %28 = vector.load %arg5[%c0_13, %c0_14] : memref<64x8xf32, #tpu.memory_space<vmem>>, vector<64x8xf32>
    tpu.vector_store %arg5[%c0_13, %c0_14], %27 {strides = array<i32>} : memref<64x8xf32, #tpu.memory_space<vmem>>, vector<64x8xf32>,
    %c0_15 = arith.constant 0 : index
    %c0_16 = arith.constant 0 : index
    %29 = vector.load %arg6[%c0_15, %c0_16] : memref<64x1xf32, #tpu.memory_space<vmem>>, vector<64x1xf32>
    tpu.vector_store %arg6[%c0_15, %c0_16], %7 {strides = array<i32>} : memref<64x1xf32, #tpu.memory_space<vmem>>, vector<64x1xf32>,
    return
  }
  func.func @transform_0(%arg0: i32) -> (i32, i32) {
    %c0_i32 = arith.constant 0 : i32
    %c0_i32_0 = arith.constant 0 : i32
    return %arg0, %c0_i32 : i32, i32
  }
  func.func @transform_1(%arg0: i32) -> (i32, i32) {
    %c0_i32 = arith.constant 0 : i32
    %c0_i32_0 = arith.constant 0 : i32
    return %arg0, %c0_i32 : i32, i32
  }
  func.func @transform_2(%arg0: i32) -> (i32, i32) {
    %c0_i32 = arith.constant 0 : i32
    %c0_i32_0 = arith.constant 0 : i32
    %c0_i32_1 = arith.constant 0 : i32
    return %c0_i32, %c0_i32_0 : i32, i32
  }
  func.func @transform_3(%arg0: i32) -> (i32, i32) {
    %c0_i32 = arith.constant 0 : i32
    %c0_i32_0 = arith.constant 0 : i32
    %c0_i32_1 = arith.constant 0 : i32
    return %c0_i32, %c0_i32_0 : i32, i32
  }
  func.func @transform_4(%arg0: i32) -> (i32, i32) {
    %c0_i32 = arith.constant 0 : i32
    %c0_i32_0 = arith.constant 0 : i32
    return %arg0, %c0_i32 : i32, i32
  }
  func.func @transform_5(%arg0: i32) -> (i32, i32) {
    %c0_i32 = arith.constant 0 : i32
    %c0_i32_0 = arith.constant 0 : i32
    return %arg0, %c0_i32 : i32, i32
  }
}

module attributes {stable_mosaic.version = 11 : i64} {
  func.func @_pconv_kernel(%arg0: i32, %arg1: memref<16x200xbf16, #tpu.memory_space<vmem>>, %arg2: memref<16x1xf32, #tpu.memory_space<vmem>>, %arg3: memref<200x16xbf16, #tpu.memory_space<vmem>>, %arg4: memref<2x16xf32, #tpu.memory_space<vmem>>, %arg5: memref<16x16xf32, #tpu.memory_space<vmem>>, %arg6: memref<16x1xf32, #tpu.memory_space<vmem>>) attributes {dimension_semantics = [#tpu.dimension_semantics<parallel>], iteration_bounds = array<i64: 2>, scalar_prefetch = 0 : i64, scratch_operands = 0 : i64, tpu.core_type = #tpu.core_type<tc>, window_params = [{transform_indices = @transform_0, window_bounds = array<i64: 16, 200>}, {transform_indices = @transform_1, window_bounds = array<i64: 16, 1>}, {pipeline_mode = #tpu.pipeline_mode<synchronous>, transform_indices = @transform_2, window_bounds = array<i64: 200, 16>}, {pipeline_mode = #tpu.pipeline_mode<synchronous>, transform_indices = @transform_3, window_bounds = array<i64: 2, 16>}, {transform_indices = @transform_4, window_bounds = array<i64: 16, 16>}, {transform_indices = @transform_5, window_bounds = array<i64: 16, 1>}]} {
    %c0 = arith.constant 0 : index
    %c0_0 = arith.constant 0 : index
    %0 = vector.load %arg1[%c0, %c0_0] : memref<16x200xbf16, #tpu.memory_space<vmem>>, vector<16x200xbf16>
    %c0_1 = arith.constant 0 : index
    %c0_2 = arith.constant 0 : index
    %1 = vector.load %arg3[%c0_1, %c0_2] : memref<200x16xbf16, #tpu.memory_space<vmem>>, vector<200x16xbf16>
    %cst = arith.constant dense<0.000000e+00> : vector<16x16xf32>
    %2 = tpu.matmul %0, %1, %cst {dimension_numbers = #tpu.dot_dimension_numbers<[1], [0], [0], [1], [0, 0, 1, 1], [], []>} : vector<16x200xbf16>, vector<200x16xbf16>, vector<16x16xf32> -> vector<16x16xf32>
    %c0_3 = arith.constant 0 : index
    %c0_4 = arith.constant 0 : index
    %3 = vector.load %arg2[%c0_3, %c0_4] : memref<16x1xf32, #tpu.memory_space<vmem>>, vector<16x1xf32>
    %cst_5 = arith.constant 0.000000e+00 : f32
    %4 = vector.broadcast %cst_5 : f32 to vector<16x1xf32>
    %5 = arith.cmpf ogt, %3, %4 : vector<16x1xf32>
    %6 = arith.extui %5 : vector<16x1xi1> to vector<16x1xi32>
    %7 = arith.sitofp %6 : vector<16x1xi32> to vector<16x1xf32>
    %cst_6 = arith.constant 0.000000e+00 : f32
    %8 = vector.broadcast %cst_6 : f32 to vector<16x1xf32>
    %9 = arith.cmpf ogt, %3, %8 : vector<16x1xf32>
    %cst_7 = arith.constant 1.000000e+00 : f32
    %10 = vector.broadcast %cst_7 : f32 to vector<16x1xf32>
    %11 = arith.select %9, %3, %10 : vector<16x1xi1>, vector<16x1xf32>
    %12 = tpu.reciprocal %11 {approx = true} : vector<16x1xf32> -> vector<16x1xf32>
    %cst_8 = arith.constant 2.000000e+02 : f32
    %13 = vector.broadcast %cst_8 : f32 to vector<16x1xf32>
    %14 = arith.mulf %13, %12 : vector<16x1xf32>
    %15 = arith.mulf %14, %7 : vector<16x1xf32>
    %c0_9 = arith.constant 0 : index
    %c0_10 = arith.constant 0 : index
    %16 = vector.load %arg4[%c0_9, %c0_10] : memref<2x16xf32, #tpu.memory_space<vmem>>, vector<1x16xf32>
    %c1 = arith.constant 1 : index
    %c0_11 = arith.constant 0 : index
    %17 = vector.load %arg4[%c1, %c0_11] : memref<2x16xf32, #tpu.memory_space<vmem>>, vector<1x16xf32>
    %18 = vector.broadcast %15 : vector<16x1xf32> to vector<16x16xf32>
    %19 = arith.mulf %2, %18 : vector<16x16xf32>
    %20 = vector.broadcast %16 : vector<1x16xf32> to vector<16x16xf32>
    %21 = vector.broadcast %7 : vector<16x1xf32> to vector<16x16xf32>
    %22 = arith.mulf %20, %21 : vector<16x16xf32>
    %23 = arith.addf %19, %22 : vector<16x16xf32>
    %24 = vector.broadcast %17 : vector<1x16xf32> to vector<16x16xf32>
    %25 = arith.addf %23, %24 : vector<16x16xf32>
    %cst_12 = arith.constant 0.000000e+00 : f32
    %26 = vector.broadcast %cst_12 : f32 to vector<16x16xf32>
    %27 = arith.maximumf %25, %26 : vector<16x16xf32>
    %c0_13 = arith.constant 0 : index
    %c0_14 = arith.constant 0 : index
    %28 = vector.load %arg5[%c0_13, %c0_14] : memref<16x16xf32, #tpu.memory_space<vmem>>, vector<16x16xf32>
    tpu.vector_store %arg5[%c0_13, %c0_14], %27 {strides = array<i32>} : memref<16x16xf32, #tpu.memory_space<vmem>>, vector<16x16xf32>,
    %c0_15 = arith.constant 0 : index
    %c0_16 = arith.constant 0 : index
    %29 = vector.load %arg6[%c0_15, %c0_16] : memref<16x1xf32, #tpu.memory_space<vmem>>, vector<16x1xf32>
    tpu.vector_store %arg6[%c0_15, %c0_16], %7 {strides = array<i32>} : memref<16x1xf32, #tpu.memory_space<vmem>>, vector<16x1xf32>,
    return
  }
  func.func @transform_0(%arg0: i32) -> (i32, i32) {
    %c0_i32 = arith.constant 0 : i32
    %c0_i32_0 = arith.constant 0 : i32
    return %arg0, %c0_i32 : i32, i32
  }
  func.func @transform_1(%arg0: i32) -> (i32, i32) {
    %c0_i32 = arith.constant 0 : i32
    %c0_i32_0 = arith.constant 0 : i32
    return %arg0, %c0_i32 : i32, i32
  }
  func.func @transform_2(%arg0: i32) -> (i32, i32) {
    %c0_i32 = arith.constant 0 : i32
    %c0_i32_0 = arith.constant 0 : i32
    %c0_i32_1 = arith.constant 0 : i32
    return %c0_i32, %c0_i32_0 : i32, i32
  }
  func.func @transform_3(%arg0: i32) -> (i32, i32) {
    %c0_i32 = arith.constant 0 : i32
    %c0_i32_0 = arith.constant 0 : i32
    %c0_i32_1 = arith.constant 0 : i32
    return %c0_i32, %c0_i32_0 : i32, i32
  }
  func.func @transform_4(%arg0: i32) -> (i32, i32) {
    %c0_i32 = arith.constant 0 : i32
    %c0_i32_0 = arith.constant 0 : i32
    return %arg0, %c0_i32 : i32, i32
  }
  func.func @transform_5(%arg0: i32) -> (i32, i32) {
    %c0_i32 = arith.constant 0 : i32
    %c0_i32_0 = arith.constant 0 : i32
    return %arg0, %c0_i32 : i32, i32
  }
}

module attributes {stable_mosaic.version = 11 : i64} {
  func.func @_pconv_kernel(%arg0: i32, %arg1: memref<8x144xbf16, #tpu.memory_space<vmem>>, %arg2: memref<8x1xf32, #tpu.memory_space<vmem>>, %arg3: memref<144x16xbf16, #tpu.memory_space<vmem>>, %arg4: memref<2x16xf32, #tpu.memory_space<vmem>>, %arg5: memref<8x16xf32, #tpu.memory_space<vmem>>, %arg6: memref<8x1xf32, #tpu.memory_space<vmem>>) attributes {dimension_semantics = [#tpu.dimension_semantics<parallel>], iteration_bounds = array<i64: 1>, scalar_prefetch = 0 : i64, scratch_operands = 0 : i64, tpu.core_type = #tpu.core_type<tc>, window_params = [{transform_indices = @transform_0, window_bounds = array<i64: 8, 144>}, {transform_indices = @transform_1, window_bounds = array<i64: 8, 1>}, {pipeline_mode = #tpu.pipeline_mode<synchronous>, transform_indices = @transform_2, window_bounds = array<i64: 144, 16>}, {pipeline_mode = #tpu.pipeline_mode<synchronous>, transform_indices = @transform_3, window_bounds = array<i64: 2, 16>}, {transform_indices = @transform_4, window_bounds = array<i64: 8, 16>}, {transform_indices = @transform_5, window_bounds = array<i64: 8, 1>}]} {
    %c0 = arith.constant 0 : index
    %c0_0 = arith.constant 0 : index
    %0 = vector.load %arg1[%c0, %c0_0] : memref<8x144xbf16, #tpu.memory_space<vmem>>, vector<8x144xbf16>
    %c0_1 = arith.constant 0 : index
    %c0_2 = arith.constant 0 : index
    %1 = vector.load %arg3[%c0_1, %c0_2] : memref<144x16xbf16, #tpu.memory_space<vmem>>, vector<144x16xbf16>
    %cst = arith.constant dense<0.000000e+00> : vector<8x16xf32>
    %2 = tpu.matmul %0, %1, %cst {dimension_numbers = #tpu.dot_dimension_numbers<[1], [0], [0], [1], [0, 0, 1, 1], [], []>} : vector<8x144xbf16>, vector<144x16xbf16>, vector<8x16xf32> -> vector<8x16xf32>
    %c0_3 = arith.constant 0 : index
    %c0_4 = arith.constant 0 : index
    %3 = vector.load %arg2[%c0_3, %c0_4] : memref<8x1xf32, #tpu.memory_space<vmem>>, vector<8x1xf32>
    %cst_5 = arith.constant 0.000000e+00 : f32
    %4 = vector.broadcast %cst_5 : f32 to vector<8x1xf32>
    %5 = arith.cmpf ogt, %3, %4 : vector<8x1xf32>
    %6 = arith.extui %5 : vector<8x1xi1> to vector<8x1xi32>
    %7 = arith.sitofp %6 : vector<8x1xi32> to vector<8x1xf32>
    %cst_6 = arith.constant 0.000000e+00 : f32
    %8 = vector.broadcast %cst_6 : f32 to vector<8x1xf32>
    %9 = arith.cmpf ogt, %3, %8 : vector<8x1xf32>
    %cst_7 = arith.constant 1.000000e+00 : f32
    %10 = vector.broadcast %cst_7 : f32 to vector<8x1xf32>
    %11 = arith.select %9, %3, %10 : vector<8x1xi1>, vector<8x1xf32>
    %12 = tpu.reciprocal %11 {approx = true} : vector<8x1xf32> -> vector<8x1xf32>
    %cst_8 = arith.constant 1.440000e+02 : f32
    %13 = vector.broadcast %cst_8 : f32 to vector<8x1xf32>
    %14 = arith.mulf %13, %12 : vector<8x1xf32>
    %15 = arith.mulf %14, %7 : vector<8x1xf32>
    %c0_9 = arith.constant 0 : index
    %c0_10 = arith.constant 0 : index
    %16 = vector.load %arg4[%c0_9, %c0_10] : memref<2x16xf32, #tpu.memory_space<vmem>>, vector<1x16xf32>
    %c1 = arith.constant 1 : index
    %c0_11 = arith.constant 0 : index
    %17 = vector.load %arg4[%c1, %c0_11] : memref<2x16xf32, #tpu.memory_space<vmem>>, vector<1x16xf32>
    %18 = vector.broadcast %15 : vector<8x1xf32> to vector<8x16xf32>
    %19 = arith.mulf %2, %18 : vector<8x16xf32>
    %20 = vector.broadcast %16 : vector<1x16xf32> to vector<8x16xf32>
    %21 = vector.broadcast %7 : vector<8x1xf32> to vector<8x16xf32>
    %22 = arith.mulf %20, %21 : vector<8x16xf32>
    %23 = arith.addf %19, %22 : vector<8x16xf32>
    %24 = vector.broadcast %17 : vector<1x16xf32> to vector<8x16xf32>
    %25 = arith.addf %23, %24 : vector<8x16xf32>
    %cst_12 = arith.constant 0.000000e+00 : f32
    %26 = vector.broadcast %cst_12 : f32 to vector<8x16xf32>
    %27 = arith.maximumf %25, %26 : vector<8x16xf32>
    %c0_13 = arith.constant 0 : index
    %c0_14 = arith.constant 0 : index
    %28 = vector.load %arg5[%c0_13, %c0_14] : memref<8x16xf32, #tpu.memory_space<vmem>>, vector<8x16xf32>
    tpu.vector_store %arg5[%c0_13, %c0_14], %27 {strides = array<i32>} : memref<8x16xf32, #tpu.memory_space<vmem>>, vector<8x16xf32>,
    %c0_15 = arith.constant 0 : index
    %c0_16 = arith.constant 0 : index
    %29 = vector.load %arg6[%c0_15, %c0_16] : memref<8x1xf32, #tpu.memory_space<vmem>>, vector<8x1xf32>
    tpu.vector_store %arg6[%c0_15, %c0_16], %7 {strides = array<i32>} : memref<8x1xf32, #tpu.memory_space<vmem>>, vector<8x1xf32>,
    return
  }
  func.func @transform_0(%arg0: i32) -> (i32, i32) {
    %c0_i32 = arith.constant 0 : i32
    %c0_i32_0 = arith.constant 0 : i32
    return %arg0, %c0_i32 : i32, i32
  }
  func.func @transform_1(%arg0: i32) -> (i32, i32) {
    %c0_i32 = arith.constant 0 : i32
    %c0_i32_0 = arith.constant 0 : i32
    return %arg0, %c0_i32 : i32, i32
  }
  func.func @transform_2(%arg0: i32) -> (i32, i32) {
    %c0_i32 = arith.constant 0 : i32
    %c0_i32_0 = arith.constant 0 : i32
    %c0_i32_1 = arith.constant 0 : i32
    return %c0_i32, %c0_i32_0 : i32, i32
  }
  func.func @transform_3(%arg0: i32) -> (i32, i32) {
    %c0_i32 = arith.constant 0 : i32
    %c0_i32_0 = arith.constant 0 : i32
    %c0_i32_1 = arith.constant 0 : i32
    return %c0_i32, %c0_i32_0 : i32, i32
  }
  func.func @transform_4(%arg0: i32) -> (i32, i32) {
    %c0_i32 = arith.constant 0 : i32
    %c0_i32_0 = arith.constant 0 : i32
    return %arg0, %c0_i32 : i32, i32
  }
  func.func @transform_5(%arg0: i32) -> (i32, i32) {
    %c0_i32 = arith.constant 0 : i32
    %c0_i32_0 = arith.constant 0 : i32
    return %arg0, %c0_i32 : i32, i32
  }
}

module attributes {stable_mosaic.version = 11 : i64} {
  func.func @_pconv_kernel(%arg0: i32, %arg1: memref<16x288xbf16, #tpu.memory_space<vmem>>, %arg2: memref<16x1xf32, #tpu.memory_space<vmem>>, %arg3: memref<288x16xbf16, #tpu.memory_space<vmem>>, %arg4: memref<2x16xf32, #tpu.memory_space<vmem>>, %arg5: memref<16x16xf32, #tpu.memory_space<vmem>>, %arg6: memref<16x1xf32, #tpu.memory_space<vmem>>) attributes {dimension_semantics = [#tpu.dimension_semantics<parallel>], iteration_bounds = array<i64: 2>, scalar_prefetch = 0 : i64, scratch_operands = 0 : i64, tpu.core_type = #tpu.core_type<tc>, window_params = [{transform_indices = @transform_0, window_bounds = array<i64: 16, 288>}, {transform_indices = @transform_1, window_bounds = array<i64: 16, 1>}, {pipeline_mode = #tpu.pipeline_mode<synchronous>, transform_indices = @transform_2, window_bounds = array<i64: 288, 16>}, {pipeline_mode = #tpu.pipeline_mode<synchronous>, transform_indices = @transform_3, window_bounds = array<i64: 2, 16>}, {transform_indices = @transform_4, window_bounds = array<i64: 16, 16>}, {transform_indices = @transform_5, window_bounds = array<i64: 16, 1>}]} {
    %c0 = arith.constant 0 : index
    %c0_0 = arith.constant 0 : index
    %0 = vector.load %arg1[%c0, %c0_0] : memref<16x288xbf16, #tpu.memory_space<vmem>>, vector<16x288xbf16>
    %c0_1 = arith.constant 0 : index
    %c0_2 = arith.constant 0 : index
    %1 = vector.load %arg3[%c0_1, %c0_2] : memref<288x16xbf16, #tpu.memory_space<vmem>>, vector<288x16xbf16>
    %cst = arith.constant dense<0.000000e+00> : vector<16x16xf32>
    %2 = tpu.matmul %0, %1, %cst {dimension_numbers = #tpu.dot_dimension_numbers<[1], [0], [0], [1], [0, 0, 1, 1], [], []>} : vector<16x288xbf16>, vector<288x16xbf16>, vector<16x16xf32> -> vector<16x16xf32>
    %c0_3 = arith.constant 0 : index
    %c0_4 = arith.constant 0 : index
    %3 = vector.load %arg2[%c0_3, %c0_4] : memref<16x1xf32, #tpu.memory_space<vmem>>, vector<16x1xf32>
    %cst_5 = arith.constant 0.000000e+00 : f32
    %4 = vector.broadcast %cst_5 : f32 to vector<16x1xf32>
    %5 = arith.cmpf ogt, %3, %4 : vector<16x1xf32>
    %6 = arith.extui %5 : vector<16x1xi1> to vector<16x1xi32>
    %7 = arith.sitofp %6 : vector<16x1xi32> to vector<16x1xf32>
    %cst_6 = arith.constant 0.000000e+00 : f32
    %8 = vector.broadcast %cst_6 : f32 to vector<16x1xf32>
    %9 = arith.cmpf ogt, %3, %8 : vector<16x1xf32>
    %cst_7 = arith.constant 1.000000e+00 : f32
    %10 = vector.broadcast %cst_7 : f32 to vector<16x1xf32>
    %11 = arith.select %9, %3, %10 : vector<16x1xi1>, vector<16x1xf32>
    %12 = tpu.reciprocal %11 {approx = true} : vector<16x1xf32> -> vector<16x1xf32>
    %cst_8 = arith.constant 2.880000e+02 : f32
    %13 = vector.broadcast %cst_8 : f32 to vector<16x1xf32>
    %14 = arith.mulf %13, %12 : vector<16x1xf32>
    %15 = arith.mulf %14, %7 : vector<16x1xf32>
    %c0_9 = arith.constant 0 : index
    %c0_10 = arith.constant 0 : index
    %16 = vector.load %arg4[%c0_9, %c0_10] : memref<2x16xf32, #tpu.memory_space<vmem>>, vector<1x16xf32>
    %c1 = arith.constant 1 : index
    %c0_11 = arith.constant 0 : index
    %17 = vector.load %arg4[%c1, %c0_11] : memref<2x16xf32, #tpu.memory_space<vmem>>, vector<1x16xf32>
    %18 = vector.broadcast %15 : vector<16x1xf32> to vector<16x16xf32>
    %19 = arith.mulf %2, %18 : vector<16x16xf32>
    %20 = vector.broadcast %16 : vector<1x16xf32> to vector<16x16xf32>
    %21 = vector.broadcast %7 : vector<16x1xf32> to vector<16x16xf32>
    %22 = arith.mulf %20, %21 : vector<16x16xf32>
    %23 = arith.addf %19, %22 : vector<16x16xf32>
    %24 = vector.broadcast %17 : vector<1x16xf32> to vector<16x16xf32>
    %25 = arith.addf %23, %24 : vector<16x16xf32>
    %cst_12 = arith.constant 0.000000e+00 : f32
    %26 = vector.broadcast %cst_12 : f32 to vector<16x16xf32>
    %27 = arith.cmpf ogt, %25, %26 : vector<16x16xf32>
    %cst_13 = arith.constant 0.00999999977 : f32
    %28 = vector.broadcast %cst_13 : f32 to vector<16x16xf32>
    %29 = arith.mulf %28, %25 : vector<16x16xf32>
    %30 = arith.select %27, %25, %29 : vector<16x16xi1>, vector<16x16xf32>
    %c0_14 = arith.constant 0 : index
    %c0_15 = arith.constant 0 : index
    %31 = vector.load %arg5[%c0_14, %c0_15] : memref<16x16xf32, #tpu.memory_space<vmem>>, vector<16x16xf32>
    tpu.vector_store %arg5[%c0_14, %c0_15], %30 {strides = array<i32>} : memref<16x16xf32, #tpu.memory_space<vmem>>, vector<16x16xf32>,
    %c0_16 = arith.constant 0 : index
    %c0_17 = arith.constant 0 : index
    %32 = vector.load %arg6[%c0_16, %c0_17] : memref<16x1xf32, #tpu.memory_space<vmem>>, vector<16x1xf32>
    tpu.vector_store %arg6[%c0_16, %c0_17], %7 {strides = array<i32>} : memref<16x1xf32, #tpu.memory_space<vmem>>, vector<16x1xf32>,
    return
  }
  func.func @transform_0(%arg0: i32) -> (i32, i32) {
    %c0_i32 = arith.constant 0 : i32
    %c0_i32_0 = arith.constant 0 : i32
    return %arg0, %c0_i32 : i32, i32
  }
  func.func @transform_1(%arg0: i32) -> (i32, i32) {
    %c0_i32 = arith.constant 0 : i32
    %c0_i32_0 = arith.constant 0 : i32
    return %arg0, %c0_i32 : i32, i32
  }
  func.func @transform_2(%arg0: i32) -> (i32, i32) {
    %c0_i32 = arith.constant 0 : i32
    %c0_i32_0 = arith.constant 0 : i32
    %c0_i32_1 = arith.constant 0 : i32
    return %c0_i32, %c0_i32_0 : i32, i32
  }
  func.func @transform_3(%arg0: i32) -> (i32, i32) {
    %c0_i32 = arith.constant 0 : i32
    %c0_i32_0 = arith.constant 0 : i32
    %c0_i32_1 = arith.constant 0 : i32
    return %c0_i32, %c0_i32_0 : i32, i32
  }
  func.func @transform_4(%arg0: i32) -> (i32, i32) {
    %c0_i32 = arith.constant 0 : i32
    %c0_i32_0 = arith.constant 0 : i32
    return %arg0, %c0_i32 : i32, i32
  }
  func.func @transform_5(%arg0: i32) -> (i32, i32) {
    %c0_i32 = arith.constant 0 : i32
    %c0_i32_0 = arith.constant 0 : i32
    return %arg0, %c0_i32 : i32, i32
  }
}

module attributes {stable_mosaic.version = 11 : i64} {
  func.func @_pconv_kernel(%arg0: i32, %arg1: memref<64x216xbf16, #tpu.memory_space<vmem>>, %arg2: memref<64x1xf32, #tpu.memory_space<vmem>>, %arg3: memref<216x8xbf16, #tpu.memory_space<vmem>>, %arg4: memref<2x8xf32, #tpu.memory_space<vmem>>, %arg5: memref<64x8xf32, #tpu.memory_space<vmem>>, %arg6: memref<64x1xf32, #tpu.memory_space<vmem>>) attributes {dimension_semantics = [#tpu.dimension_semantics<parallel>], iteration_bounds = array<i64: 2>, scalar_prefetch = 0 : i64, scratch_operands = 0 : i64, tpu.core_type = #tpu.core_type<tc>, window_params = [{transform_indices = @transform_0, window_bounds = array<i64: 64, 216>}, {transform_indices = @transform_1, window_bounds = array<i64: 64, 1>}, {pipeline_mode = #tpu.pipeline_mode<synchronous>, transform_indices = @transform_2, window_bounds = array<i64: 216, 8>}, {pipeline_mode = #tpu.pipeline_mode<synchronous>, transform_indices = @transform_3, window_bounds = array<i64: 2, 8>}, {transform_indices = @transform_4, window_bounds = array<i64: 64, 8>}, {transform_indices = @transform_5, window_bounds = array<i64: 64, 1>}]} {
    %c0 = arith.constant 0 : index
    %c0_0 = arith.constant 0 : index
    %0 = vector.load %arg1[%c0, %c0_0] : memref<64x216xbf16, #tpu.memory_space<vmem>>, vector<64x216xbf16>
    %c0_1 = arith.constant 0 : index
    %c0_2 = arith.constant 0 : index
    %1 = vector.load %arg3[%c0_1, %c0_2] : memref<216x8xbf16, #tpu.memory_space<vmem>>, vector<216x8xbf16>
    %cst = arith.constant dense<0.000000e+00> : vector<64x8xf32>
    %2 = tpu.matmul %0, %1, %cst {dimension_numbers = #tpu.dot_dimension_numbers<[1], [0], [0], [1], [0, 0, 1, 1], [], []>} : vector<64x216xbf16>, vector<216x8xbf16>, vector<64x8xf32> -> vector<64x8xf32>
    %c0_3 = arith.constant 0 : index
    %c0_4 = arith.constant 0 : index
    %3 = vector.load %arg2[%c0_3, %c0_4] : memref<64x1xf32, #tpu.memory_space<vmem>>, vector<64x1xf32>
    %cst_5 = arith.constant 0.000000e+00 : f32
    %4 = vector.broadcast %cst_5 : f32 to vector<64x1xf32>
    %5 = arith.cmpf ogt, %3, %4 : vector<64x1xf32>
    %6 = arith.extui %5 : vector<64x1xi1> to vector<64x1xi32>
    %7 = arith.sitofp %6 : vector<64x1xi32> to vector<64x1xf32>
    %cst_6 = arith.constant 0.000000e+00 : f32
    %8 = vector.broadcast %cst_6 : f32 to vector<64x1xf32>
    %9 = arith.cmpf ogt, %3, %8 : vector<64x1xf32>
    %cst_7 = arith.constant 1.000000e+00 : f32
    %10 = vector.broadcast %cst_7 : f32 to vector<64x1xf32>
    %11 = arith.select %9, %3, %10 : vector<64x1xi1>, vector<64x1xf32>
    %12 = tpu.reciprocal %11 {approx = true} : vector<64x1xf32> -> vector<64x1xf32>
    %cst_8 = arith.constant 2.160000e+02 : f32
    %13 = vector.broadcast %cst_8 : f32 to vector<64x1xf32>
    %14 = arith.mulf %13, %12 : vector<64x1xf32>
    %15 = arith.mulf %14, %7 : vector<64x1xf32>
    %c0_9 = arith.constant 0 : index
    %c0_10 = arith.constant 0 : index
    %16 = vector.load %arg4[%c0_9, %c0_10] : memref<2x8xf32, #tpu.memory_space<vmem>>, vector<1x8xf32>
    %c1 = arith.constant 1 : index
    %c0_11 = arith.constant 0 : index
    %17 = vector.load %arg4[%c1, %c0_11] : memref<2x8xf32, #tpu.memory_space<vmem>>, vector<1x8xf32>
    %18 = vector.broadcast %15 : vector<64x1xf32> to vector<64x8xf32>
    %19 = arith.mulf %2, %18 : vector<64x8xf32>
    %20 = vector.broadcast %16 : vector<1x8xf32> to vector<64x8xf32>
    %21 = vector.broadcast %7 : vector<64x1xf32> to vector<64x8xf32>
    %22 = arith.mulf %20, %21 : vector<64x8xf32>
    %23 = arith.addf %19, %22 : vector<64x8xf32>
    %24 = vector.broadcast %17 : vector<1x8xf32> to vector<64x8xf32>
    %25 = arith.addf %23, %24 : vector<64x8xf32>
    %cst_12 = arith.constant 0.000000e+00 : f32
    %26 = vector.broadcast %cst_12 : f32 to vector<64x8xf32>
    %27 = arith.cmpf ogt, %25, %26 : vector<64x8xf32>
    %cst_13 = arith.constant 0.00999999977 : f32
    %28 = vector.broadcast %cst_13 : f32 to vector<64x8xf32>
    %29 = arith.mulf %28, %25 : vector<64x8xf32>
    %30 = arith.select %27, %25, %29 : vector<64x8xi1>, vector<64x8xf32>
    %c0_14 = arith.constant 0 : index
    %c0_15 = arith.constant 0 : index
    %31 = vector.load %arg5[%c0_14, %c0_15] : memref<64x8xf32, #tpu.memory_space<vmem>>, vector<64x8xf32>
    tpu.vector_store %arg5[%c0_14, %c0_15], %30 {strides = array<i32>} : memref<64x8xf32, #tpu.memory_space<vmem>>, vector<64x8xf32>,
    %c0_16 = arith.constant 0 : index
    %c0_17 = arith.constant 0 : index
    %32 = vector.load %arg6[%c0_16, %c0_17] : memref<64x1xf32, #tpu.memory_space<vmem>>, vector<64x1xf32>
    tpu.vector_store %arg6[%c0_16, %c0_17], %7 {strides = array<i32>} : memref<64x1xf32, #tpu.memory_space<vmem>>, vector<64x1xf32>,
    return
  }
  func.func @transform_0(%arg0: i32) -> (i32, i32) {
    %c0_i32 = arith.constant 0 : i32
    %c0_i32_0 = arith.constant 0 : i32
    return %arg0, %c0_i32 : i32, i32
  }
  func.func @transform_1(%arg0: i32) -> (i32, i32) {
    %c0_i32 = arith.constant 0 : i32
    %c0_i32_0 = arith.constant 0 : i32
    return %arg0, %c0_i32 : i32, i32
  }
  func.func @transform_2(%arg0: i32) -> (i32, i32) {
    %c0_i32 = arith.constant 0 : i32
    %c0_i32_0 = arith.constant 0 : i32
    %c0_i32_1 = arith.constant 0 : i32
    return %c0_i32, %c0_i32_0 : i32, i32
  }
  func.func @transform_3(%arg0: i32) -> (i32, i32) {
    %c0_i32 = arith.constant 0 : i32
    %c0_i32_0 = arith.constant 0 : i32
    %c0_i32_1 = arith.constant 0 : i32
    return %c0_i32, %c0_i32_0 : i32, i32
  }
  func.func @transform_4(%arg0: i32) -> (i32, i32) {
    %c0_i32 = arith.constant 0 : i32
    %c0_i32_0 = arith.constant 0 : i32
    return %arg0, %c0_i32 : i32, i32
  }
  func.func @transform_5(%arg0: i32) -> (i32, i32) {
    %c0_i32 = arith.constant 0 : i32
    %c0_i32_0 = arith.constant 0 : i32
    return %arg0, %c0_i32 : i32, i32
  }
}

module attributes {stable_mosaic.version = 11 : i64} {
  func.func @_pconv_kernel(%arg0: i32, %arg1: memref<256x81xbf16, #tpu.memory_space<vmem>>, %arg2: memref<256x1xf32, #tpu.memory_space<vmem>>, %arg3: memref<81x1xbf16, #tpu.memory_space<vmem>>, %arg4: memref<2x1xf32, #tpu.memory_space<vmem>>, %arg5: memref<256x1xf32, #tpu.memory_space<vmem>>, %arg6: memref<256x1xf32, #tpu.memory_space<vmem>>) attributes {dimension_semantics = [#tpu.dimension_semantics<parallel>], iteration_bounds = array<i64: 2>, scalar_prefetch = 0 : i64, scratch_operands = 0 : i64, tpu.core_type = #tpu.core_type<tc>, window_params = [{transform_indices = @transform_0, window_bounds = array<i64: 256, 81>}, {transform_indices = @transform_1, window_bounds = array<i64: 256, 1>}, {pipeline_mode = #tpu.pipeline_mode<synchronous>, transform_indices = @transform_2, window_bounds = array<i64: 81, 1>}, {pipeline_mode = #tpu.pipeline_mode<synchronous>, transform_indices = @transform_3, window_bounds = array<i64: 2, 1>}, {transform_indices = @transform_4, window_bounds = array<i64: 256, 1>}, {transform_indices = @transform_5, window_bounds = array<i64: 256, 1>}]} {
    %c0 = arith.constant 0 : index
    %c0_0 = arith.constant 0 : index
    %0 = vector.load %arg1[%c0, %c0_0] : memref<256x81xbf16, #tpu.memory_space<vmem>>, vector<256x81xbf16>
    %c0_1 = arith.constant 0 : index
    %c0_2 = arith.constant 0 : index
    %1 = vector.load %arg3[%c0_1, %c0_2] : memref<81x1xbf16, #tpu.memory_space<vmem>>, vector<81x1xbf16>
    %cst = arith.constant dense<0.000000e+00> : vector<256x1xf32>
    %2 = tpu.matmul %0, %1, %cst {dimension_numbers = #tpu.dot_dimension_numbers<[1], [0], [0], [1], [0, 0, 1, 1], [], []>} : vector<256x81xbf16>, vector<81x1xbf16>, vector<256x1xf32> -> vector<256x1xf32>
    %c0_3 = arith.constant 0 : index
    %c0_4 = arith.constant 0 : index
    %3 = vector.load %arg2[%c0_3, %c0_4] : memref<256x1xf32, #tpu.memory_space<vmem>>, vector<256x1xf32>
    %cst_5 = arith.constant 0.000000e+00 : f32
    %4 = vector.broadcast %cst_5 : f32 to vector<256x1xf32>
    %5 = arith.cmpf ogt, %3, %4 : vector<256x1xf32>
    %6 = arith.extui %5 : vector<256x1xi1> to vector<256x1xi32>
    %7 = arith.sitofp %6 : vector<256x1xi32> to vector<256x1xf32>
    %cst_6 = arith.constant 0.000000e+00 : f32
    %8 = vector.broadcast %cst_6 : f32 to vector<256x1xf32>
    %9 = arith.cmpf ogt, %3, %8 : vector<256x1xf32>
    %cst_7 = arith.constant 1.000000e+00 : f32
    %10 = vector.broadcast %cst_7 : f32 to vector<256x1xf32>
    %11 = arith.select %9, %3, %10 : vector<256x1xi1>, vector<256x1xf32>
    %12 = tpu.reciprocal %11 {approx = true} : vector<256x1xf32> -> vector<256x1xf32>
    %cst_8 = arith.constant 8.100000e+01 : f32
    %13 = vector.broadcast %cst_8 : f32 to vector<256x1xf32>
    %14 = arith.mulf %13, %12 : vector<256x1xf32>
    %15 = arith.mulf %14, %7 : vector<256x1xf32>
    %c0_9 = arith.constant 0 : index
    %c0_10 = arith.constant 0 : index
    %16 = vector.load %arg4[%c0_9, %c0_10] : memref<2x1xf32, #tpu.memory_space<vmem>>, vector<1x1xf32>
    %c1 = arith.constant 1 : index
    %c0_11 = arith.constant 0 : index
    %17 = vector.load %arg4[%c1, %c0_11] : memref<2x1xf32, #tpu.memory_space<vmem>>, vector<1x1xf32>
    %18 = arith.mulf %2, %15 : vector<256x1xf32>
    %19 = vector.broadcast %16 : vector<1x1xf32> to vector<256x1xf32>
    %20 = arith.mulf %19, %7 : vector<256x1xf32>
    %21 = arith.addf %18, %20 : vector<256x1xf32>
    %22 = vector.broadcast %17 : vector<1x1xf32> to vector<256x1xf32>
    %23 = arith.addf %21, %22 : vector<256x1xf32>
    %c0_12 = arith.constant 0 : index
    %c0_13 = arith.constant 0 : index
    %24 = vector.load %arg5[%c0_12, %c0_13] : memref<256x1xf32, #tpu.memory_space<vmem>>, vector<256x1xf32>
    tpu.vector_store %arg5[%c0_12, %c0_13], %23 {strides = array<i32>} : memref<256x1xf32, #tpu.memory_space<vmem>>, vector<256x1xf32>,
    %c0_14 = arith.constant 0 : index
    %c0_15 = arith.constant 0 : index
    %25 = vector.load %arg6[%c0_14, %c0_15] : memref<256x1xf32, #tpu.memory_space<vmem>>, vector<256x1xf32>
    tpu.vector_store %arg6[%c0_14, %c0_15], %7 {strides = array<i32>} : memref<256x1xf32, #tpu.memory_space<vmem>>, vector<256x1xf32>,
    return
  }
  func.func @transform_0(%arg0: i32) -> (i32, i32) {
    %c0_i32 = arith.constant 0 : i32
    %c0_i32_0 = arith.constant 0 : i32
    return %arg0, %c0_i32 : i32, i32
  }
  func.func @transform_1(%arg0: i32) -> (i32, i32) {
    %c0_i32 = arith.constant 0 : i32
    %c0_i32_0 = arith.constant 0 : i32
    return %arg0, %c0_i32 : i32, i32
  }
  func.func @transform_2(%arg0: i32) -> (i32, i32) {
    %c0_i32 = arith.constant 0 : i32
    %c0_i32_0 = arith.constant 0 : i32
    %c0_i32_1 = arith.constant 0 : i32
    return %c0_i32, %c0_i32_0 : i32, i32
  }
  func.func @transform_3(%arg0: i32) -> (i32, i32) {
    %c0_i32 = arith.constant 0 : i32
    %c0_i32_0 = arith.constant 0 : i32
    %c0_i32_1 = arith.constant 0 : i32
    return %c0_i32, %c0_i32_0 : i32, i32
  }
  func.func @transform_4(%arg0: i32) -> (i32, i32) {
    %c0_i32 = arith.constant 0 : i32
    %c0_i32_0 = arith.constant 0 : i32
    return %arg0, %c0_i32 : i32, i32
  }
  func.func @transform_5(%arg0: i32) -> (i32, i32) {
    %c0_i32 = arith.constant 0 : i32
    %c0_i32_0 = arith.constant 0 : i32
    return %arg0, %c0_i32 : i32, i32
  }
}

</mosaic_0001>

<bundles_post_ra>
// kernel: mul.83
= control target key start
LH: loop header
LB: loop body
LE: loop exit
PB: predicated region body
PF: predicated region fallthrough
CT: control target
= control target key end

     0   :  { %s130_s8 = smov 104   ;;  %s131_s9 = smov 112   ;;  %vm7_vm0 = vcmask 64512   ;;  %s221_s0 = inlined_call_operand.vmem [shape: f32[128], index: 0, kind: input, shape index: {}]   ;;  %s222_s1 = inlined_call_operand.vmem [shape: f32[2,8,8], index: 1, kind: output, shape index: {}]  }
   0x1   :  { %v4_v0 = vld [vmem:[%s221_s0] sm:$0x1]  ;;  %s129_s0 = smov 120   ;;  %s132_s10 = smov 96  }
   0x2   :  { %5 = vst [vmem:[#allocation0] sm:$0x1] %v4_v0  ;;  %s133_s11 = smov 88   ;;  %s134_s12 = smov 80  }
   0x3   :  { %s135_s13 = smov 72   ;;  %s136_s14 = smov 64  }
   0x4   :  { %s137_s17 = smov 56   ;;  %s138_s18 = smov 48  }
   0x5   :  { %s139_s19 = smov 40   ;;  %s140_s20 = smov 32  }
   0x6   :  { %s141_s21 = smov 24   ;;  %s142_s22 = smov 16  }
   0x7   :  { %s143_s23 = smov 8  }
   0x9   :  { %v9_v1 = vld [vmem:[#allocation0] sm:$0x1]  }
   0xa   :  { %v21_v2 = vld [vmem:[#allocation0] sm:$0x1]   ;;  %10 = vrot.lane.b32.xlu0 %v9_v1, %s129_s0 }
   0xb   :  { %22 = vrot.lane.b32.xlu1 %v21_v2, %s130_s8  ;;  %v15_v3 = vld [vmem:[#allocation0] sm:$0x1]  }
   0xc   :  { %v27_v4 = vld [vmem:[#allocation0] sm:$0x1]  }
   0xd   :  { %v33_v5 = vld [vmem:[#allocation0] sm:$0x1]  }
   0xe   :  { %16 = vrot.lane.b32.xlu0 %v15_v3, %s131_s9  ;;  %v39_v6 = vld [vmem:[#allocation0] sm:$0x1]  }
   0xf   :  { %28 = vrot.lane.b32.xlu1 %v27_v4, %s132_s10  ;;  %v45_v7 = vld [vmem:[#allocation0] sm:$0x1]  }
  0x10   :  { %v51_v8 = vld [vmem:[#allocation0] sm:$0x1]  }
  0x11   :  { %v57_v9 = vld [vmem:[#allocation0] sm:$0x1]  }
  0x12   :  { %34 = vrot.lane.b32.xlu0 %v33_v5, %s133_s11  ;;  %v63_v10 = vld [vmem:[#allocation0] sm:$0x1]  }
  0x13   :  { %40 = vrot.lane.b32.xlu1 %v39_v6, %s134_s12  ;;  %v6_v11 = vld [vmem:[#allocation0] sm:$0x1]  }
  0x14   :  { %8 = vst.msk [vmem:[%s222_s1] sm:$0x1] %vm7_vm0, %v6_v11   ;;  %v69_v12 = vld [vmem:[#allocation0] sm:$0x1]  }
  0x15   :  { %v75_v13 = vld [vmem:[#allocation0] sm:$0x1]  }
  0x16   :  { %46 = vrot.lane.b32.xlu0 %v45_v7, %s135_s13  ;;  %v81_v14 = vld [vmem:[#allocation0] sm:$0x1]  }
  0x17   :  { %52 = vrot.lane.b32.xlu1 %v51_v8, %s136_s14  ;;  %v87_v15 = vld [vmem:[#allocation0] sm:$0x1]  }
  0x18   :  { %v93_v16 = vld [vmem:[#allocation0] sm:$0x1]  }
  0x1a   :  { %58 = vrot.lane.b32.xlu0 %v57_v9, %s137_s17 }
  0x1b   :  { %64 = vrot.lane.b32.xlu1 %v63_v10, %s138_s18 }
  0x1e   :  { %70 = vrot.lane.b32.xlu0 %v69_v12, %s139_s19 }
  0x1f   :  { %76 = vrot.lane.b32.xlu1 %v75_v13, %s140_s20 }
  0x22   :  { %82 = vrot.lane.b32.xlu0 %v81_v14, %s141_s21 }
  0x23   :  { %88 = vrot.lane.b32.xlu1 %v87_v15, %s142_s22 }
  0x26   :  { %94 = vrot.lane.b32.xlu0 %v93_v16, %s143_s23 }
  0x7c   :  { %v11_v17 = vpop.permute.xlu0 %10  }
  0x7d   :  { %v23_v18 = vpop.permute.xlu1 %22   ;;  %99 = vst.msk [vmem:[%s222_s1 + $0x1] sm:$0x1] %vm7_vm0, %v11_v17  }
  0x7e   :  { %101 = vst.msk [vmem:[%s222_s1 + $0x3] sm:$0x1] %vm7_vm0, %v23_v18  }
  0x80   :  { %v17_v19 = vpop.permute.xlu0 %16  }
  0x81   :  { %v29_v20 = vpop.permute.xlu1 %28   ;;  %100 = vst.msk [vmem:[%s222_s1 + $0x2] sm:$0x1] %vm7_vm0, %v17_v19  }
  0x82   :  { %102 = vst.msk [vmem:[%s222_s1 + $0x4] sm:$0x1] %vm7_vm0, %v29_v20  }
  0x84   :  { %v35_v21 = vpop.permute.xlu0 %34  }
  0x85   :  { %v41_v22 = vpop.permute.xlu1 %40   ;;  %103 = vst.msk [vmem:[%s222_s1 + $0x5] sm:$0x1] %vm7_vm0, %v35_v21  }
  0x86   :  { %104 = vst.msk [vmem:[%s222_s1 + $0x6] sm:$0x1] %vm7_vm0, %v41_v22  }
  0x88   :  { %v47_v23 = vpop.permute.xlu0 %46  }
  0x89   :  { %v53_v24 = vpop.permute.xlu1 %52   ;;  %105 = vst.msk [vmem:[%s222_s1 + $0x7] sm:$0x1] %vm7_vm0, %v47_v23  }
  0x8a   :  { %106 = vst.msk [vmem:[%s222_s1 + $0x8] sm:$0x1] %vm7_vm0, %v53_v24  }
  0x8c   :  { %v59_v25 = vpop.permute.xlu0 %58  }
  0x8d   :  { %v65_v26 = vpop.permute.xlu1 %64   ;;  %107 = vst.msk [vmem:[%s222_s1 + $0x9] sm:$0x1] %vm7_vm0, %v59_v25  }
  0x8e   :  { %108 = vst.msk [vmem:[%s222_s1 + $0xa] sm:$0x1] %vm7_vm0, %v65_v26  }
  0x90   :  { %v71_v27 = vpop.permute.xlu0 %70  }
  0x91   :  { %v77_v28 = vpop.permute.xlu1 %76   ;;  %109 = vst.msk [vmem:[%s222_s1 + $0xb] sm:$0x1] %vm7_vm0, %v71_v27  }
  0x92   :  { %110 = vst.msk [vmem:[%s222_s1 + $0xc] sm:$0x1] %vm7_vm0, %v77_v28  }
  0x94   :  { %v83_v29 = vpop.permute.xlu0 %82  }
  0x95   :  { %v89_v30 = vpop.permute.xlu1 %88   ;;  %111 = vst.msk [vmem:[%s222_s1 + $0xd] sm:$0x1] %vm7_vm0, %v83_v29  }
  0x96   :  { %112 = vst.msk [vmem:[%s222_s1 + $0xe] sm:$0x1] %vm7_vm0, %v89_v30  }
  0x98   :  { %v95_v31 = vpop.permute.xlu0 %94  }
  0x99   :  { %113 = vst.msk [vmem:[%s222_s1 + $0xf] sm:$0x1] %vm7_vm0, %v95_v31  }

// kernel: crainet_forward.6
= control target key start
LH: loop header
LB: loop body
LE: loop exit
PB: predicated region body
PF: predicated region fallthrough
CT: control target
= control target key end

     0   :  { %s860_s18 = smov 0   ;;  %s938_s0 = inlined_call_operand.vmem [shape: bf16[128,25], index: 0, kind: input, shape index: {}]   ;;  %s939_s1 = inlined_call_operand.vmem [shape: f32[128,1], index: 1, kind: input, shape index: {}]   ;;  %s940_s2 = inlined_call_operand.vmem [shape: bf16[25,8], index: 2, kind: input, shape index: {}]   ;;  %s941_s3 = inlined_call_operand.vmem [shape: f32[2,8], index: 3, kind: input, shape index: {}]   ;;  %s942_s4 = inlined_call_operand.vmem [shape: f32[128,8], index: 4, kind: output, shape index: {0}]   ;;  %s943_s5 = inlined_call_operand.vmem [shape: f32[128,1], index: 5, kind: output, shape index: {1}]  }
   0x1 LB: > { %s707_s19 = sadd.s32 4294967295, %s825_s18   ;;  %p711_p0 = scmp.ge.s32.totalorder %s825_s18, 1  ;;  %s825_s18 = sphi %s860_s18, %s16_s18  }
   0x2   : > { %p202_p1 = scmp.lt.s32.totalorder %s825_s18, 3 }
   0x4   : > { %p203_p2 = pnand %p711_p0, %p202_p1 }
   0x5   : > { %v797_v0 = vld [vmem:[%s940_s2] sm:$0xff] (!%p203_p2)   ;;  %vm321_vm0 = vcmask (!%p203_p2), 1043456   ;;  %v798_v1 = vld [vmem:[%s940_s2 + $0x8] sm:$0x1f] (!%p203_p2)   ;;  %vm322_vm1 = vcmask (!%p203_p2), 1044480   ;;  %s712_s24 = sshll.u32 (!%p203_p2), %s707_s19, 3 }
   0x6   : > { %206 = sbr.rel (%p203_p2) target bundleno = 242 (0xf2), region = 36  ;;  %748 = vmatprep.subr.bf16.mxu0 (!%p203_p2), %v797_v0  ;;  %760 = vmatprep.subr.bf16.mxu1 (!%p203_p2), %v797_v0  ;;  %v827_v2 = vmov (!%p203_p2), 65535   ;;  %p241_p3 = scmp.lt.s32.totalorder (!%p203_p2), %s712_s24, 15  ;;  %v828_v5 = vmov (!%p203_p2), 0   ;;  %vm308_vm2 = vcmask (!%p203_p2), 203776   ;;  %vm596_vm3 = vcmask (!%p203_p2), 7168  }
   0x7   : > { %749 = vmatpush3.bf16.msra.mxu0 (!%p203_p2), %v797_v0  ;;  %762 = vmatpush3.bf16.msra.mxu1 (!%p203_p2), %v797_v0  ;;  %v323_v3 = vsel (!%p203_p2), %vm321_vm0, 4294967295, %v827_v2  ;;  %v829_v15 = vmov (!%p203_p2), 0.0   ;;  %vm587_vm12 = vcmask (!%p203_p2), 64512  }
   0x8   : > { %v324_v4 = vsel (!%p203_p2), %vm322_vm1, %v323_v3, 0  ;;  %781 = vset.pattern.permute.xlu1 (!%p203_p2), %v828_v5  ;;  %775 = vset.pattern.permute.xlu0 (!%p203_p2), %v828_v5 }
   0x9   : > { %v326_v6 = vand.u32 (!%p203_p2), %v798_v1, %v324_v4 }
   0xb   : > { %750 = vmatprep.subr.bf16.mxu0 (!%p203_p2), %v326_v6  ;;  %761 = vmatprep.subr.bf16.mxu1 (!%p203_p2), %v326_v6 }
   0xc   : > { %751 = vmatpush3.bf16.msra.mxu0 (!%p203_p2), %v326_v6  ;;  %763 = vmatpush3.bf16.msra.mxu1 (!%p203_p2), %v326_v6 }
   0xd   : > { %s945_s24 = smov (!%p241_p3, %s712_s24), 15 }
   0xe   : > { %s713_s25 = sshll.u32 %s945_s24, 2  ;;  %s874_s26 = sshll.u32 %s945_s24, 3 }
   0xf   : > { %s244_s29 = scalar_lea.vmem %s938_s0, %s713_s25  ;;  %s883_s7 = scalar_lea.vmem %s939_s1, %s874_s26 }
  0x10   : > { %v799_v7 = vld [vmem:[%s244_s29] sm:$0xff]   ;;  %v800_v8 = vld [vmem:[%s244_s29 + $0x10] sm:$0xff]   ;;  %v801_v9 = vld [vmem:[%s244_s29 + $0x8] sm:$0xff]   ;;  %s889_s10 = scalar_lea.vmem %s943_s5, %s874_s26  ;;  %s256_s17 = scalar_lea.vmem %s942_s4, %s874_s26 }
  0x11   : > { %752 = vmatprep.mubr.msk.bf16.mxu0 %vm308_vm2, %v799_v7  ;;  %756 = vmatprep.mubr.msk.bf16.mxu1 %vm308_vm2, %v800_v8  ;;  %v802_v10 = vld [vmem:[%s244_s29 + $0x18] sm:$0xff]   ;;  %v395_v11 = vld [vmem:[%s883_s7 + $0x10] sm:$0xff]  ;;  %v393_v13 = vld [vmem:[%s883_s7] sm:$0xff] }
  0x12   : > { %753 = vmatmul.mubr.msk.bf16.vlgmr.msra.gmra.mrb[0].mxu0 %vm308_vm2, %v801_v9  ;;  %v396_v12 = vld [vmem:[%s883_s7 + $0x18] sm:$0xff]  ;;  %757 = vmatmul.mubr.msk.bf16.vlgmr.msra.gmra.mrb[0].mxu1 %vm308_vm2, %v802_v10  ;;  %vm403_vm4 = vcmp.gt.f32.partialorder %v395_v11, 0.0  ;;  %v394_v14 = vld [vmem:[%s883_s7 + $0x8] sm:$0xff]  ;;  %vm401_vm6 = vcmp.gt.f32.partialorder %v393_v13, 0.0  ;;  %v397_v21 = vld [vmem:[%s883_s7 + $0x20] sm:$0xff] }
  0x13   : > { %vm404_vm5 = vcmp.gt.f32.partialorder %v396_v12, 0.0  ;;  %v732_v16 = vsel %vm403_vm4, 1.0, %v829_v15  ;;  %v427_v18 = vsel %vm403_vm4, %v395_v11, 1.0  ;;  %v398_v20 = vld [vmem:[%s883_s7 + $0x28] sm:$0xff]  ;;  %vm402_vm7 = vcmp.gt.f32.partialorder %v394_v14, 0.0  ;;  %v400_v27 = vld [vmem:[%s883_s7 + $0x38] sm:$0xff] }
  0x14   : > { %v733_v17 = vsel %vm404_vm5, 1.0, %v829_v15  ;;  %v428_v19 = vsel %vm404_vm5, %v396_v12, 1.0  ;;  %803 = vrcp.f32 %v427_v18  ;;  %599 = vst.msk [vmem:[%s889_s10 + $0x10] sm:$0xff] %vm596_vm3, %v732_v16  ;;  %v730_v23 = vsel %vm401_vm6, 1.0, %v829_v15  ;;  %v399_v28 = vld [vmem:[%s883_s7 + $0x30] sm:$0xff] }
  0x15   : > { %600 = vst.msk [vmem:[%s889_s10 + $0x18] sm:$0xff] %vm596_vm3, %v733_v17  ;;  %v782_v22 = vpack.i.bf16 %v733_v17, %v732_v16  ;;  %805 = vrcp.f32 %v428_v19  ;;  %v731_v24 = vsel %vm402_vm7, 1.0, %v829_v15  ;;  %v425_v25 = vsel %vm401_vm6, %v393_v13, 1.0  ;;  %597 = vst.msk [vmem:[%s889_s10] sm:$0xff] %vm596_vm3, %v730_v23 }
  0x16   : > { %v426_v26 = vsel %vm402_vm7, %v394_v14, 1.0  ;;  %807 = vrcp.f32 %v425_v25  ;;  %598 = vst.msk [vmem:[%s889_s10 + $0x8] sm:$0xff] %vm596_vm3, %v731_v24  ;;  %v776_v29 = vpack.i.bf16 %v731_v24, %v730_v23  ;;  %vm406_vm8 = vcmp.gt.f32.partialorder %v398_v20, 0.0  ;;  %v738_v14 = vld [vmem:[%s941_s3] ss:$0 sm:$0xff] }
  0x17   : > { %783 = vperm.xlu1 %781, %v782_v22   ;;  %vm405_vm9 = vcmp.gt.f32.partialorder %v397_v21, 0.0  ;;  %809 = vrcp.f32 %v426_v26  ;;  %v735_v30 = vsel %vm406_vm8, 1.0, %v829_v15  ;;  %v430_v31 = vsel %vm406_vm8, %v398_v20, 1.0 }
  0x18   : > { %v734_v32 = vsel %vm405_vm9, 1.0, %v829_v15  ;;  %777 = vperm.xlu0 %775, %v776_v29   ;;  %811 = vrcp.f32 %v430_v31  ;;  %602 = vst.msk [vmem:[%s889_s10 + $0x28] sm:$0xff] %vm596_vm3, %v735_v30  ;;  %v429_v33 = vsel %vm405_vm9, %v397_v21, 1.0  ;;  %vm408_vm10 = vcmp.gt.f32.partialorder %v400_v27, 0.0 }
  0x19   : > { %601 = vst.msk [vmem:[%s889_s10 + $0x20] sm:$0xff] %vm596_vm3, %v734_v32  ;;  %vm407_vm11 = vcmp.gt.f32.partialorder %v399_v28, 0.0  ;;  %813 = vrcp.f32 %v429_v33  ;;  %v737_v34 = vsel %vm408_vm10, 1.0, %v829_v15  ;;  %v432_v35 = vsel %vm408_vm10, %v400_v27, 1.0 }
  0x1a   : > { %v736_v36 = vsel %vm407_vm11, 1.0, %v829_v15  ;;  %815 = vrcp.f32 %v432_v35  ;;  %604 = vst.msk [vmem:[%s889_s10 + $0x38] sm:$0xff] %vm596_vm3, %v737_v34  ;;  %v431_v37 = vsel %vm407_vm11, %v399_v28, 1.0  ;;  %v787_v63 = vpack.i.bf16 %v735_v30, %v734_v32 }
  0x1b   : > { %603 = vst.msk [vmem:[%s889_s10 + $0x30] sm:$0xff] %vm596_vm3, %v736_v36  ;;  %817 = vrcp.f32 %v431_v37  ;;  %v792_v62 = vpack.i.bf16 %v737_v34, %v736_v36 }
  0x1e   : > { %v804_v38 = vpop.eup %803 }
  0x1f   : > { %v806_v39 = vpop.eup %805  ;;  %v443_v40 = vmul.f32 25.0, %v804_v38 }
  0x20   : > { %v808_v41 = vpop.eup %807  ;;  %v444_v42 = vmul.f32 25.0, %v806_v39 }
  0x21   : > { %v810_v43 = vpop.eup %809  ;;  %v451_v44 = vmul.f32 %v732_v16, %v443_v40  ;;  %v441_v45 = vmul.f32 25.0, %v808_v41 }
  0x22   : > { %v812_v46 = vpop.eup %811  ;;  %v442_v47 = vmul.f32 25.0, %v810_v43  ;;  %v452_v50 = vmul.f32 %v733_v17, %v444_v42 }
  0x23   : > { %v814_v48 = vpop.eup %813  ;;  %471 = vperm.xlu1 %781, %v451_v44   ;;  %v449_v49 = vmul.f32 %v730_v23, %v441_v45  ;;  %v446_v51 = vmul.f32 25.0, %v812_v46 }
  0x24   : > { %v816_v52 = vpop.eup %815  ;;  %v450_v53 = vmul.f32 %v731_v24, %v442_v47  ;;  %v445_v54 = vmul.f32 25.0, %v814_v48 }
  0x25   : > { %461 = vperm.xlu0 %775, %v449_v49   ;;  %v818_v55 = vpop.eup %817  ;;  %v454_v56 = vmul.f32 %v735_v30, %v446_v51  ;;  %v448_v57 = vmul.f32 25.0, %v816_v52 }
  0x26   : > { %v453_v58 = vmul.f32 %v734_v32, %v445_v54  ;;  %v447_v59 = vmul.f32 25.0, %v818_v55  ;;  %v739_v32 = vld [vmem:[%s941_s3 + $0x1] ss:$0 sm:$0xff] }
  0x27   : > { %476 = vperm.xlu1 %781, %v452_v50   ;;  %v456_v60 = vmul.f32 %v737_v34, %v448_v57 }
  0x28   : > { %v455_v61 = vmul.f32 %v736_v36, %v447_v59 }
  0x29   : > { %466 = vperm.xlu0 %775, %v450_v53  }
  0x2b   : > { %486 = vperm.xlu1 %781, %v454_v56  }
  0x2d   : > { %481 = vperm.xlu0 %775, %v453_v58  }
  0x2f   : > { %496 = vperm.xlu1 %781, %v456_v60  }
  0x31   : > { %491 = vperm.xlu0 %775, %v455_v61  }
  0x33   : > { %793 = vperm.xlu1 %781, %v792_v62  }
  0x35   : > { %788 = vperm.xlu0 %775, %v787_v63  }
  0x96   : > { %v784_v0 = vpop.permute.xlu1 %783 }
  0x97   : > { %v778_v1 = vpop.permute.xlu0 %777  ;;  %v786_v12 = vunpack.i.h.bf16 %v784_v0  ;;  %v785_v13 = vunpack.i.l.bf16 %v784_v0 }
  0x98   : > { %v780_v15 = vunpack.i.h.bf16 %v778_v1  ;;  %v779_v16 = vunpack.i.l.bf16 %v778_v1 }
  0x99   : > { %v554_v21 = vmul.f32 %v786_v12, %v738_v14  ;;  %v553_v22 = vmul.f32 %v785_v13, %v738_v14 }
  0x9a   : > { %v552_v24 = vmul.f32 %v780_v15, %v738_v14  ;;  %v551_v25 = vmul.f32 %v779_v16, %v738_v14 }
  0xa2   : > { %v472_v2 = vpop.permute.xlu1 %471 }
  0xa4   : > { %v462_v3 = vpop.permute.xlu0 %461 }
  0xa6   : > { %v477_v4 = vpop.permute.xlu1 %476 }
  0xa8   : > { %v467_v5 = vpop.permute.xlu0 %466 }
  0xaa   : > { %v487_v6 = vpop.permute.xlu1 %486 }
  0xac   : > { %v482_v7 = vpop.permute.xlu0 %481 }
  0xae   : > { %v497_v8 = vpop.permute.xlu1 %496 }
  0xb0   : > { %v492_v9 = vpop.permute.xlu0 %491 }
  0xb2   : > { %v794_v10 = vpop.permute.xlu1 %793 }
  0xb3   : > { %v796_v17 = vunpack.i.h.bf16 %v794_v10  ;;  %v795_v18 = vunpack.i.l.bf16 %v794_v10 }
  0xb4   : > { %v789_v11 = vpop.permute.xlu0 %788 }
  0xb5   : > { %v791_v19 = vunpack.i.h.bf16 %v789_v11  ;;  %v790_v20 = vunpack.i.l.bf16 %v789_v11  ;;  %v558_v26 = vmul.f32 %v796_v17, %v738_v14  ;;  %v557_v30 = vmul.f32 %v795_v18, %v738_v14 }
  0xb7   : > { %v556_v31 = vmul.f32 %v791_v19, %v738_v14  ;;  %v555_v37 = vmul.f32 %v790_v20, %v738_v14 }
  0xe5   : > { %v754_v23 = vpop.f32.mrb[0].mxu0  ;;  %v758_v28 = vpop.f32.mrb[0].mxu1 }
  0xe6   : > { %v501_v27 = vmul.f32 %v754_v23, %v472_v2  ;;  %v362_v29 = vpop.f32.mrb[1].mxu0  ;;  %v505_v33 = vmul.f32 %v758_v28, %v492_v9  ;;  %v378_v35 = vpop.f32.mrb[1].mxu1 }
  0xe7   : > { %v499_v34 = vmul.f32 %v462_v3, %v362_v29  ;;  %v755_v36 = vpop.f32.mrb[2].mxu0  ;;  %v503_v39 = vmul.f32 %v482_v7, %v378_v35  ;;  %v759_v41 = vpop.f32.mrb[2].mxu1 }
  0xe8   : > { %v561_v38 = vadd.f32 %v553_v22, %v501_v27  ;;  %v502_v40 = vmul.f32 %v755_v36, %v477_v4  ;;  %v365_v42 = vpop.f32.mrb[3].mxu0  ;;  %v565_v43 = vadd.f32 %v557_v30, %v505_v33  ;;  %v506_v45 = vmul.f32 %v759_v41, %v497_v8  ;;  %v381_v47 = vpop.f32.mrb[3].mxu1 }
  0xe9   : > { %v559_v44 = vadd.f32 %v551_v25, %v499_v34  ;;  %v500_v46 = vmul.f32 %v467_v5, %v365_v42  ;;  %v563_v49 = vadd.f32 %v555_v37, %v503_v39  ;;  %v504_v51 = vmul.f32 %v487_v6, %v381_v47 }
  0xea   : > { %v573_v48 = vadd.f32 %v739_v32, %v561_v38  ;;  %v562_v50 = vadd.f32 %v554_v21, %v502_v40  ;;  %v577_v52 = vadd.f32 %v739_v32, %v565_v43  ;;  %v566_v54 = vadd.f32 %v558_v26, %v506_v45 }
  0xeb   : > { %v571_v53 = vadd.f32 %v739_v32, %v559_v44  ;;  %v560_v55 = vadd.f32 %v552_v24, %v500_v46  ;;  %v575_v57 = vadd.f32 %v739_v32, %v563_v49  ;;  %v564_v59 = vadd.f32 %v556_v31, %v504_v51 }
  0xec   : > { %v581_v56 = vmax.f32 %v573_v48, 0.0  ;;  %v574_v58 = vadd.f32 %v739_v32, %v562_v50  ;;  %v585_v60 = vmax.f32 %v577_v52, 0.0  ;;  %v578_v62 = vadd.f32 %v739_v32, %v566_v54 }
  0xed   : > { %v579_v61 = vmax.f32 %v571_v53, 0.0  ;;  %v572_v63 = vadd.f32 %v739_v32, %v560_v55  ;;  %v583_v0 = vmax.f32 %v575_v57, 0.0  ;;  %v576_v2 = vadd.f32 %v739_v32, %v564_v59 }
  0xee   : > { %590 = vst.msk [vmem:[%s256_s17 + $0x10] sm:$0xff] %vm587_vm12, %v581_v56  ;;  %v582_v1 = vmax.f32 %v574_v58, 0.0  ;;  %594 = vst.msk [vmem:[%s256_s17 + $0x30] sm:$0xff] %vm587_vm12, %v585_v60  ;;  %v586_v3 = vmax.f32 %v578_v62, 0.0 }
  0xef   : > { %588 = vst.msk [vmem:[%s256_s17] sm:$0xff] %vm587_vm12, %v579_v61  ;;  %v580_v4 = vmax.f32 %v572_v63, 0.0  ;;  %592 = vst.msk [vmem:[%s256_s17 + $0x20] sm:$0xff] %vm587_vm12, %v583_v0  ;;  %v584_v5 = vmax.f32 %v576_v2, 0.0 }
  0xf0   : > { %591 = vst.msk [vmem:[%s256_s17 + $0x18] sm:$0xff] %vm587_vm12, %v582_v1  ;;  %595 = vst.msk [vmem:[%s256_s17 + $0x38] sm:$0xff] %vm587_vm12, %v586_v3 }
  0xf1   : > { %589 = vst.msk [vmem:[%s256_s17 + $0x8] sm:$0xff] %vm587_vm12, %v580_v4  ;;  %593 = vst.msk [vmem:[%s256_s17 + $0x28] sm:$0xff] %vm587_vm12, %v584_v5 }
  0xf2 PF: > { %s16_s18 = sadd.s32 1, %s825_s18  }
  0xf3   : > { %p13_p4 = scmp.ge.s32.totalorder %s16_s18, 4  }
  0xf5   :  { %15 = sbr.rel (!%p13_p4) target bundleno = 1 (0x1), region = 81 }

// kernel: mul.93
= control target key start
LH: loop header
LB: loop body
LE: loop exit
PB: predicated region body
PF: predicated region fallthrough
CT: control target
= control target key end

     0   :  { %s71_s8 = smov 116   ;;  %vm7_vm0 = vcmask 31744   ;;  %s72_s9 = smov 120   ;;  %s104_s0 = inlined_call_operand.vmem [shape: f32[32], index: 0, kind: input, shape index: {}]   ;;  %s105_s1 = inlined_call_operand.vmem [shape: f32[2,4,4], index: 1, kind: output, shape index: {}]  }
   0x1   :  { %v4_v0 = vld [vmem:[%s104_s0] sm:$0x1]  ;;  %s70_s0 = smov 124   ;;  %s73_s10 = smov 112  }
   0x2   :  { %5 = vst [vmem:[#allocation1] sm:$0x1] %v4_v0  ;;  %s74_s11 = smov 108   ;;  %s75_s12 = smov 104  }
   0x3   :  { %s76_s13 = smov 100  }
   0x9   :  { %v9_v1 = vld [vmem:[#allocation1] sm:$0x1]  }
   0xa   :  { %v21_v2 = vld [vmem:[#allocation1] sm:$0x1]   ;;  %10 = vrot.lane.b32.xlu0 %v9_v1, %s70_s0 }
   0xb   :  { %22 = vrot.lane.b32.xlu1 %v21_v2, %s71_s8  ;;  %v15_v3 = vld [vmem:[#allocation1] sm:$0x1]  }
   0xc   :  { %v27_v4 = vld [vmem:[#allocation1] sm:$0x1]  }
   0xd   :  { %v6_v5 = vld [vmem:[#allocation1] sm:$0x1]  }
   0xe   :  { %8 = vst.msk [vmem:[#allocation0] sm:$0x1] %vm7_vm0, %v6_v5   ;;  %16 = vrot.lane.b32.xlu0 %v15_v3, %s72_s9  ;;  %v33_v6 = vld [vmem:[#allocation1] sm:$0x1]  }
   0xf   :  { %28 = vrot.lane.b32.xlu1 %v27_v4, %s73_s10  ;;  %v39_v7 = vld [vmem:[#allocation1] sm:$0x1]  }
  0x10   :  { %v45_v8 = vld [vmem:[#allocation1] sm:$0x1]  }
  0x12   :  { %34 = vrot.lane.b32.xlu0 %v33_v6, %s74_s11 }
  0x13   :  { %40 = vrot.lane.b32.xlu1 %v39_v7, %s75_s12 }
  0x16   :  { %46 = vrot.lane.b32.xlu0 %v45_v8, %s76_s13 }
  0x7c   :  { %v11_v9 = vpop.permute.xlu0 %10  }
  0x7d   :  { %v23_v10 = vpop.permute.xlu1 %22   ;;  %14 = vst.msk [vmem:[#allocation0 + $0x1] sm:$0x1] %vm7_vm0, %v11_v9  }
  0x7e   :  { %26 = vst.msk [vmem:[#allocation0 + $0x3] sm:$0x1] %vm7_vm0, %v23_v10  }
  0x80   :  { %v17_v11 = vpop.permute.xlu0 %16  }
  0x81   :  { %v29_v12 = vpop.permute.xlu1 %28   ;;  %20 = vst.msk [vmem:[#allocation0 + $0x2] sm:$0x1] %vm7_vm0, %v17_v11  }
  0x82   :  { %32 = vst.msk [vmem:[#allocation0 + $0x8] sm:$0x1] %vm7_vm0, %v29_v12  }
  0x84   :  { %v35_v13 = vpop.permute.xlu0 %34  }
  0x85   :  { %v41_v14 = vpop.permute.xlu1 %40   ;;  %38 = vst.msk [vmem:[#allocation0 + $0x9] sm:$0x1] %vm7_vm0, %v35_v13  }
  0x86   :  { %44 = vst.msk [vmem:[#allocation0 + $0xa] sm:$0x1] %vm7_vm0, %v41_v14  }
  0x88   :  { %v54_v15 = vld [vmem:[#allocation0] sm:$0xf]  ;;  %v47_v16 = vpop.permute.xlu0 %46  }
  0x89   :  { %56 = vst [vmem:[%s105_s1] sm:$0xf] %v54_v15  ;;  %50 = vst.msk [vmem:[#allocation0 + $0xb] sm:$0x1] %vm7_vm0, %v47_v16  }
  0x90   :  { %v58_v17 = vld [vmem:[#allocation0 + $0x8] sm:$0xf] }
  0x91   :  { %62 = vst [vmem:[%s105_s1 + $0x4] sm:$0xf] %v58_v17 }

// kernel: crainet_forward.7
= control target key start
LH: loop header
LB: loop body
LE: loop exit
PB: predicated region body
PF: predicated region fallthrough
CT: control target
= control target key end

     0   :  { %s706_s18 = smov 0   ;;  %s799_s0 = inlined_call_operand.vmem [shape: bf16[32,200], index: 0, kind: input, shape index: {}]   ;;  %s800_s1 = inlined_call_operand.vmem [shape: f32[32,1], index: 1, kind: input, shape index: {}]   ;;  %s801_s2 = inlined_call_operand.vmem [shape: bf16[200,16], index: 2, kind: input, shape index: {}]   ;;  %s802_s3 = inlined_call_operand.vmem [shape: f32[2,16], index: 3, kind: input, shape index: {}]   ;;  %s803_s4 = inlined_call_operand.vmem [shape: f32[32,16], index: 4, kind: output, shape index: {0}]   ;;  %s804_s5 = inlined_call_operand.vmem [shape: f32[32,1], index: 5, kind: output, shape index: {1}]  }
   0x1 LB: > { %s592_s19 = sadd.s32 4294967295, %s672_s18   ;;  %p596_p0 = scmp.ge.s32.totalorder %s672_s18, 1  ;;  %s672_s18 = sphi %s706_s18, %s16_s18  }
   0x2   : > { %p203_p1 = scmp.lt.s32.totalorder %s672_s18, 3 }
   0x4   : > { %p204_p2 = pnand %p596_p0, %p203_p1 }
   0x5   : > { %v646_v0 = vld [vmem:[%s801_s2] sm:$0xff] (!%p204_p2)   ;;  %v674_v1 = vmov (!%p204_p2), 0   ;;  %v647_v2 = vld [vmem:[%s801_s2 + $0x8] sm:$0xff] (!%p204_p2)   ;;  %s597_s24 = sshll.u32 (!%p204_p2), %s592_s19, 1  ;;  %v648_v3 = vld [vmem:[%s801_s2 + $0x10] sm:$0xff] (!%p204_p2)   ;;  %vm379_vm0 = vcmask (!%p204_p2), 588800  }
   0x6   : > { %207 = sbr.rel (%p204_p2) target bundleno = 281 (0x119), region = 36  ;;  %387 = vmatprep.subr.bf16.mxu0 (!%p204_p2), %v674_v1  ;;  %639 = vset.pattern.permute.xlu0 (!%p204_p2), %v674_v1  ;;  %p243_p3 = scmp.lt.s32.totalorder (!%p204_p2), %s597_s24, 3  ;;  %v649_v4 = vld [vmem:[%s801_s2 + $0x18] sm:$0xff] (!%p204_p2)   ;;  %v650_v6 = vld [vmem:[%s801_s2 + $0x20] sm:$0xff] (!%p204_p2)   ;;  %vm487_vm1 = vcmask (!%p204_p2), 7168   ;;  %v675_v9 = vmov (!%p204_p2), 0.0  }
   0x7   : > { %388 = vmatpush1.bf16.msra.mxu0 (!%p204_p2), %v646_v0  ;;  %645 = vset.pattern.permute.xlu1 (!%p204_p2), %v674_v1  ;;  %v651_v14 = vld [vmem:[%s801_s2 + $0x28] sm:$0xff] (!%p204_p2)   ;;  %v652_v15 = vld [vmem:[%s801_s2 + $0x30] sm:$0xff] (!%p204_p2)   ;;  %v653_v16 = vld [vmem:[%s801_s2 + $0x38] sm:$0xff] (!%p204_p2)   ;;  %vm383_vm4 = vcmask (!%p204_p2), 1043456   ;;  %vm484_vm5 = vcmask (!%p204_p2), 130048  }
   0x8   : > { %389 = vmatprep.subr.bf16.mxu0 (!%p204_p2), %v674_v1  ;;  %v654_v21 = vld [vmem:[%s801_s2 + $0x40] sm:$0xff] (!%p204_p2)   ;;  %v655_v25 = vld [vmem:[%s801_s2 + $0x48] sm:$0xff] (!%p204_p2)   ;;  %v656_v26 = vld [vmem:[%s801_s2 + $0x50] sm:$0xff] (!%p204_p2)  }
   0x9   : > { %v657_v27 = vld [vmem:[%s801_s2 + $0x58] sm:$0xff] (!%p204_p2)   ;;  %v658_v28 = vld [vmem:[%s801_s2 + $0x60] ss:$0 sps:$4 sm:$0xff] (!%p204_p2)   ;;  %v625_v41 = vld [vmem:[%s802_s3 + $0x1] ss:$0 sm:$0xff] (!%p204_p2) }
   0xa   : > { %v385_v29 = vsel (!%p204_p2), %vm383_vm4, %v658_v28, 0  ;;  %v624_v34 = vld [vmem:[%s802_s3] ss:$0 sm:$0xff] (!%p204_p2) }
   0xb   : > { %390 = vmatpush1.bf16.msra.mxu0 (!%p204_p2), %v647_v2 }
   0xc   : > { %391 = vmatprep.subr.bf16.mxu0 (!%p204_p2), %v674_v1 }
   0xd   : > { %s806_s24 = smov (!%p243_p3, %s597_s24), 3 }
   0xe   : > { %s728_s27 = sshll.u32 %s806_s24, 3 }
   0xf   : > { %392 = vmatpush1.bf16.msra.mxu0 %v648_v3  ;;  %s737_s7 = scalar_lea.vmem %s799_s0, %s728_s27  ;;  %s253_s10 = scalar_lea.vmem %s800_s1, %s728_s27 }
  0x10   : > { %393 = vmatprep.subr.bf16.mxu0 %v674_v1  ;;  %v661_v5 = vld [vmem:[%s737_s7 + $0x4] ss:$8 sps:$4 sm:$0xff]   ;;  %s265_s15 = scalar_lea.vmem %s804_s5, %s728_s27  ;;  %v659_v30 = vld [vmem:[%s737_s7] ss:$8 sps:$4 sm:$0xff]  }
  0x11   : > { %v428_v7 = vld [vmem:[%s253_s10] sm:$0xff]  ;;  %v429_v8 = vld [vmem:[%s253_s10 + $0x8] sm:$0xff]  ;;  %621 = vmatprep.mubr.msk.bf16.mxu0 %vm379_vm0, %v661_v5 }
  0x12   : > { %vm430_vm2 = vcmp.gt.f32.partialorder %v428_v7, 0.0  ;;  %vm431_vm3 = vcmp.gt.f32.partialorder %v429_v8, 0.0 }
  0x13   : > { %394 = vmatpush1.bf16.msra.mxu0 %v649_v4  ;;  %v622_v10 = vsel %vm430_vm2, 1.0, %v675_v9  ;;  %v436_v11 = vsel %vm430_vm2, %v428_v7, 1.0  ;;  %v437_v12 = vsel %vm431_vm3, %v429_v8, 1.0  ;;  %v623_v13 = vsel %vm431_vm3, 1.0, %v675_v9 }
  0x14   : > { %395 = vmatprep.subr.bf16.mxu0 %v674_v1  ;;  %662 = vrcp.f32 %v436_v11  ;;  %488 = vst.msk [vmem:[%s265_s15] sm:$0xff] %vm487_vm1, %v622_v10  ;;  %489 = vst.msk [vmem:[%s265_s15 + $0x8] sm:$0xff] %vm487_vm1, %v623_v13  ;;  %v640_v24 = vpack.i.bf16 %v623_v13, %v622_v10  ;;  %s259_s15 = scalar_lea.vmem %s803_s4, %s728_s27 }
  0x15   : > { %664 = vrcp.f32 %v437_v12 }
  0x17   : > { %396 = vmatpush1.bf16.msra.mxu0 %v650_v6 }
  0x18   : > { %397 = vmatprep.subr.bf16.mxu0 %v674_v1 }
  0x1b   : > { %398 = vmatpush1.bf16.msra.mxu0 %v651_v14 }
  0x1c   : > { %399 = vmatprep.subr.bf16.mxu0 %v674_v1 }
  0x1e   : > { %v663_v17 = vpop.eup %662 }
  0x1f   : > { %400 = vmatpush1.bf16.msra.mxu0 %v652_v15  ;;  %v665_v18 = vpop.eup %664  ;;  %v440_v19 = vmul.f32 200.0, %v663_v17 }
  0x20   : > { %401 = vmatprep.subr.bf16.mxu0 %v674_v1  ;;  %v441_v20 = vmul.f32 200.0, %v665_v18 }
  0x21   : > { %v442_v22 = vmul.f32 %v622_v10, %v440_v19 }
  0x22   : > { %v443_v23 = vmul.f32 %v623_v13, %v441_v20 }
  0x23   : > { %402 = vmatpush1.bf16.msra.mxu0 %v653_v16  ;;  %448 = vperm.xlu0 %639, %v442_v22  }
  0x24   : > { %403 = vmatprep.subr.bf16.mxu0 %v674_v1  ;;  %453 = vperm.xlu1 %645, %v443_v23  }
  0x27   : > { %404 = vmatpush1.bf16.msra.mxu0 %v654_v21  ;;  %641 = vperm.xlu0 %639, %v640_v24  }
  0x28   : > { %405 = vmatprep.subr.bf16.mxu0 %v674_v1 }
  0x2b   : > { %406 = vmatpush1.bf16.msra.mxu0 %v655_v25 }
  0x2c   : > { %407 = vmatprep.subr.bf16.mxu0 %v674_v1 }
  0x2f   : > { %408 = vmatpush1.bf16.msra.mxu0 %v656_v26 }
  0x30   : > { %409 = vmatprep.subr.bf16.mxu0 %v674_v1 }
  0x33   : > { %410 = vmatpush1.bf16.msra.mxu0 %v657_v27 }
  0x34   : > { %411 = vmatprep.subr.bf16.mxu0 %v674_v1 }
  0x37   : > { %412 = vmatpush1.bf16.msra.mxu0 %v385_v29 }
  0x3a   : > { %420 = vmatmul.mubr.bf16.vlgmr.msra.gmra.mrb[0].mxu0 %v659_v30 }
  0xa2   : > { %v449_v31 = vpop.permute.xlu0 %448 }
  0xa3   : > { %v454_v37 = vpop.permute.xlu1 %453 }
  0xa6   : > { %v642_v32 = vpop.permute.xlu0 %641 }
  0xa7   : > { %v643_v33 = vunpack.i.l.bf16 %v642_v32  ;;  %v644_v35 = vunpack.i.h.bf16 %v642_v32 }
  0xa9   : > { %v472_v38 = vmul.f32 %v643_v33, %v624_v34  ;;  %v473_v43 = vmul.f32 %v644_v35, %v624_v34 }
 0x10d   : > { %v421_v36 = vpop.f32.mrb[0].mxu0 }
 0x10e   : > { %v456_v39 = vmul.f32 %v449_v31, %v421_v36  ;;  %v423_v40 = vpop.f32.mrb[1].mxu0 }
 0x10f   : > { %v424_v42 = vpop.f32.mrb[2].mxu0 }
 0x110   : > { %v474_v44 = vadd.f32 %v472_v38, %v456_v39  ;;  %v457_v45 = vmul.f32 %v454_v37, %v424_v42  ;;  %v426_v46 = vpop.f32.mrb[3].mxu0 }
 0x112   : > { %v480_v47 = vadd.f32 %v625_v41, %v474_v44  ;;  %v475_v48 = vadd.f32 %v473_v43, %v457_v45 }
 0x114   : > { %v482_v49 = vmax.f32 %v480_v47, 0.0  ;;  %v481_v50 = vadd.f32 %v625_v41, %v475_v48 }
 0x116   : > { %485 = vst.msk [vmem:[%s259_s15] sm:$0xff] %vm484_vm5, %v482_v49  ;;  %v483_v51 = vmax.f32 %v481_v50, 0.0 }
 0x118   : > { %486 = vst.msk [vmem:[%s259_s15 + $0x8] sm:$0xff] %vm484_vm5, %v483_v51 }
 0x119 PF: > { %s16_s18 = sadd.s32 1, %s672_s18  }
 0x11a   : > { %p13_p4 = scmp.ge.s32.totalorder %s16_s18, 4  }
 0x11c   :  { %15 = sbr.rel (!%p13_p4) target bundleno = 1 (0x1), region = 81 }

// kernel: crainet_forward.8
= control target key start
LH: loop header
LB: loop body
LE: loop exit
PB: predicated region body
PF: predicated region fallthrough
CT: control target
= control target key end

     0   :  { %v218_v0 = vmov 0   ;;  %vm99_vm0 = vcmask 130048   ;;  %vm177_vm1 = vcmask 7168   ;;  %v219_v8 = vmov 0.0   ;;  %s297_s2 = inlined_call_operand.vmem [shape: bf16[144,16], index: 2, kind: input, shape index: {}]   ;;  %s298_s0 = inlined_call_operand.vmem [shape: bf16[8,144], index: 0, kind: input, shape index: {}]   ;;  %s299_s1 = inlined_call_operand.vmem [shape: f32[8,1], index: 1, kind: input, shape index: {}]   ;;  %s300_s5 = inlined_call_operand.vmem [shape: f32[8,1], index: 5, kind: output, shape index: {1}]   ;;  %s301_s3 = inlined_call_operand.vmem [shape: f32[2,16], index: 3, kind: input, shape index: {}]   ;;  %s302_s4 = inlined_call_operand.vmem [shape: f32[8,16], index: 4, kind: output, shape index: {0}]  }
   0x1   :  { %103 = vmatprep.subr.bf16.mxu0 %v218_v0  ;;  %v205_v1 = vld [vmem:[%s297_s2] sm:$0xff]   ;;  %204 = vset.pattern.permute.xlu0 %v218_v0  ;;  %v206_v2 = vld [vmem:[%s297_s2 + $0x8] sm:$0xff]   ;;  %v207_v3 = vld [vmem:[%s297_s2 + $0x10] sm:$0xff]  }
   0x2   :  { %104 = vmatpush1.bf16.msra.mxu0 %v205_v1  ;;  %v20_v4 = vld [vmem:[%s298_s0] sm:$0xff]  ;;  %v208_v6 = vld [vmem:[%s297_s2 + $0x18] sm:$0xff]   ;;  %v210_v12 = vld [vmem:[%s297_s2 + $0x28] sm:$0xff]  }
   0x3   :  { %105 = vmatprep.subr.bf16.mxu0 %v218_v0  ;;  %v143_v5 = vld [vmem:[%s299_s1] sm:$0xff]  ;;  %v188_v7 = vcombine.high %v20_v4, %v20_v4  ;;  %v211_v14 = vld [vmem:[%s297_s2 + $0x30] sm:$0xff]   ;;  %v212_v17 = vld [vmem:[%s297_s2 + $0x38] sm:$0xff]   ;;  %v187_v19 = vcombine.low %v20_v4, %v20_v4 }
   0x4   :  { %vm144_vm2 = vcmp.gt.f32.partialorder %v143_v5, 0.0  ;;  %v209_v11 = vld [vmem:[%s297_s2 + $0x20] sm:$0xff]  }
   0x5   :  { %v199_v9 = vsel %vm144_vm2, 1.0, %v219_v8  ;;  %v147_v10 = vsel %vm144_vm2, %v143_v5, 1.0  ;;  %198 = vmatprep.mubr.msk.bf16.mxu0 %vm99_vm0, %v188_v7  ;;  %v213_v18 = vld [vmem:[%s297_s2 + $0x40] sm:$0xff]  }
   0x6   :  { %106 = vmatpush1.bf16.msra.mxu0 %v206_v2  ;;  %216 = vrcp.f32 %v147_v10  ;;  %178 = vst.msk [vmem:[%s300_s5] sm:$0xff] %vm177_vm1, %v199_v9  ;;  %v200_v21 = vld [vmem:[%s301_s3] ss:$0 sm:$0xff]  ;;  %v201_v27 = vld [vmem:[%s301_s3 + $0x1] ss:$0 sm:$0xff] }
   0x7   :  { %107 = vmatprep.subr.bf16.mxu0 %v218_v0 }
   0xa   :  { %108 = vmatpush1.bf16.msra.mxu0 %v207_v3 }
   0xb   :  { %109 = vmatprep.subr.bf16.mxu0 %v218_v0 }
   0xe   :  { %110 = vmatpush1.bf16.msra.mxu0 %v208_v6 }
   0xf   :  { %111 = vmatprep.subr.bf16.mxu0 %v218_v0 }
  0x10   :  { %v217_v13 = vpop.eup %216 }
  0x11   :  { %v149_v15 = vmul.f32 144.0, %v217_v13 }
  0x12   :  { %112 = vmatpush1.bf16.msra.mxu0 %v209_v11 }
  0x13   :  { %113 = vmatprep.subr.bf16.mxu0 %v218_v0  ;;  %v150_v16 = vmul.f32 %v199_v9, %v149_v15 }
  0x15   :  { %155 = vperm.xlu0 %204, %v150_v16  }
  0x16   :  { %114 = vmatpush1.bf16.msra.mxu0 %v210_v12 }
  0x17   :  { %115 = vmatprep.subr.bf16.mxu0 %v218_v0 }
  0x19   :  { %165 = vperm.xlu0 %204, %v199_v9  }
  0x1a   :  { %116 = vmatpush1.bf16.msra.mxu0 %v211_v14 }
  0x1b   :  { %117 = vmatprep.subr.bf16.mxu0 %v218_v0 }
  0x1e   :  { %118 = vmatpush1.bf16.msra.mxu0 %v212_v17 }
  0x1f   :  { %119 = vmatprep.subr.bf16.mxu0 %v218_v0 }
  0x22   :  { %120 = vmatpush1.bf16.msra.mxu0 %v213_v18 }
  0x25   :  { %136 = vmatmul.mubr.bf16.vlgmr.msra.gmra.mrb[0].mxu0 %v187_v19 }
  0x94   :  { %v156_v20 = vpop.permute.xlu0 %155 }
  0x98   :  { %v166_v22 = vpop.permute.xlu0 %165 }
  0x99   :  { %v168_v24 = vmul.f32 %v200_v21, %v166_v22 }
  0xf8   :  { %v137_v23 = vpop.f32.mrb[0].mxu0 }
  0xf9   :  { %v158_v25 = vmul.f32 %v156_v20, %v137_v23  ;;  %v139_v26 = vpop.f32.mrb[1].mxu0 }
  0xfa   :  { %v140_v28 = vpop.f32.mrb[2].mxu0 }
  0xfb   :  { %v169_v29 = vadd.f32 %v168_v24, %v158_v25  ;;  %v141_v30 = vpop.f32.mrb[3].mxu0 }
  0xfd   :  { %v174_v31 = vadd.f32 %v201_v27, %v169_v29 }
  0xff   :  { %v175_v32 = vmax.f32 %v174_v31, 0.0 }
 0x101   :  { %176 = vst.msk [vmem:[%s302_s4] sm:$0xff] %vm99_vm0, %v175_v32 }

// kernel: crainet_forward.9
= control target key start
LH: loop header
LB: loop body
LE: loop exit
PB: predicated region body
PF: predicated region fallthrough
CT: control target
= control target key end

     0   :  { %s845_s18 = smov 0   ;;  %s938_s0 = inlined_call_operand.vmem [shape: bf16[32,288], index: 0, kind: input, shape index: {}]   ;;  %s939_s1 = inlined_call_operand.vmem [shape: f32[32,1], index: 1, kind: input, shape index: {}]   ;;  %s940_s2 = inlined_call_operand.vmem [shape: bf16[288,16], index: 2, kind: input, shape index: {}]   ;;  %s941_s3 = inlined_call_operand.vmem [shape: f32[2,16], index: 3, kind: input, shape index: {}]   ;;  %s942_s4 = inlined_call_operand.vmem [shape: f32[32,16], index: 4, kind: output, shape index: {0}]   ;;  %s943_s5 = inlined_call_operand.vmem [shape: f32[32,1], index: 5, kind: output, shape index: {1}]  }
   0x1 LB: > { %s685_s19 = sadd.s32 4294967295, %s810_s18   ;;  %p689_p0 = scmp.ge.s32.totalorder %s810_s18, 1  ;;  %s810_s18 = sphi %s845_s18, %s16_s18  }
   0x2   : > { %p203_p1 = scmp.lt.s32.totalorder %s810_s18, 3 }
   0x4   : > { %p204_p2 = pnand %p689_p0, %p203_p1 }
   0x5   : > { %v778_v0 = vld [vmem:[%s940_s2 + $0x40] sm:$0xff] (!%p204_p2)   ;;  %v812_v2 = vmov (!%p204_p2), 0.0   ;;  %s690_s24 = sshll.u32 (!%p204_p2), %s685_s19, 1  ;;  %v780_v3 = vld [vmem:[%s940_s2 + $0x48] sm:$0xff] (!%p204_p2)   ;;  %v782_v5 = vld [vmem:[%s940_s2 + $0x50] sm:$0xff] (!%p204_p2)   ;;  %vm813_vm0 = vmmov (!%p204_p2), 0  }
   0x6   : > { %207 = sbr.rel (%p204_p2) target bundleno = 267 (0x10b), region = 36  ;;  %v779_v1 = vld [vmem:[%s940_s2] sm:$0xff] (!%p204_p2)   ;;  %751 = vmatprep.subr.bf16.mxu1 (!%p204_p2), %v812_v2  ;;  %726 = vmatprep.subr.bf16.mxu0 (!%p204_p2), %v778_v0  ;;  %v781_v4 = vld [vmem:[%s940_s2 + $0x8] sm:$0xff] (!%p204_p2)   ;;  %p243_p3 = scmp.lt.s32.totalorder (!%p204_p2), %s690_s24, 3  ;;  %v783_v6 = vld [vmem:[%s940_s2 + $0x10] sm:$0xff] (!%p204_p2)   ;;  %v814_v8 = vmov (!%p204_p2), 0  }
   0x7   : > { %727 = vmatpush3.bf16.msra.mxu0 (!%p204_p2), %v779_v1  ;;  %755 = vmatprep.mubr.msk.bf16.mxu1 (!%p204_p2), %vm813_vm0, %v812_v2  ;;  %v784_v7 = vld [vmem:[%s940_s2 + $0x58] sm:$0xff] (!%p204_p2)   ;;  %v786_v10 = vld [vmem:[%s940_s2 + $0x60] sm:$0xff] (!%p204_p2)   ;;  %v788_v13 = vld [vmem:[%s940_s2 + $0x68] sm:$0xff] (!%p204_p2)   ;;  %vm431_vm1 = vcmask (!%p204_p2), 261120   ;;  %vm580_vm2 = vcmask (!%p204_p2), 7168   ;;  %vm577_vm5 = vcmask (!%p204_p2), 130048  }
   0x8   : > { %728 = vmatprep.subr.bf16.mxu0 (!%p204_p2), %v780_v3  ;;  %771 = vset.pattern.permute.xlu0 (!%p204_p2), %v814_v8  ;;  %v785_v9 = vld [vmem:[%s940_s2 + $0x18] sm:$0xff] (!%p204_p2)   ;;  %v792_v11 = vld [vmem:[%s940_s2 + $0x80] sm:$0xff] (!%p204_p2)   ;;  %v789_v14 = vld [vmem:[%s940_s2 + $0x28] sm:$0xff] (!%p204_p2)  }
   0x9   : > { %777 = vset.pattern.permute.xlu1 (!%p204_p2), %v814_v8  ;;  %v787_v12 = vld [vmem:[%s940_s2 + $0x20] sm:$0xff] (!%p204_p2)   ;;  %752 = vmatpush3.bf16.msra.mxu1 (!%p204_p2), %v792_v11  ;;  %v795_v15 = vld [vmem:[%s940_s2 + $0x88] sm:$0xff] (!%p204_p2)   ;;  %v790_v16 = vld [vmem:[%s940_s2 + $0x70] sm:$0xff] (!%p204_p2)  }
   0xa   : > { %753 = vmatprep.subr.bf16.mxu1 (!%p204_p2), %v812_v2  ;;  %v791_v24 = vld [vmem:[%s940_s2 + $0x30] sm:$0xff] (!%p204_p2)   ;;  %v793_v26 = vld [vmem:[%s940_s2 + $0x78] sm:$0xff] (!%p204_p2)   ;;  %v722_v47 = vld [vmem:[%s941_s3] ss:$0 sm:$0xff] (!%p204_p2) }
   0xb   : > { %729 = vmatpush3.bf16.msra.mxu0 (!%p204_p2), %v781_v4  ;;  %v794_v27 = vld [vmem:[%s940_s2 + $0x38] sm:$0xff] (!%p204_p2)   ;;  %v723_v56 = vld [vmem:[%s941_s3 + $0x1] ss:$0 sm:$0xff] (!%p204_p2) }
   0xc   : > { %730 = vmatprep.subr.bf16.mxu0 (!%p204_p2), %v782_v5 }
   0xd   : > { %s945_s24 = smov (!%p243_p3, %s690_s24), 3  ;;  %754 = vmatpush3.bf16.msra.mxu1 %v795_v15 }
   0xe   : > { %s759_s14 = smul.u32 12, %s945_s24  ;;  %s883_s17 = sshll.u32 %s945_s24, 3 }
   0xf   : > { %731 = vmatpush3.bf16.msra.mxu0 %v783_v6  ;;  %s253_s7 = scalar_lea.vmem %s939_s1, %s883_s17  ;;  %s265_s12 = scalar_lea.vmem %s943_s5, %s883_s17 }
  0x10   : > { %732 = vmatprep.subr.bf16.mxu0 %v784_v7  ;;  %s894_s26 = scalar_lea.vmem %s938_s0, %s759_s14  ;;  %v517_v19 = vld [vmem:[%s253_s7] sm:$0xff]  ;;  %v518_v20 = vld [vmem:[%s253_s7 + $0x8] sm:$0xff]  ;;  %s259_s27 = scalar_lea.vmem %s942_s4, %s883_s17 }
  0x11   : > { %v798_v17 = vld [vmem:[%s894_s26 + $0x4] ss:$12 sps:$4 sm:$0xff]   ;;  %v799_v18 = vld [vmem:[%s894_s26 + $0x8] ss:$12 sps:$4 sm:$0xff]   ;;  %vm519_vm3 = vcmp.gt.f32.partialorder %v517_v19, 0.0  ;;  %vm520_vm4 = vcmp.gt.f32.partialorder %v518_v20, 0.0 }
  0x12   : > { %467 = vmatprep.mubr.bf16.mxu0 %v798_v17  ;;  %v720_v21 = vsel %vm519_vm3, 1.0, %v812_v2  ;;  %v525_v22 = vsel %vm519_vm3, %v517_v19, 1.0  ;;  %v526_v23 = vsel %vm520_vm4, %v518_v20, 1.0  ;;  %756 = vmatmul.mubr.msk.bf16.vlgmr.msra.gmra.mrb[0].mxu1 %vm431_vm1, %v799_v18  ;;  %v721_v25 = vsel %vm520_vm4, 1.0, %v812_v2  ;;  %v796_v28 = vld [vmem:[%s894_s26] ss:$12 sps:$4 sm:$0xff]  }
  0x13   : > { %733 = vmatpush3.bf16.msra.mxu0 %v785_v9  ;;  %800 = vrcp.f32 %v525_v22  ;;  %581 = vst.msk [vmem:[%s265_s12] sm:$0xff] %vm580_vm2, %v720_v21  ;;  %582 = vst.msk [vmem:[%s265_s12 + $0x8] sm:$0xff] %vm580_vm2, %v721_v25  ;;  %v772_v35 = vpack.i.bf16 %v721_v25, %v720_v21 }
  0x14   : > { %734 = vmatprep.subr.bf16.mxu0 %v786_v10  ;;  %802 = vrcp.f32 %v526_v23 }
  0x17   : > { %735 = vmatpush3.bf16.msra.mxu0 %v787_v12 }
  0x18   : > { %736 = vmatprep.subr.bf16.mxu0 %v788_v13 }
  0x1b   : > { %737 = vmatpush3.bf16.msra.mxu0 %v789_v14 }
  0x1c   : > { %738 = vmatprep.subr.bf16.mxu0 %v790_v16 }
  0x1d   : > { %v801_v29 = vpop.eup %800 }
  0x1e   : > { %v803_v30 = vpop.eup %802  ;;  %v529_v31 = vmul.f32 288.0, %v801_v29 }
  0x1f   : > { %739 = vmatpush3.bf16.msra.mxu0 %v791_v24  ;;  %v530_v32 = vmul.f32 288.0, %v803_v30 }
  0x20   : > { %740 = vmatprep.subr.bf16.mxu0 %v793_v26  ;;  %v531_v33 = vmul.f32 %v720_v21, %v529_v31 }
  0x21   : > { %v532_v34 = vmul.f32 %v721_v25, %v530_v32 }
  0x22   : > { %537 = vperm.xlu0 %771, %v531_v33  }
  0x23   : > { %741 = vmatpush3.bf16.msra.mxu0 %v794_v27  ;;  %542 = vperm.xlu1 %777, %v532_v34  }
  0x26   : > { %468 = vmatmul.mubr.bf16.vlgmr.msra.gmra.mrb[0].mxu0 %v796_v28  ;;  %773 = vperm.xlu0 %771, %v772_v35  }
  0xa1   : > { %v538_v40 = vpop.permute.xlu0 %537 }
  0xa2   : > { %v543_v52 = vpop.permute.xlu1 %542 }
  0xa5   : > { %v774_v41 = vpop.permute.xlu0 %773 }
  0xa6   : > { %v775_v44 = vunpack.i.l.bf16 %v774_v41  ;;  %v776_v49 = vunpack.i.h.bf16 %v774_v41 }
  0xa8   : > { %v561_v53 = vmul.f32 %v775_v44, %v722_v47  ;;  %v562_v57 = vmul.f32 %v776_v49, %v722_v47 }
  0xe5   : > { %v510_v36 = vpop.f32.mrb[0].mxu1 }
  0xe6   : > { %v757_v37 = vpop.f32.mrb[1].mxu1 }
  0xe7   : > { %v513_v38 = vpop.f32.mrb[2].mxu1 }
  0xe8   : > { %v758_v39 = vpop.f32.mrb[3].mxu1 }
  0xf9   : > { %v742_v42 = vpop.f32.mrb[0].mxu0 }
  0xfa   : > { %v743_v43 = vpop.f32.mrb[1].mxu0 }
  0xfb   : > { %v744_v45 = vadd.f32 %v743_v43, %v742_v42  ;;  %v745_v46 = vpop.f32.mrb[2].mxu0 }
  0xfc   : > { %v746_v48 = vpop.f32.mrb[3].mxu0 }
  0xfd   : > { %v511_v50 = vadd.f32 %v744_v45, %v510_v36  ;;  %v747_v51 = vadd.f32 %v746_v48, %v745_v46 }
  0xff   : > { %v545_v54 = vmul.f32 %v538_v40, %v511_v50  ;;  %v514_v55 = vadd.f32 %v747_v51, %v513_v38 }
 0x101   : > { %v563_v58 = vadd.f32 %v561_v53, %v545_v54  ;;  %v546_v59 = vmul.f32 %v543_v52, %v514_v55 }
 0x103   : > { %v564_v60 = vadd.f32 %v562_v57, %v546_v59  ;;  %v569_v61 = vadd.f32 %v723_v56, %v563_v58 }
 0x105   : > { %v570_v62 = vadd.f32 %v723_v56, %v564_v60  ;;  %vm571_vm6 = vcmp.gt.f32.partialorder %v569_v61, 0.0  ;;  %v573_v63 = vmul.f32 0.01, %v569_v61 }
 0x107   : > { %vm572_vm7 = vcmp.gt.f32.partialorder %v570_v62, 0.0  ;;  %v574_v0 = vmul.f32 0.01, %v570_v62  ;;  %v575_v1 = vsel %vm571_vm6, %v569_v61, %v573_v63 }
 0x108   : > { %578 = vst.msk [vmem:[%s259_s27] sm:$0xff] %vm577_vm5, %v575_v1 }
 0x109   : > { %v576_v2 = vsel %vm572_vm7, %v570_v62, %v574_v0 }
 0x10a   : > { %579 = vst.msk [vmem:[%s259_s27 + $0x8] sm:$0xff] %vm577_vm5, %v576_v2 }
 0x10b PF: > { %s16_s18 = sadd.s32 1, %s810_s18  }
 0x10c   : > { %p13_p4 = scmp.ge.s32.totalorder %s16_s18, 4  }
 0x10e   :  { %15 = sbr.rel (!%p13_p4) target bundleno = 1 (0x1), region = 81 }

// kernel: crainet_forward.10
= control target key start
LH: loop header
LB: loop body
LE: loop exit
PB: predicated region body
PF: predicated region fallthrough
CT: control target
= control target key end

     0   :  { %s1027_s18 = smov 0   ;;  %s1256_s0 = inlined_call_operand.vmem [shape: bf16[128,216], index: 0, kind: input, shape index: {}]   ;;  %s1257_s1 = inlined_call_operand.vmem [shape: f32[128,1], index: 1, kind: input, shape index: {}]   ;;  %s1258_s2 = inlined_call_operand.vmem [shape: bf16[216,8], index: 2, kind: input, shape index: {}]   ;;  %s1259_s3 = inlined_call_operand.vmem [shape: f32[2,8], index: 3, kind: input, shape index: {}]   ;;  %s1260_s4 = inlined_call_operand.vmem [shape: f32[128,8], index: 4, kind: output, shape index: {0}]   ;;  %s1261_s5 = inlined_call_operand.vmem [shape: f32[128,1], index: 5, kind: output, shape index: {1}]  }
   0x1 LB: > { %s832_s19 = sadd.s32 4294967295, %s993_s18   ;;  %p836_p0 = scmp.ge.s32.totalorder %s993_s18, 1  ;;  %s993_s18 = sphi %s1027_s18, %s16_s18  }
   0x2   : > { %p203_p1 = scmp.lt.s32.totalorder %s993_s18, 3 }
   0x4   : > { %p204_p2 = pnand %p836_p0, %p203_p1 }
   0x5   : > { %v945_v0 = vld [vmem:[%s1258_s2] sm:$0xff] (!%p204_p2)   ;;  %v995_v1 = vmov (!%p204_p2), 0   ;;  %v946_v2 = vld [vmem:[%s1258_s2 + $0x8] sm:$0xff] (!%p204_p2)   ;;  %s837_s24 = sshll.u32 (!%p204_p2), %s832_s19, 3  ;;  %v947_v3 = vld [vmem:[%s1258_s2 + $0x10] sm:$0xff] (!%p204_p2)   ;;  %vm420_vm0 = vcmask (!%p204_p2), 719872  }
   0x6   : > { %207 = sbr.rel (%p204_p2) target bundleno = 296 (0x128), region = 36  ;;  %437 = vmatprep.subr.bf16.mxu0 (!%p204_p2), %v995_v1  ;;  %885 = vmatprep.subr.bf16.mxu1 (!%p204_p2), %v995_v1  ;;  %p243_p3 = scmp.lt.s32.totalorder (!%p204_p2), %s837_s24, 15  ;;  %v948_v4 = vld [vmem:[%s1258_s2 + $0x18] sm:$0xff] (!%p204_p2)   ;;  %v949_v5 = vld [vmem:[%s1258_s2 + $0x20] sm:$0xff] (!%p204_p2)   ;;  %v950_v8 = vld [vmem:[%s1258_s2 + $0x28] sm:$0xff] (!%p204_p2)   ;;  %vm721_vm1 = vcmask (!%p204_p2), 7168  }
   0x7   : > { %438 = vmatpush1.bf16.msra.mxu0 (!%p204_p2), %v945_v0  ;;  %899 = vmatpush1.bf16.msra.mxu1 (!%p204_p2), %v945_v0  ;;  %v996_v13 = vmov (!%p204_p2), 0.0   ;;  %v951_v20 = vld [vmem:[%s1258_s2 + $0x30] sm:$0xff] (!%p204_p2)   ;;  %v952_v32 = vld [vmem:[%s1258_s2 + $0x38] sm:$0xff] (!%p204_p2)   ;;  %v953_v38 = vld [vmem:[%s1258_s2 + $0x40] sm:$0xff] (!%p204_p2)   ;;  %vm433_vm10 = vcmask (!%p204_p2), 1043456   ;;  %vm712_vm11 = vcmask (!%p204_p2), 64512  }
   0x8   : > { %439 = vmatprep.subr.bf16.mxu0 (!%p204_p2), %v995_v1  ;;  %886 = vmatprep.subr.bf16.mxu1 (!%p204_p2), %v995_v1  ;;  %v954_v43 = vld [vmem:[%s1258_s2 + $0x48] sm:$0xff] (!%p204_p2)   ;;  %v955_v55 = vld [vmem:[%s1258_s2 + $0x50] sm:$0xff] (!%p204_p2)   ;;  %v956_v61 = vld [vmem:[%s1258_s2 + $0x58] sm:$0xff] (!%p204_p2)  }
   0x9   : > { %929 = vset.pattern.permute.xlu1 (!%p204_p2), %v995_v1  ;;  %923 = vset.pattern.permute.xlu0 (!%p204_p2), %v995_v1 }
   0xb   : > { %440 = vmatpush1.bf16.msra.mxu0 (!%p204_p2), %v946_v2  ;;  %900 = vmatpush1.bf16.msra.mxu1 (!%p204_p2), %v946_v2  ;;  %v957_v2 = vld [vmem:[%s1258_s2 + $0x60] sm:$0xff] (!%p204_p2)  }
   0xc   : > { %441 = vmatprep.subr.bf16.mxu0 (!%p204_p2), %v995_v1  ;;  %887 = vmatprep.subr.bf16.mxu1 (!%p204_p2), %v995_v1 }
   0xd   : > { %s1263_s24 = smov (!%p243_p3, %s837_s24), 15 }
   0xe   : > { %s1052_s27 = sshll.u32 %s1263_s24, 3 }
   0xf   : > { %442 = vmatpush1.bf16.msra.mxu0 %v947_v3  ;;  %901 = vmatpush1.bf16.msra.mxu1 %v947_v3  ;;  %s1063_s7 = scalar_lea.vmem %s1256_s0, %s1052_s27  ;;  %s1077_s12 = scalar_lea.vmem %s1257_s1, %s1052_s27  ;;  %v958_v3 = vld [vmem:[%s1258_s2 + $0x68] ss:$0 sps:$4 sm:$0xff]  }
  0x10   : > { %443 = vmatprep.subr.bf16.mxu0 %v995_v1  ;;  %888 = vmatprep.subr.bf16.mxu1 %v995_v1  ;;  %v961_v6 = vld [vmem:[%s1063_s7 + $0x4] ss:$8 sps:$4 sm:$0xff]   ;;  %s1088_s17 = scalar_lea.vmem %s1261_s5, %s1052_s27  ;;  %v504_v9 = vld [vmem:[%s1077_s12 + $0x10] sm:$0xff]  ;;  %v505_v10 = vld [vmem:[%s1077_s12 + $0x18] sm:$0xff] }
  0x11   : > { %868 = vmatprep.mubr.msk.bf16.mxu0 %vm420_vm0, %v961_v6  ;;  %v964_v7 = vld [vmem:[%s1063_s7 + $0x24] ss:$8 sps:$4 sm:$0xff]   ;;  %vm512_vm2 = vcmp.gt.f32.partialorder %v504_v9, 0.0  ;;  %vm513_vm3 = vcmp.gt.f32.partialorder %v505_v10, 0.0  ;;  %v509_v26 = vld [vmem:[%s1077_s12 + $0x38] sm:$0xff]  ;;  %v508_v27 = vld [vmem:[%s1077_s12 + $0x30] sm:$0xff] }
  0x12   : > { %v502_v11 = vld [vmem:[%s1077_s12] sm:$0xff]  ;;  %870 = vmatprep.mubr.msk.bf16.mxu1 %vm420_vm0, %v964_v7  ;;  %v503_v12 = vld [vmem:[%s1077_s12 + $0x8] sm:$0xff]  ;;  %v1095_v14 = vsel %vm512_vm2, 1.0, %v996_v13  ;;  %v1097_v15 = vsel %vm513_vm3, 1.0, %v996_v13  ;;  %v536_v16 = vsel %vm512_vm2, %v504_v9, 1.0  ;;  %v537_v17 = vsel %vm513_vm3, %v505_v10, 1.0 }
  0x13   : > { %444 = vmatpush1.bf16.msra.mxu0 %v948_v4  ;;  %902 = vmatpush1.bf16.msra.mxu1 %v948_v4  ;;  %vm510_vm4 = vcmp.gt.f32.partialorder %v502_v11, 0.0  ;;  %v507_v18 = vld [vmem:[%s1077_s12 + $0x28] sm:$0xff]  ;;  %v506_v19 = vld [vmem:[%s1077_s12 + $0x20] sm:$0xff]  ;;  %971 = vrcp.f32 %v536_v16  ;;  %725 = vst.msk [vmem:[%s1088_s17 + $0x18] sm:$0xff] %vm721_vm1, %v1097_v15  ;;  %v930_v21 = vpack.i.bf16 %v1097_v15, %v1095_v14  ;;  %724 = vst.msk [vmem:[%s1088_s17 + $0x10] sm:$0xff] %vm721_vm1, %v1095_v14  ;;  %vm511_vm5 = vcmp.gt.f32.partialorder %v503_v12, 0.0 }
  0x14   : > { %445 = vmatprep.subr.bf16.mxu0 %v995_v1  ;;  %889 = vmatprep.subr.bf16.mxu1 %v995_v1  ;;  %v1113_v22 = vsel %vm510_vm4, 1.0, %v996_v13  ;;  %973 = vrcp.f32 %v537_v17  ;;  %v1117_v23 = vsel %vm511_vm5, 1.0, %v996_v13  ;;  %v534_v24 = vsel %vm510_vm4, %v502_v11, 1.0  ;;  %v962_v9 = vld [vmem:[%s1063_s7 + $0x20] ss:$8 sps:$4 sm:$0xff]  }
  0x15   : > { %v535_v25 = vsel %vm511_vm5, %v503_v12, 1.0  ;;  %722 = vst.msk [vmem:[%s1088_s17] sm:$0xff] %vm721_vm1, %v1113_v22  ;;  %931 = vperm.xlu1 %929, %v930_v21   ;;  %975 = vrcp.f32 %v534_v24  ;;  %723 = vst.msk [vmem:[%s1088_s17 + $0x8] sm:$0xff] %vm721_vm1, %v1117_v23  ;;  %v924_v28 = vpack.i.bf16 %v1117_v23, %v1113_v22  ;;  %vm515_vm6 = vcmp.gt.f32.partialorder %v507_v18, 0.0  ;;  %v965_v10 = vld [vmem:[%s1063_s7 + $0x14] ss:$8 sps:$4 sm:$0xff]  }
  0x16   : > { %vm514_vm7 = vcmp.gt.f32.partialorder %v506_v19, 0.0  ;;  %977 = vrcp.f32 %v535_v25  ;;  %v1130_v29 = vsel %vm515_vm6, 1.0, %v996_v13  ;;  %v539_v30 = vsel %vm515_vm6, %v507_v18, 1.0  ;;  %v967_v11 = vld [vmem:[%s1063_s7 + $0x34] ss:$8 sps:$4 sm:$0xff]  }
  0x17   : > { %446 = vmatpush1.bf16.msra.mxu0 %v949_v5  ;;  %903 = vmatpush1.bf16.msra.mxu1 %v949_v5  ;;  %v1132_v31 = vsel %vm514_vm7, 1.0, %v996_v13  ;;  %979 = vrcp.f32 %v539_v30  ;;  %727 = vst.msk [vmem:[%s1088_s17 + $0x28] sm:$0xff] %vm721_vm1, %v1130_v29  ;;  %v538_v33 = vsel %vm514_vm7, %v506_v19, 1.0  ;;  %vm517_vm8 = vcmp.gt.f32.partialorder %v509_v26, 0.0  ;;  %v970_v12 = vld [vmem:[%s1063_s7 + $0x30] ss:$8 sps:$4 sm:$0xff]  }
  0x18   : > { %447 = vmatprep.subr.bf16.mxu0 %v995_v1  ;;  %890 = vmatprep.subr.bf16.mxu1 %v995_v1  ;;  %726 = vst.msk [vmem:[%s1088_s17 + $0x20] sm:$0xff] %vm721_vm1, %v1132_v31  ;;  %vm516_vm9 = vcmp.gt.f32.partialorder %v508_v27, 0.0  ;;  %981 = vrcp.f32 %v538_v33  ;;  %v1145_v34 = vsel %vm517_vm8, 1.0, %v996_v13  ;;  %v541_v35 = vsel %vm517_vm8, %v509_v26, 1.0  ;;  %v880_v26 = vld [vmem:[%s1259_s3] ss:$0 sm:$0xff] }
  0x19   : > { %v1147_v36 = vsel %vm516_vm9, 1.0, %v996_v13  ;;  %925 = vperm.xlu0 %923, %v924_v28   ;;  %983 = vrcp.f32 %v541_v35  ;;  %729 = vst.msk [vmem:[%s1088_s17 + $0x38] sm:$0xff] %vm721_vm1, %v1145_v34  ;;  %v540_v37 = vsel %vm516_vm9, %v508_v27, 1.0  ;;  %v435_v6 = vsel %vm433_vm10, %v958_v3, 0 }
  0x1a   : > { %728 = vst.msk [vmem:[%s1088_s17 + $0x30] sm:$0xff] %vm721_vm1, %v1147_v36  ;;  %985 = vrcp.f32 %v540_v37  ;;  %v940_v5 = vpack.i.bf16 %v1145_v34, %v1147_v36  ;;  %v935_v7 = vpack.i.bf16 %v1130_v29, %v1132_v31  ;;  %s1227_s17 = scalar_lea.vmem %s1260_s4, %s1052_s27 }
  0x1b   : > { %448 = vmatpush1.bf16.msra.mxu0 %v950_v8  ;;  %904 = vmatpush1.bf16.msra.mxu1 %v950_v8  ;;  %v959_v8 = vld [vmem:[%s1063_s7] ss:$8 sps:$4 sm:$0xff]  }
  0x1c   : > { %449 = vmatprep.subr.bf16.mxu0 %v995_v1  ;;  %891 = vmatprep.subr.bf16.mxu1 %v995_v1 }
  0x1d   : > { %v972_v39 = vpop.eup %971 }
  0x1e   : > { %v974_v40 = vpop.eup %973  ;;  %v552_v41 = vmul.f32 216.0, %v972_v39 }
  0x1f   : > { %450 = vmatpush1.bf16.msra.mxu0 %v951_v20  ;;  %905 = vmatpush1.bf16.msra.mxu1 %v951_v20  ;;  %v976_v42 = vpop.eup %975  ;;  %v553_v44 = vmul.f32 216.0, %v974_v40  ;;  %v1217_v40 = vld [vmem:[%s1259_s3 + $0x1] ss:$0 sm:$0xff] }
  0x20   : > { %451 = vmatprep.subr.bf16.mxu0 %v995_v1  ;;  %892 = vmatprep.subr.bf16.mxu1 %v995_v1  ;;  %v978_v45 = vpop.eup %977  ;;  %v560_v46 = vmul.f32 %v1095_v14, %v552_v41  ;;  %v550_v47 = vmul.f32 216.0, %v976_v42 }
  0x21   : > { %v980_v48 = vpop.eup %979  ;;  %v551_v49 = vmul.f32 216.0, %v978_v45  ;;  %v561_v52 = vmul.f32 %v1097_v15, %v553_v44 }
  0x22   : > { %v982_v50 = vpop.eup %981  ;;  %580 = vperm.xlu1 %929, %v560_v46   ;;  %v558_v51 = vmul.f32 %v1113_v22, %v550_v47  ;;  %v555_v53 = vmul.f32 216.0, %v980_v48 }
  0x23   : > { %452 = vmatpush1.bf16.msra.mxu0 %v952_v32  ;;  %906 = vmatpush1.bf16.msra.mxu1 %v952_v32  ;;  %v984_v54 = vpop.eup %983  ;;  %v559_v56 = vmul.f32 %v1117_v23, %v551_v49  ;;  %v554_v57 = vmul.f32 216.0, %v982_v50 }
  0x24   : > { %453 = vmatprep.subr.bf16.mxu0 %v995_v1  ;;  %893 = vmatprep.subr.bf16.mxu1 %v995_v1  ;;  %v986_v58 = vpop.eup %985  ;;  %v563_v59 = vmul.f32 %v1130_v29, %v555_v53  ;;  %v557_v60 = vmul.f32 216.0, %v984_v54 }
  0x25   : > { %570 = vperm.xlu0 %923, %v558_v51   ;;  %v562_v62 = vmul.f32 %v1132_v31, %v554_v57  ;;  %v556_v63 = vmul.f32 216.0, %v986_v58 }
  0x26   : > { %585 = vperm.xlu1 %929, %v561_v52   ;;  %v565_v0 = vmul.f32 %v1145_v34, %v557_v60 }
  0x27   : > { %454 = vmatpush1.bf16.msra.mxu0 %v953_v38  ;;  %907 = vmatpush1.bf16.msra.mxu1 %v953_v38  ;;  %v564_v4 = vmul.f32 %v1147_v36, %v556_v63 }
  0x28   : > { %455 = vmatprep.subr.bf16.mxu0 %v995_v1  ;;  %894 = vmatprep.subr.bf16.mxu1 %v995_v1 }
  0x29   : > { %575 = vperm.xlu0 %923, %v559_v56  }
  0x2a   : > { %595 = vperm.xlu1 %929, %v563_v59  }
  0x2b   : > { %456 = vmatpush1.bf16.msra.mxu0 %v954_v43  ;;  %908 = vmatpush1.bf16.msra.mxu1 %v954_v43 }
  0x2c   : > { %457 = vmatprep.subr.bf16.mxu0 %v995_v1  ;;  %895 = vmatprep.subr.bf16.mxu1 %v995_v1 }
  0x2d   : > { %590 = vperm.xlu0 %923, %v562_v62  }
  0x2e   : > { %605 = vperm.xlu1 %929, %v565_v0  }
  0x2f   : > { %458 = vmatpush1.bf16.msra.mxu0 %v955_v55  ;;  %909 = vmatpush1.bf16.msra.mxu1 %v955_v55 }
  0x30   : > { %459 = vmatprep.subr.bf16.mxu0 %v995_v1  ;;  %896 = vmatprep.subr.bf16.mxu1 %v995_v1 }
  0x31   : > { %600 = vperm.xlu0 %923, %v564_v4  }
  0x32   : > { %941 = vperm.xlu1 %929, %v940_v5  }
  0x33   : > { %460 = vmatpush1.bf16.msra.mxu0 %v956_v61  ;;  %910 = vmatpush1.bf16.msra.mxu1 %v956_v61 }
  0x34   : > { %461 = vmatprep.subr.bf16.mxu0 %v995_v1  ;;  %897 = vmatprep.subr.bf16.mxu1 %v995_v1 }
  0x35   : > { %936 = vperm.xlu0 %923, %v935_v7  }
  0x37   : > { %462 = vmatpush1.bf16.msra.mxu0 %v957_v2  ;;  %911 = vmatpush1.bf16.msra.mxu1 %v957_v2 }
  0x38   : > { %463 = vmatprep.subr.bf16.mxu0 %v995_v1  ;;  %898 = vmatprep.subr.bf16.mxu1 %v995_v1  ;;  %v969_v1 = vld [vmem:[%s1063_s7 + $0x10] ss:$8 sps:$4 sm:$0xff]  }
  0x3b   : > { %464 = vmatpush1.bf16.msra.mxu0 %v435_v6  ;;  %912 = vmatpush1.bf16.msra.mxu1 %v435_v6 }
  0x3e   : > { %470 = vmatmul.mubr.bf16.vlgmr.msra.gmra.mrb[0].mxu0 %v959_v8  ;;  %486 = vmatmul.mubr.bf16.vlgmr.msra.gmra.mrb[0].mxu1 %v962_v9 }
  0x3f   : > { %869 = vmatprep.mubr.msk.bf16.mxu0 %vm420_vm0, %v965_v10  ;;  %871 = vmatprep.mubr.msk.bf16.mxu1 %vm420_vm0, %v967_v11 }
  0x46   : > { %478 = vmatmul.mubr.bf16.gmra.mrb[4].mxu0 %v969_v1  ;;  %494 = vmatmul.mubr.bf16.gmra.mrb[4].mxu1 %v970_v12 }
  0x94   : > { %v1205_v14 = vpop.permute.xlu1 %931 }
  0x95   : > { %v933_v49 = vunpack.i.l.bf16 %v1205_v14  ;;  %v934_v55 = vunpack.i.h.bf16 %v1205_v14 }
  0x97   : > { %v662_v59 = vmul.f32 %v933_v49, %v880_v26  ;;  %v663_v10 = vmul.f32 %v934_v55, %v880_v26 }
  0x98   : > { %v926_v13 = vpop.permute.xlu0 %925 }
  0x99   : > { %v927_v24 = vunpack.i.l.bf16 %v926_v13  ;;  %v928_v27 = vunpack.i.h.bf16 %v926_v13 }
  0x9b   : > { %v660_v32 = vmul.f32 %v927_v24, %v880_v26  ;;  %v661_v38 = vmul.f32 %v928_v27, %v880_v26 }
  0xa1   : > { %v581_v16 = vpop.permute.xlu1 %580 }
  0xa4   : > { %v571_v15 = vpop.permute.xlu0 %570 }
  0xa5   : > { %v1207_v18 = vpop.permute.xlu1 %585 }
  0xa8   : > { %v576_v17 = vpop.permute.xlu0 %575 }
  0xa9   : > { %v596_v20 = vpop.permute.xlu1 %595 }
  0xac   : > { %v591_v19 = vpop.permute.xlu0 %590 }
  0xad   : > { %v1209_v22 = vpop.permute.xlu1 %605 }
  0xb0   : > { %v601_v21 = vpop.permute.xlu0 %600 }
  0xb1   : > { %v942_v29 = vpop.permute.xlu1 %941 }
  0xb2   : > { %v943_v50 = vunpack.i.l.bf16 %v942_v29  ;;  %v944_v56 = vunpack.i.h.bf16 %v942_v29 }
  0xb4   : > { %v937_v23 = vpop.permute.xlu0 %936  ;;  %v666_v60 = vmul.f32 %v943_v50, %v880_v26  ;;  %v667_v11 = vmul.f32 %v944_v56, %v880_v26 }
  0xb5   : > { %v938_v25 = vunpack.i.l.bf16 %v937_v23  ;;  %v939_v28 = vunpack.i.h.bf16 %v937_v23 }
  0xb7   : > { %v664_v33 = vmul.f32 %v938_v25, %v880_v26  ;;  %v665_v39 = vmul.f32 %v939_v28, %v880_v26 }
 0x111   : > { %v471_v30 = vpop.f32.mrb[0].mxu0  ;;  %v487_v31 = vpop.f32.mrb[0].mxu1 }
 0x112   : > { %v608_v34 = vmul.f32 %v571_v15, %v471_v30  ;;  %v612_v35 = vmul.f32 %v591_v19, %v487_v31  ;;  %v473_v36 = vpop.f32.mrb[1].mxu0  ;;  %v489_v37 = vpop.f32.mrb[1].mxu1 }
 0x113   : > { %v474_v41 = vpop.f32.mrb[2].mxu0  ;;  %v490_v42 = vpop.f32.mrb[2].mxu1 }
 0x114   : > { %v668_v43 = vadd.f32 %v660_v32, %v608_v34  ;;  %v672_v44 = vadd.f32 %v664_v33, %v612_v35  ;;  %v609_v45 = vmul.f32 %v576_v17, %v474_v41  ;;  %v613_v46 = vmul.f32 %v596_v20, %v490_v42  ;;  %v476_v47 = vpop.f32.mrb[3].mxu0  ;;  %v492_v48 = vpop.f32.mrb[3].mxu1 }
 0x116   : > { %v680_v51 = vadd.f32 %v1217_v40, %v668_v43  ;;  %v684_v52 = vadd.f32 %v1217_v40, %v672_v44  ;;  %v669_v53 = vadd.f32 %v661_v38, %v609_v45  ;;  %v673_v54 = vadd.f32 %v665_v39, %v613_v46 }
 0x118   : > { %vm688_vm12 = vcmp.gt.f32.partialorder %v680_v51, 0.0  ;;  %v696_v57 = vmul.f32 0.01, %v680_v51  ;;  %vm692_vm13 = vcmp.gt.f32.partialorder %v684_v52, 0.0  ;;  %v700_v58 = vmul.f32 0.01, %v684_v52 }
 0x119   : > { %v681_v61 = vadd.f32 %v1217_v40, %v669_v53  ;;  %v685_v62 = vadd.f32 %v1217_v40, %v673_v54  ;;  %v479_v63 = vpop.f32.mrb[4].mxu0  ;;  %v495_v0 = vpop.f32.mrb[4].mxu1 }
 0x11a   : > { %v704_v2 = vsel %vm688_vm12, %v680_v51, %v696_v57  ;;  %v708_v3 = vsel %vm692_vm13, %v684_v52, %v700_v58  ;;  %v610_v4 = vmul.f32 %v581_v16, %v479_v63  ;;  %v614_v5 = vmul.f32 %v601_v21, %v495_v0  ;;  %v481_v6 = vpop.f32.mrb[5].mxu0  ;;  %v497_v7 = vpop.f32.mrb[5].mxu1 }
 0x11b   : > { %713 = vst.msk [vmem:[%s1227_s17] sm:$0xff] %vm712_vm11, %v704_v2  ;;  %717 = vst.msk [vmem:[%s1227_s17 + $0x20] sm:$0xff] %vm712_vm11, %v708_v3  ;;  %vm689_vm14 = vcmp.gt.f32.partialorder %v681_v61, 0.0  ;;  %v697_v8 = vmul.f32 0.01, %v681_v61  ;;  %vm693_vm15 = vcmp.gt.f32.partialorder %v685_v62, 0.0 }
 0x11c   : > { %v701_v9 = vmul.f32 0.01, %v685_v62  ;;  %v670_v1 = vadd.f32 %v662_v59, %v610_v4  ;;  %v674_v12 = vadd.f32 %v666_v60, %v614_v5  ;;  %v482_v13 = vpop.f32.mrb[6].mxu0  ;;  %v498_v14 = vpop.f32.mrb[6].mxu1 }
 0x11d   : > { %v705_v15 = vsel %vm689_vm14, %v681_v61, %v697_v8  ;;  %v611_v17 = vmul.f32 %v1207_v18, %v482_v13  ;;  %v615_v19 = vmul.f32 %v1209_v22, %v498_v14  ;;  %v484_v20 = vpop.f32.mrb[7].mxu0  ;;  %v500_v21 = vpop.f32.mrb[7].mxu1 }
 0x11e   : > { %v709_v16 = vsel %vm693_vm15, %v685_v62, %v701_v9  ;;  %714 = vst.msk [vmem:[%s1227_s17 + $0x8] sm:$0xff] %vm712_vm11, %v705_v15  ;;  %v682_v23 = vadd.f32 %v1217_v40, %v670_v1  ;;  %v686_v24 = vadd.f32 %v1217_v40, %v674_v12 }
 0x11f   : > { %718 = vst.msk [vmem:[%s1227_s17 + $0x28] sm:$0xff] %vm712_vm11, %v709_v16  ;;  %v671_v25 = vadd.f32 %v663_v10, %v611_v17  ;;  %v675_v26 = vadd.f32 %v667_v11, %v615_v19 }
 0x120   : > { %vm690_vm0 = vcmp.gt.f32.partialorder %v682_v23, 0.0  ;;  %v698_v27 = vmul.f32 0.01, %v682_v23  ;;  %vm694_vm1 = vcmp.gt.f32.partialorder %v686_v24, 0.0  ;;  %v702_v18 = vmul.f32 0.01, %v686_v24 }
 0x121   : > { %v683_v22 = vadd.f32 %v1217_v40, %v671_v25  ;;  %v687_v28 = vadd.f32 %v1217_v40, %v675_v26 }
 0x122   : > { %v706_v29 = vsel %vm690_vm0, %v682_v23, %v698_v27  ;;  %v710_v30 = vsel %vm694_vm1, %v686_v24, %v702_v18 }
 0x123   : > { %715 = vst.msk [vmem:[%s1227_s17 + $0x10] sm:$0xff] %vm712_vm11, %v706_v29  ;;  %719 = vst.msk [vmem:[%s1227_s17 + $0x30] sm:$0xff] %vm712_vm11, %v710_v30  ;;  %vm691_vm2 = vcmp.gt.f32.partialorder %v683_v22, 0.0  ;;  %v699_v31 = vmul.f32 0.01, %v683_v22  ;;  %vm695_vm3 = vcmp.gt.f32.partialorder %v687_v28, 0.0 }
 0x124   : > { %v703_v32 = vmul.f32 0.01, %v687_v28 }
 0x125   : > { %v707_v33 = vsel %vm691_vm2, %v683_v22, %v699_v31 }
 0x126   : > { %v711_v34 = vsel %vm695_vm3, %v687_v28, %v703_v32  ;;  %716 = vst.msk [vmem:[%s1227_s17 + $0x18] sm:$0xff] %vm712_vm11, %v707_v33 }
 0x127   : > { %720 = vst.msk [vmem:[%s1227_s17 + $0x38] sm:$0xff] %vm712_vm11, %v711_v34 }
 0x128 PF: > { %s16_s18 = sadd.s32 1, %s993_s18  }
 0x129   : > { %p13_p4 = scmp.ge.s32.totalorder %s16_s18, 4  }
 0x12b   :  { %15 = sbr.rel (!%p13_p4) target bundleno = 1 (0x1), region = 81 }

// kernel: crainet_forward.11
= control target key start
LH: loop header
LB: loop body
LE: loop exit
PB: predicated region body
PF: predicated region fallthrough
CT: control target
= control target key end

     0   :  { %11 = vsyncpa [#allocation3], 0  ;;  %s2435_s0 = inlined_call_operand.vmem [shape: bf16[512,81], index: 0, kind: input, shape index: {}]   ;;  %s2436_s1 = inlined_call_operand.vmem [shape: f32[512,1], index: 1, kind: input, shape index: {}]   ;;  %s2437_s2 = inlined_call_operand.vmem [shape: bf16[81,1], index: 2, kind: input, shape index: {}]   ;;  %s2438_s3 = inlined_call_operand.vmem [shape: f32[2,1], index: 3, kind: input, shape index: {}]   ;;  %s2439_s4 = inlined_call_operand.vmem [shape: f32[512,1], index: 4, kind: output, shape index: {0}]   ;;  %s2440_s5 = inlined_call_operand.hbm [shape: f32[512,1], index: 5, kind: output, shape index: {1}]  }
   0x1   :  { %13 = vsyncpa [#allocation3 + $0x1], 0  ;;  %s1611_s18 = smov 0   ;;  %s1613_s19 = smov 0  }
   0x2   :  { %s1615_s20 = smov 0   ;;  %s1617_s21 = smov 0  }
   0x3 LB: > { %s1632_s22 = sadd.s32 4294967295, %s1574_s21   ;;  %s1216_s23 = sadd.s32 4294967294, %s1574_s21   ;;  %s1574_s21 = sphi %s1617_s21, %s2481_s21   ;;  %s1570_s20 = sphi %s1615_s20, %s2480_s20   ;;  %s1566_s19 = sphi %s1613_s19, %s2479_s19   ;;  %s1562_s18 = sphi %s1611_s18, %s2478_s18  }
   0x4   : > { %s1636_s24 = sadd.s32 1, %s1574_s21   ;;  %s146_s25 = sadd.s32 1, %s1570_s20 }
   0x5   : > { %s143_s26 = ssub.s32 %s1574_s21, %s1636_s24  ;;  %p156_p0 = scmp.ne.s32.totalorder %s1570_s20, %s1566_s19 }
   0x6   : > { %p144_p1 = scmp.eq.s32.totalorder %s143_s26, 0  ;;  %p157_p2 = scmp.eq.s32.totalorder %s1632_s22, 1 }
   0x7   : > { %p162_p3 = scmp.ne.s32.totalorder %s1566_s19, %s1562_s18  ;;  %p163_p4 = scmp.eq.s32.totalorder %s1216_s23, 1 }
   0x8   : > { %s1647_s27 = scalar_select %p144_p1, %s1570_s20, %s146_s25  }
   0x9   : > { %p1649_p5 = por %p157_p2, %p156_p0  ;;  %p1653_p6 = por %p163_p4, %p162_p3 }
   0xa   : > { %p1219_p7 = scmp.ge.s32.totalorder %s1574_s21, 1  ;;  %p205_p8 = scmp.lt.s32.totalorder %s1574_s21, 3 }
   0xc   : > { %p206_p9 = pnand %p1219_p7, %p205_p8 }
   0xe   : > { %209 = sbr.rel (%p206_p9) target bundleno = 295 (0x127), region = 36 }
  0x15   : > { %v1426_v0 = vld [vmem:[%s2437_s2] sm:$0xff]   ;;  %v1427_v1 = vld [vmem:[%s2437_s2 + $0x8] sm:$0xff]   ;;  %s1221_s9 = sshll.u32 %s1632_s22, 5  ;;  %v1428_v2 = vld [vmem:[%s2437_s2 + $0x10] sm:$0xff]   ;;  %vm468_vm0 = vcmask 1040384   ;;  %vm419_vm1 = vcmask 662528  }
  0x16   : > { %1327 = vmatprep.subr.bf16.mxu0 %v1426_v0  ;;  %1371 = vmatprep.subr.bf16.mxu1 %v1426_v0  ;;  %p244_p10 = scmp.lt.s32.totalorder %s1221_s9, 63  ;;  %v1429_v3 = vld [vmem:[%s2437_s2 + $0x18] sm:$0xff]   ;;  %v1431_v4 = vld [vmem:[%s2437_s2 + $0x28] ss:$0 sps:$4 sm:$0x11]   ;;  %v1430_v7 = vld [vmem:[%s2437_s2 + $0x20] sm:$0xff]  }
  0x17   : > { %1328 = vmatpush3.bf16.msra.mxu0 %v1426_v0  ;;  %1377 = vmatpush3.bf16.msra.mxu1 %v1426_v0  ;;  %v1576_v8 = vmov 0   ;;  %s240_s11 = sand.u32 1, %s1566_s19   ;;  %v1577_v59 = vmov 0.0   ;;  %s1578_s26 = smov [#allocation2]  }
  0x18   : > { %1329 = vmatprep.subr.bf16.mxu0 %v1427_v1  ;;  %1372 = vmatprep.subr.bf16.mxu1 %v1427_v1  ;;  %s2483_s9 = smov (!%p244_p10, %s1221_s9), 63  ;;  %v470_v9 = vsel %vm468_vm0, 65535, %v1576_v8  ;;  %s1220_s12 = sshll.u32 %s240_s11, 8 }
  0x19   : > { %s1222_s14 = sshll.u32 %s2483_s9, 2  ;;  %v472_v10 = vand.u32 %v1431_v4, %v470_v9  ;;  %s1224_s6 = sshll.u32 %s2483_s9, 3 }
  0x1a   : > { %s1678_s17 = scalar_lea.vmem %s2435_s0, %s1222_s14  ;;  %s1724_s10 = scalar_lea.vmem %s2436_s1, %s1224_s6 }
  0x1b   : > { %1330 = vmatpush3.bf16.msra.mxu0 %v1427_v1  ;;  %1378 = vmatpush3.bf16.msra.mxu1 %v1427_v1  ;;  %v1432_v5 = vld [vmem:[%s1678_s17] sm:$0xff]   ;;  %v1434_v11 = vld [vmem:[%s1678_s17 + $0x8] sm:$0xff]   ;;  %v1436_v13 = vld [vmem:[%s1678_s17 + $0x10] sm:$0xff]   ;;  %s1894_s13 = scalar_lea.vmem [#allocation2], %s1220_s12  ;;  %s1304_s14 = sshll.u32 %s1632_s22, 12 }
  0x1c   : > { %1331 = vmatprep.subr.bf16.mxu0 %v1428_v2  ;;  %1373 = vmatprep.subr.bf16.mxu1 %v1428_v2  ;;  %v1433_v6 = vld [vmem:[%s1678_s17 + $0x40] sm:$0xff]   ;;  %v1435_v12 = vld [vmem:[%s1678_s17 + $0x48] sm:$0xff]   ;;  %v1437_v14 = vld [vmem:[%s1678_s17 + $0x50] sm:$0xff]   ;;  %s1117_s15 = sshll.u32 %s1894_s13, 4  ;;  %s2164_s23 = scalar_lea.sflag [#allocation3], %s240_s11  ;;  %s2142_s15 = int_to_ptr.vmem [resolvable:$true] %s1117_s15 }
  0x1d   : > { %1339 = vmatprep.mubr.msk.bf16.mxu0 %vm419_vm1, %v1432_v5  ;;  %1355 = vmatprep.mubr.msk.bf16.mxu1 %vm419_vm1, %v1433_v6  ;;  %v1438_v15 = vld [vmem:[%s1678_s17 + $0x18] sm:$0xff]   ;;  %v1440_v17 = vld [vmem:[%s1678_s17 + $0x20] sm:$0xff]   ;;  %v1442_v19 = vld [vmem:[%s1678_s17 + $0x28] sm:$0xff]   ;;  %s1512_s25 = scalar_lea.vmem %s2142_s15, 4096  ;;  %s1516_s30 = sshll.u32 %s1578_s26, 4  ;;  %s1517_s30 = int_to_ptr.vmem [resolvable:$false] %s1516_s30 }
  0x1e   : > { %v1439_v16 = vld [vmem:[%s1678_s17 + $0x58] sm:$0xff]   ;;  %v1441_v18 = vld [vmem:[%s1678_s17 + $0x60] sm:$0xff]   ;;  %v1443_v20 = vld [vmem:[%s1678_s17 + $0x68] sm:$0xff]   ;;  %p1513_p11 = scmp.ne.s32.totalorder %s2142_s15, %s1512_s25  ;;  %s1518_s7 = scalar_lea.vmem %s1517_s30, 8192 }
  0x1f   : > { %1332 = vmatpush3.bf16.msra.mxu0 %v1428_v2  ;;  %1379 = vmatpush3.bf16.msra.mxu1 %v1428_v2  ;;  %v1444_v21 = vld [vmem:[%s1678_s17 + $0x30] sm:$0xff]   ;;  %v1446_v23 = vld [vmem:[%s1678_s17 + $0x38] sm:$0xff]   ;;  %v1735_v27 = vld [vmem:[%s1724_s10] sm:$0xff]  ;;  %p1519_p0 = scmp.lt.s32.totalorder %s2142_s15, %s1517_s30  ;;  %p1520_p1 = scmp.lt.s32.totalorder %s1518_s7, %s1512_s25 }
  0x20   : > { %1333 = vmatprep.subr.bf16.mxu0 %v1429_v3  ;;  %1374 = vmatprep.subr.bf16.mxu1 %v1429_v3  ;;  %v1445_v22 = vld [vmem:[%s1678_s17 + $0x70] sm:$0xff]   ;;  %v1447_v24 = vld [vmem:[%s1678_s17 + $0x78] sm:$0xff]   ;;  %v1738_v28 = vld [vmem:[%s1724_s10 + $0x80] sm:$0xff]  ;;  %vm667_vm4 = vcmp.gt.f32.partialorder %v1735_v27, 0.0  ;;  %s2140_s17 = scalar_lea.hbm %s2440_s5, %s1304_s14  ;;  %p1514_p12 = pnand %p1513_p11, %p1649_p5 }
  0x21   : > { %v1727_v25 = vld [vmem:[%s1724_s10 + $0x10] sm:$0xff]  ;;  %vm683_vm5 = vcmp.gt.f32.partialorder %v1738_v28, 0.0  ;;  %v1749_v31 = vld [vmem:[%s1724_s10 + $0x18] sm:$0xff]  ;;  %v763_v33 = vsel %vm667_vm4, %v1735_v27, 1.0  ;;  %v1762_v35 = vld [vmem:[%s1724_s10 + $0x8] sm:$0xff]  ;;  %v1850_v1 = vsel %vm667_vm4, 1.0, %v1577_v59  ;;  %p1521_p2 = por %p1520_p1, %p1519_p0 }
  0x22   : > { %v1730_v26 = vld [vmem:[%s1724_s10 + $0x90] sm:$0xff]  ;;  %vm669_vm2 = vcmp.gt.f32.partialorder %v1727_v25, 0.0  ;;  %v1752_v32 = vld [vmem:[%s1724_s10 + $0x98] sm:$0xff]  ;;  %v779_v34 = vsel %vm683_vm5, %v1738_v28, 1.0  ;;  %vm670_vm6 = vcmp.gt.f32.partialorder %v1749_v31, 0.0  ;;  %v1765_v36 = vld [vmem:[%s1724_s10 + $0x88] sm:$0xff]  ;;  %p1515_p13 = pneg %p1514_p12 }
  0x23   : > { %1334 = vmatpush3.bf16.msra.mxu0 %v1429_v3  ;;  %1380 = vmatpush3.bf16.msra.mxu1 %v1429_v3  ;;  %vm685_vm3 = vcmp.gt.f32.partialorder %v1730_v26, 0.0  ;;  %v765_v29 = vsel %vm669_vm2, %v1727_v25, 1.0  ;;  %v766_v37 = vsel %vm670_vm6, %v1749_v31, 1.0  ;;  %vm686_vm7 = vcmp.gt.f32.partialorder %v1752_v32, 0.0  ;;  %v1783_v41 = vld [vmem:[%s1724_s10 + $0x30] sm:$0xff]  ;;  %v1791_v43 = vld [vmem:[%s1724_s10 + $0x20] sm:$0xff] }
  0x24   : > { %1335 = vmatprep.subr.bf16.mxu0 %v1430_v7  ;;  %1375 = vmatprep.subr.bf16.mxu1 %v1430_v7  ;;  %v781_v30 = vsel %vm685_vm3, %v1730_v26, 1.0  ;;  %1448 = vrcp.f32 %v765_v29  ;;  %vm668_vm8 = vcmp.gt.f32.partialorder %v1762_v35, 0.0  ;;  %v782_v38 = vsel %vm686_vm7, %v1752_v32, 1.0  ;;  %v1786_v42 = vld [vmem:[%s1724_s10 + $0xb0] sm:$0xff]  ;;  %v1794_v44 = vld [vmem:[%s1724_s10 + $0xa0] sm:$0xff]  ;;  %v1804_v47 = vld [vmem:[%s1724_s10 + $0x38] sm:$0xff]  ;;  %p1522_p3 = pnand %p1521_p2, %p1515_p13 }
  0x25   : > { %1450 = vrcp.f32 %v781_v30  ;;  %v764_v39 = vsel %vm668_vm8, %v1762_v35, 1.0  ;;  %vm684_vm9 = vcmp.gt.f32.partialorder %v1765_v36, 0.0  ;;  %vm673_vm10 = vcmp.gt.f32.partialorder %v1783_v41, 0.0  ;;  %v1807_v48 = vld [vmem:[%s1724_s10 + $0xb8] sm:$0xff]  ;;  %v1815_v50 = vld [vmem:[%s1724_s10 + $0x28] sm:$0xff] }
  0x26   : > { %1452 = vrcp.f32 %v763_v33  ;;  %v780_v40 = vsel %vm684_vm9, %v1765_v36, 1.0  ;;  %vm689_vm11 = vcmp.gt.f32.partialorder %v1786_v42, 0.0  ;;  %v769_v45 = vsel %vm673_vm10, %v1783_v41, 1.0 }
  0x27   : > { %1336 = vmatpush3.bf16.msra.mxu0 %v1430_v7  ;;  %1381 = vmatpush3.bf16.msra.mxu1 %v1430_v7  ;;  %1454 = vrcp.f32 %v779_v34  ;;  %v785_v46 = vsel %vm689_vm11, %v1786_v42, 1.0  ;;  %vm671_vm12 = vcmp.gt.f32.partialorder %v1791_v43, 0.0  ;;  %vm687_vm13 = vcmp.gt.f32.partialorder %v1794_v44, 0.0  ;;  %v656_v34 = vld [vmem:[%s1724_s10 + $0xa8] sm:$0xff] }
  0x28   : > { %1337 = vmatprep.subr.bf16.mxu0 %v472_v10  ;;  %1376 = vmatprep.subr.bf16.mxu1 %v472_v10  ;;  %1456 = vrcp.f32 %v766_v37  ;;  %v767_v49 = vsel %vm671_vm12, %v1791_v43, 1.0  ;;  %vm674_vm14 = vcmp.gt.f32.partialorder %v1804_v47, 0.0  ;;  %v783_v51 = vsel %vm687_vm13, %v1794_v44, 1.0 }
  0x29   : > { %1458 = vrcp.f32 %v782_v38  ;;  %v770_v52 = vsel %vm674_vm14, %v1804_v47, 1.0  ;;  %vm690_vm15 = vcmp.gt.f32.partialorder %v1807_v48, 0.0  ;;  %vm672_vm0 = vcmp.gt.f32.partialorder %v1815_v50, 0.0 }
  0x2a   : > { %1460 = vrcp.f32 %v764_v39  ;;  %v786_v54 = vsel %vm690_vm15, %v1807_v48, 1.0  ;;  %v1832_v57 = vsel %vm672_vm0, %v1815_v50, 1.0  ;;  %v1837_v60 = vsel %vm669_vm2, 1.0, %v1577_v59  ;;  %v661_v48 = vld [vmem:[%s1724_s10 + $0xd0] sm:$0xff] }
  0x2b   : > { %1338 = vmatpush3.bf16.msra.mxu0 %v472_v10  ;;  %1382 = vmatpush3.bf16.msra.mxu1 %v472_v10  ;;  %1462 = vrcp.f32 %v780_v40  ;;  %v1842_v61 = vsel %vm685_vm3, 1.0, %v1577_v59  ;;  %v1855_v3 = vsel %vm683_vm5, 1.0, %v1577_v59  ;;  %v1865_v7 = vsel %vm670_vm6, 1.0, %v1577_v59 }
  0x2c   : > { %1464 = vrcp.f32 %v769_v45  ;;  %v1929_v27 = vsel %vm673_vm10, 1.0, %v1577_v59  ;;  %v1937_v30 = vsel %vm689_vm11, 1.0, %v1577_v59  ;;  %v1942_v32 = vsel %vm671_vm12, 1.0, %v1577_v59  ;;  %v645_v45 = vld [vmem:[%s1724_s10 + $0x50] sm:$0xff] }
  0x2d   : > { %1466 = vrcp.f32 %v785_v46  ;;  %v1957_v37 = vsel %vm687_vm13, 1.0, %v1577_v59  ;;  %v1962_v39 = vsel %vm674_vm14, 1.0, %v1577_v59  ;;  %vm688_vm2 = vcmp.gt.f32.partialorder %v656_v34, 0.0 }
  0x2e   : > { %1340 = vmatmul.mubr.msk.bf16.vlgmr.msra.gmra.mrb[0].mxu0 %vm419_vm1, %v1434_v11  ;;  %1356 = vmatmul.mubr.msk.bf16.vlgmr.msra.gmra.mrb[0].mxu1 %vm419_vm1, %v1435_v12  ;;  %v1449_v53 = vpop.eup %1448  ;;  %1468 = vrcp.f32 %v767_v49  ;;  %v1983_v46 = vsel %vm690_vm15, 1.0, %v1577_v59  ;;  %v1988_v49 = vsel %vm672_vm0, 1.0, %v1577_v59  ;;  %vm677_vm3 = vcmp.gt.f32.partialorder %v645_v45, 0.0 }
  0x2f   : > { %1343 = vmatprep.mubr.msk.bf16.mxu0 %vm419_vm1, %v1436_v13  ;;  %1359 = vmatprep.mubr.msk.bf16.mxu1 %vm419_vm1, %v1437_v14  ;;  %v1451_v55 = vpop.eup %1450  ;;  %v829_v56 = vmul.f32 81.0, %v1449_v53  ;;  %1470 = vrcp.f32 %v783_v51  ;;  %v1876_v13 = vsel %vm686_vm7, 1.0, %v1577_v59  ;;  %v659_v53 = vld [vmem:[%s1724_s10 + $0xc0] sm:$0xff]  ;;  %vm693_vm4 = vcmp.gt.f32.partialorder %v661_v48, 0.0 }
  0x30   : > { %v1453_v58 = vpop.eup %1452  ;;  %v845_v62 = vmul.f32 81.0, %v1451_v55  ;;  %1472 = vrcp.f32 %v770_v52  ;;  %v643_v52 = vld [vmem:[%s1724_s10 + $0x40] sm:$0xff]  ;;  %v784_v55 = vsel %vm688_vm2, %v656_v34, 1.0  ;;  %vm691_vm6 = vcmp.gt.f32.partialorder %v659_v53, 0.0 }
  0x31   : > { %v1455_v63 = vpop.eup %1454  ;;  %v1845_v0 = vmul.f32 %v1837_v60, %v829_v56  ;;  %v827_v2 = vmul.f32 81.0, %v1453_v58  ;;  %1474 = vrcp.f32 %v786_v54  ;;  %v2007_v54 = vsel %vm688_vm2, 1.0, %v1577_v59  ;;  %v646_v58 = vld [vmem:[%s1724_s10 + $0x58] sm:$0xff] }
  0x32   : > { %v1457_v4 = vpop.eup %1456  ;;  %v1860_v5 = vmul.f32 %v1842_v61, %v845_v62  ;;  %v843_v6 = vmul.f32 81.0, %v1455_v63  ;;  %1476 = vrcp.f32 %v1832_v57  ;;  %v2013_v56 = vsel %vm677_vm3, 1.0, %v1577_v59 }
  0x33   : > { %v1459_v8 = vpop.eup %1458  ;;  %v1868_v9 = vmul.f32 %v1850_v1, %v827_v2  ;;  %v830_v10 = vmul.f32 81.0, %v1457_v4  ;;  %1478 = vrcp.f32 %v784_v55  ;;  %v773_v57 = vsel %vm677_vm3, %v645_v45, 1.0 }
  0x34   : > { %v1461_v11 = vpop.eup %1460  ;;  %v1871_v12 = vmul.f32 %v1855_v3, %v843_v6  ;;  %1480 = vrcp.f32 %v773_v57  ;;  %vm675_vm5 = vcmp.gt.f32.partialorder %v643_v52, 0.0  ;;  %v2020_v62 = vsel %vm693_vm4, 1.0, %v1577_v59  ;;  %v662_v6 = vld [vmem:[%s1724_s10 + $0xd8] sm:$0xff]  ;;  %v663_v57 = vld [vmem:[%s1724_s10 + $0xe0] sm:$0xff] }
  0x35   : > { %v1463_v14 = vpop.eup %1462  ;;  %v789_v63 = vsel %vm693_vm4, %v661_v48, 1.0  ;;  %v2023_v2 = vsel %vm675_vm5, 1.0, %v1577_v59  ;;  %v771_v4 = vsel %vm675_vm5, %v643_v52, 1.0  ;;  %vm678_vm7 = vcmp.gt.f32.partialorder %v646_v58, 0.0 }
  0x36   : > { %1344 = vmatmul.mubr.msk.bf16.gmra.mrb[4].mxu0 %vm419_vm1, %v1438_v15  ;;  %1360 = vmatmul.mubr.msk.bf16.gmra.mrb[4].mxu1 %vm419_vm1, %v1439_v16  ;;  %v1879_v15 = vmul.f32 %v1865_v7, %v830_v10  ;;  %v846_v16 = vmul.f32 81.0, %v1459_v8  ;;  %v644_v8 = vld [vmem:[%s1724_s10 + $0x48] sm:$0xff]  ;;  %1482 = vrcp.f32 %v789_v63  ;;  %v2034_v10 = vsel %vm691_vm6, 1.0, %v1577_v59 }
  0x37   : > { %1347 = vmatprep.mubr.msk.bf16.mxu0 %vm419_vm1, %v1440_v17  ;;  %1363 = vmatprep.mubr.msk.bf16.mxu1 %vm419_vm1, %v1441_v18  ;;  %v1465_v17 = vpop.eup %1464  ;;  %v1884_v18 = vsel %vm668_vm8, 1.0, %v1577_v59  ;;  %1484 = vrcp.f32 %v771_v4  ;;  %vm694_vm8 = vcmp.gt.f32.partialorder %v662_v6, 0.0  ;;  %vm695_vm14 = vcmp.gt.f32.partialorder %v663_v57, 0.0 }
  0x38   : > { %v833_v28 = vmul.f32 81.0, %v1465_v17  ;;  %v774_v17 = vsel %vm678_vm7, %v646_v58, 1.0 }
  0x3a   : > { %v1946_v36 = vmul.f32 %v1929_v27, %v833_v28  ;;  %v665_v28 = vld [vmem:[%s1724_s10 + $0xf0] sm:$0xff] }
  0x3b   : > { %vm697_vm12 = vcmp.gt.f32.partialorder %v665_v28, 0.0 }
  0x3c   : > { %v2077_v55 = vsel %vm697_vm12, 1.0, %v1577_v59  ;;  %v793_v4 = vsel %vm697_vm12, %v665_v28, 1.0 }
  0x3e   : > { %1348 = vmatmul.mubr.msk.bf16.gmra.mrb[8].mxu0 %vm419_vm1, %v1442_v19  ;;  %1364 = vmatmul.mubr.msk.bf16.gmra.mrb[8].mxu1 %vm419_vm1, %v1443_v20  ;;  %v828_v19 = vmul.f32 81.0, %v1461_v11  ;;  %v1889_v20 = vsel %vm684_vm9, 1.0, %v1577_v59  ;;  %v787_v11 = vsel %vm691_vm6, %v659_v53, 1.0  ;;  %vm676_vm9 = vcmp.gt.f32.partialorder %v644_v8, 0.0 }
  0x3f   : > { %1351 = vmatprep.mubr.msk.bf16.mxu0 %vm419_vm1, %v1444_v21  ;;  %1367 = vmatprep.mubr.msk.bf16.mxu1 %vm419_vm1, %v1445_v22  ;;  %v844_v21 = vmul.f32 81.0, %v1463_v14  ;;  %v1467_v22 = vpop.eup %1466  ;;  %1486 = vrcp.f32 %v787_v11  ;;  %v660_v14 = vld [vmem:[%s1724_s10 + $0xc8] sm:$0xff] }
  0x40   : > { %v1915_v25 = vmul.f32 %v1884_v18, %v828_v19  ;;  %v849_v31 = vmul.f32 81.0, %v1467_v22  ;;  %v2044_v19 = vsel %vm694_vm8, 1.0, %v1577_v59  ;;  %1488 = vrcp.f32 %v774_v17  ;;  %v650_v17 = vld [vmem:[%s1724_s10 + $0x78] sm:$0xff] }
  0x41   : > { %v1921_v26 = vmul.f32 %v1889_v20, %v844_v21  ;;  %v790_v21 = vsel %vm694_vm8, %v662_v6, 1.0  ;;  %v2053_v22 = vsel %vm676_vm9, 1.0, %v1577_v59  ;;  %vm692_vm10 = vcmp.gt.f32.partialorder %v660_v14, 0.0 }
  0x42   : > { %v1965_v40 = vmul.f32 %v1937_v30, %v849_v31  ;;  %1490 = vrcp.f32 %v790_v21  ;;  %v772_v31 = vsel %vm676_vm9, %v644_v8, 1.0  ;;  %v2061_v34 = vsel %vm692_vm10, 1.0, %v1577_v59 }
  0x43   : > { %1492 = vrcp.f32 %v772_v31  ;;  %vm682_vm15 = vcmp.gt.f32.partialorder %v650_v17, 0.0 }
  0x46   : > { %1352 = vmatmul.mubr.msk.bf16.gmra.mrb[12].mxu0 %vm419_vm1, %v1446_v23  ;;  %1368 = vmatmul.mubr.msk.bf16.gmra.mrb[12].mxu1 %vm419_vm1, %v1447_v24  ;;  %vm1029_vm1 = vcmask 7168   ;;  %v1892_v23 = vmul.f32 %v1876_v13, %v846_v16  ;;  %v1469_v24 = vpop.eup %1468  ;;  %v2041_v16 = vsel %vm678_vm7, 1.0, %v1577_v59 }
  0x47   : > { %1064 = vst.msk [vmem:[%s1894_s13 + $0x10] sm:$0xff] %vm1029_vm1, %v1837_v60  ;;  %1080 = vst.msk [vmem:[%s1894_s13 + $0x90] sm:$0xff] %vm1029_vm1, %v1842_v61  ;;  %v1471_v29 = vpop.eup %1470  ;;  %v831_v33 = vmul.f32 81.0, %v1469_v24  ;;  %v649_v24 = vld [vmem:[%s1724_s10 + $0x70] sm:$0xff] }
  0x48   : > { %1062 = vst.msk [vmem:[%s1894_s13] sm:$0xff] %vm1029_vm1, %v1850_v1  ;;  %1078 = vst.msk [vmem:[%s1894_s13 + $0x80] sm:$0xff] %vm1029_vm1, %v1855_v3  ;;  %v1473_v35 = vpop.eup %1472  ;;  %v847_v38 = vmul.f32 81.0, %v1471_v29  ;;  %vm681_vm11 = vcmp.gt.f32.partialorder %v649_v24, 0.0 }
  0x49   : > { %1065 = vst.msk [vmem:[%s1894_s13 + $0x18] sm:$0xff] %vm1029_vm1, %v1865_v7  ;;  %1081 = vst.msk [vmem:[%s1894_s13 + $0x98] sm:$0xff] %vm1029_vm1, %v1876_v13  ;;  %v1968_v41 = vmul.f32 %v1942_v32, %v831_v33  ;;  %v1475_v42 = vpop.eup %1474  ;;  %v834_v44 = vmul.f32 81.0, %v1473_v35  ;;  %v788_v35 = vsel %vm692_vm10, %v660_v14, 1.0  ;;  %v2071_v48 = vsel %vm681_vm11, 1.0, %v1577_v59 }
  0x4a   : > { %1063 = vst.msk [vmem:[%s1894_s13 + $0x8] sm:$0xff] %vm1029_vm1, %v1884_v18  ;;  %1079 = vst.msk [vmem:[%s1894_s13 + $0x88] sm:$0xff] %vm1029_vm1, %v1889_v20  ;;  %v1977_v43 = vmul.f32 %v1957_v37, %v847_v38  ;;  %v850_v47 = vmul.f32 81.0, %v1475_v42  ;;  %v1477_v29 = vpop.eup %1476  ;;  %1494 = vrcp.f32 %v788_v35  ;;  %v647_v42 = vld [vmem:[%s1724_s10 + $0x60] sm:$0xff]  ;;  %v777_v52 = vsel %vm681_vm11, %v649_v24, 1.0  ;;  %v666_v35 = vld [vmem:[%s1724_s10 + $0xf8] sm:$0xff] }
  0x4b   : > { %1068 = vst.msk [vmem:[%s1894_s13 + $0x30] sm:$0xff] %vm1029_vm1, %v1929_v27  ;;  %1084 = vst.msk [vmem:[%s1894_s13 + $0xb0] sm:$0xff] %vm1029_vm1, %v1937_v30  ;;  %v1991_v51 = vmul.f32 %v1962_v39, %v834_v44  ;;  %v832_v33 = vmul.f32 81.0, %v1477_v29  ;;  %v1479_v38 = vpop.eup %1478  ;;  %1496 = vrcp.f32 %v777_v52  ;;  %vm679_vm13 = vcmp.gt.f32.partialorder %v647_v42, 0.0 }
  0x4c   : > { %1066 = vst.msk [vmem:[%s1894_s13 + $0x20] sm:$0xff] %vm1029_vm1, %v1942_v32  ;;  %1082 = vst.msk [vmem:[%s1894_s13 + $0xa0] sm:$0xff] %vm1029_vm1, %v1957_v37  ;;  %v2004_v50 = vmul.f32 %v1983_v46, %v850_v47  ;;  %v1481_v44 = vpop.eup %1480  ;;  %v848_v47 = vmul.f32 81.0, %v1479_v38  ;;  %1498 = vrcp.f32 %v793_v4  ;;  %v2090_v14 = vsel %vm679_vm13, 1.0, %v1577_v59  ;;  %v648_v4 = vld [vmem:[%s1724_s10 + $0x68] sm:$0xff] }
  0x4d   : > { %1069 = vst.msk [vmem:[%s1894_s13 + $0x38] sm:$0xff] %vm1029_vm1, %v1962_v39  ;;  %1085 = vst.msk [vmem:[%s1894_s13 + $0xb8] sm:$0xff] %vm1029_vm1, %v1983_v46  ;;  %v2068_v45 = vmul.f32 %v1988_v49, %v832_v33  ;;  %v837_v53 = vmul.f32 81.0, %v1481_v44  ;;  %v1483_v58 = vpop.eup %1482  ;;  %v775_v29 = vsel %vm679_vm13, %v647_v42, 1.0  ;;  %v2100_v33 = vsel %vm695_vm14, 1.0, %v1577_v59 }
  0x4e   : > { %1067 = vst.msk [vmem:[%s1894_s13 + $0x28] sm:$0xff] %vm1029_vm1, %v1988_v49  ;;  %1083 = vst.msk [vmem:[%s1894_s13 + $0xa8] sm:$0xff] %vm1029_vm1, %v2007_v54  ;;  %v2081_v63 = vmul.f32 %v2007_v54, %v848_v47  ;;  %v1485_v6 = vpop.eup %1484  ;;  %v853_v11 = vmul.f32 81.0, %v1483_v58  ;;  %1500 = vrcp.f32 %v775_v29  ;;  %v791_v42 = vsel %vm695_vm14, %v663_v57, 1.0  ;;  %v664_v57 = vld [vmem:[%s1724_s10 + $0xe8] sm:$0xff] }
  0x4f   : > { %1072 = vst.msk [vmem:[%s1894_s13 + $0x50] sm:$0xff] %vm1029_vm1, %v2013_v56  ;;  %1088 = vst.msk [vmem:[%s1894_s13 + $0xd0] sm:$0xff] %vm1029_vm1, %v2020_v62  ;;  %v2087_v8 = vmul.f32 %v2013_v56, %v837_v53  ;;  %v1487_v21 = vpop.eup %1486  ;;  %v835_v24 = vmul.f32 81.0, %v1485_v6  ;;  %1502 = vrcp.f32 %v791_v42  ;;  %v2113_v58 = vsel %vm682_vm15, 1.0, %v1577_v59 }
  0x50   : > { %1070 = vst.msk [vmem:[%s1894_s13 + $0x40] sm:$0xff] %vm1029_vm1, %v2023_v2  ;;  %1086 = vst.msk [vmem:[%s1894_s13 + $0xc0] sm:$0xff] %vm1029_vm1, %v2034_v10  ;;  %v2097_v28 = vmul.f32 %v2020_v62, %v853_v11  ;;  %v851_v31 = vmul.f32 81.0, %v1487_v21  ;;  %v1489_v38 = vpop.eup %1488  ;;  %v778_v21 = vsel %vm682_vm15, %v650_v17, 1.0  ;;  %vm698_vm0 = vcmp.gt.f32.partialorder %v666_v35, 0.0 }
  0x51   : > { %1073 = vst.msk [vmem:[%s1894_s13 + $0x58] sm:$0xff] %vm1029_vm1, %v2041_v16  ;;  %1089 = vst.msk [vmem:[%s1894_s13 + $0xd8] sm:$0xff] %vm1029_vm1, %v2044_v19  ;;  %v2104_v44 = vmul.f32 %v2023_v2, %v835_v24  ;;  %v1491_v47 = vpop.eup %1490  ;;  %v838_v53 = vmul.f32 81.0, %v1489_v38  ;;  %1504 = vrcp.f32 %v778_v21  ;;  %v2126_v38 = vsel %vm698_vm0, 1.0, %v1577_v59 }
  0x52   : > { %1071 = vst.msk [vmem:[%s1894_s13 + $0x48] sm:$0xff] %vm1029_vm1, %v2053_v22  ;;  %1087 = vst.msk [vmem:[%s1894_s13 + $0xc8] sm:$0xff] %vm1029_vm1, %v2061_v34  ;;  %v2110_v52 = vmul.f32 %v2034_v10, %v851_v31  ;;  %v1493_v6 = vpop.eup %1492  ;;  %v854_v11 = vmul.f32 81.0, %v1491_v47  ;;  %v794_v47 = vsel %vm698_vm0, %v666_v35, 1.0  ;;  %vm680_vm2 = vcmp.gt.f32.partialorder %v648_v4, 0.0 }
  0x53   : > { %2446 = vst [vmem:[#allocation5_spill] sm:$0xff] %v2071_v48  ;;  %1076 = vst.msk [vmem:[%s1894_s13 + $0x70] sm:$0xff] %vm1029_vm1, %v2071_v48  ;;  %v2123_v29 = vmul.f32 %v2041_v16, %v838_v53  ;;  %v836_v31 = vmul.f32 81.0, %v1493_v6  ;;  %1506 = vrcp.f32 %v794_v47  ;;  %vm696_vm3 = vcmp.gt.f32.partialorder %v664_v57, 0.0 }
  0x54   : > { %1092 = vst.msk [vmem:[%s1894_s13 + $0xf0] sm:$0xff] %vm1029_vm1, %v2077_v55  ;;  %1074 = vst.msk [vmem:[%s1894_s13 + $0x60] sm:$0xff] %vm1029_vm1, %v2090_v14  ;;  %v1495_v24 = vpop.eup %1494  ;;  %v2129_v42 = vmul.f32 %v2044_v19, %v854_v11  ;;  %v2148_v6 = vsel %vm680_vm2, 1.0, %v1577_v59  ;;  %v776_v11 = vsel %vm680_vm2, %v648_v4, 1.0 }
  0x55   : > { %2447 = vst [vmem:[#allocation6_spill] sm:$0xff] %v2104_v44  ;;  %1090 = vst.msk [vmem:[%s1894_s13 + $0xe0] sm:$0xff] %vm1029_vm1, %v2100_v33  ;;  %v852_v17 = vmul.f32 81.0, %v1495_v24  ;;  %v2135_v44 = vmul.f32 %v2053_v22, %v836_v31  ;;  %1508 = vrcp.f32 %v776_v11  ;;  %v2154_v24 = vsel %vm696_vm3, 1.0, %v1577_v59 }
  0x56   : > { %2448 = vst [vmem:[#allocation7_spill] sm:$0xff] %v2110_v52  ;;  %1077 = vst.msk [vmem:[%s1894_s13 + $0x78] sm:$0xff] %vm1029_vm1, %v2113_v58  ;;  %v1497_v52 = vpop.eup %1496  ;;  %v792_v31 = vsel %vm696_vm3, %v664_v57, 1.0 }
  0x57   : > { %2449 = vst [vmem:[#allocation8_spill] sm:$0xff] %v2123_v29  ;;  %2450 = vst [vmem:[#allocation9_spill] sm:$0xff] %v2129_v42  ;;  %v2145_v35 = vmul.f32 %v2061_v34, %v852_v17  ;;  %v841_v53 = vmul.f32 81.0, %v1497_v52  ;;  %v1499_v21 = vpop.eup %1498  ;;  %1510 = vrcp.f32 %v792_v31 }
  0x58   : > { %1093 = vst.msk [vmem:[%s1894_s13 + $0xf8] sm:$0xff] %vm1029_vm1, %v2126_v38  ;;  %2451 = vst [vmem:[#allocation10_spill] sm:$0xff] %v2135_v44  ;;  %v857_v47 = vmul.f32 81.0, %v1499_v21  ;;  %v1501_v52 = vpop.eup %1500 }
  0x59   : > { %2452 = vst [vmem:[#allocation11_spill] sm:$0xff] %v2145_v35  ;;  %2453 = vst [vmem:[#allocation12_spill] sm:$0xff] %v2148_v6  ;;  %v2157_v17 = vmul.f32 %v2071_v48, %v841_v53 }
  0x5a   : > { %1075 = vst.msk [vmem:[%s1894_s13 + $0x68] sm:$0xff] %vm1029_vm1, %v2148_v6  ;;  %2454 = vst [vmem:[#allocation13_spill] sm:$0xff] %v2154_v24 }
  0x5b   : > { %2455 = vst [vmem:[#allocation14_spill] sm:$0xff] %v2157_v17  ;;  %1091 = vst.msk [vmem:[%s1894_s13 + $0xe8] sm:$0xff] %vm1029_vm1, %v2154_v24 }
  0x5c   : > { %1525 = shalt.err (!%p1522_p3)
}
  0x5d   : > { %s1526_s8 = scalar_lea.hbm %s2140_s17, 4096  ;;  %s1530_s12 = scalar_lea.hbm %s2440_s5, 8192 }
  0x5e   : > { %p1527_p4 = scmp.ne.s32.totalorder %s2140_s17, %s1526_s8  ;;  %p1531_p9 = scmp.lt.u32.totalorder %s2140_s17, %s2440_s5 }
  0x5f   : > { %p1532_p10 = scmp.lt.u32.totalorder %s1530_s12, %s1526_s8  ;;  %p1534_p12 = scmp.lt.u32.totalorder %s1526_s8, %s2140_s17 }
  0x60   : > { %p1528_p7 = pnand %p1527_p4, %p1649_p5 }
  0x61   : > { %p1533_p11 = por %p1532_p10, %p1531_p9 }
  0x62   : > { %p1529_p8 = pneg %p1528_p7 }
  0x63   : > { %p1535_p13 = por %p1534_p12, %p1533_p11 }
  0x65   : > { %p1536_p0 = pnand %p1535_p13, %p1529_p8 }
  0x67   : > { %1539 = shalt.err (!%p1536_p0)
}
  0x68   : > { %s1579_s22 = smov 128   ;;  %s1580_s16 = smov 8   ;;  %v2189_v59 = vmul.f32 %v2077_v55, %v857_v47  ;;  %v839_v4 = vmul.f32 81.0, %v1501_v52  ;;  %v1503_v57 = vpop.eup %1502 }
  0x69   : > { %1383 = dma.vmem_to_hbm [thread:$0]  (%p1649_p5), %s2142_s15, 4096, %s2140_s17, %s2164_s23, %s1579_s22, %s1579_s22, %s1580_s16   ;;  %v855_v11 = vmul.f32 81.0, %v1503_v57  ;;  %v1505_v21 = vpop.eup %1504 }
  0x6a   : > { %2456 = vst [vmem:[#allocation15_spill] sm:$0xff] %v2189_v59  ;;  %v2192_v53 = vmul.f32 %v2090_v14, %v839_v4  ;;  %v842_v17 = vmul.f32 81.0, %v1505_v21  ;;  %v1507_v48 = vpop.eup %1506  ;;  %s2246_s30 = scalar_lea.vmem %s2439_s4, %s1224_s6 }
  0x6b   : > { %v2195_v31 = vmul.f32 %v2100_v33, %v855_v11  ;;  %v858_v44 = vmul.f32 81.0, %v1507_v48  ;;  %v1509_v42 = vpop.eup %1508  ;;  %v2212_v11 = vld [vmem:[%s2438_s3] ss:$0 sm:$0xff] }
  0x6c   : > { %v2198_v35 = vmul.f32 %v2113_v58, %v842_v17  ;;  %v1511_v29 = vpop.eup %1510  ;;  %v840_v52 = vmul.f32 81.0, %v1509_v42  ;;  %v931_v48 = vmul.f32 %v2212_v11, %v1837_v60  ;;  %v932_v60 = vmul.f32 %v2212_v11, %v1865_v7 }
  0x6d   : > { %2457 = vst [vmem:[#allocation16_spill] sm:$0xff] %v2195_v31  ;;  %v2201_v47 = vmul.f32 %v2126_v38, %v858_v44  ;;  %v856_v59 = vmul.f32 81.0, %v1511_v29  ;;  %v947_v44 = vmul.f32 %v2212_v11, %v1842_v61  ;;  %v929_v29 = vmul.f32 %v2212_v11, %v1850_v1  ;;  %v2231_v1 = vld [vmem:[%s2438_s3 + $0x1] ss:$0 sm:$0xff] }
  0x6e   : > { %2458 = vst [vmem:[#allocation17_spill] sm:$0xff] %v2198_v35  ;;  %v2204_v4 = vmul.f32 %v2148_v6, %v840_v52  ;;  %v948_v61 = vmul.f32 %v2212_v11, %v1876_v13  ;;  %v946_v7 = vmul.f32 %v2212_v11, %v1889_v20 }
  0x6f   : > { %2459 = vst [vmem:[#allocation18_spill] sm:$0xff] %v2201_v47  ;;  %v2207_v57 = vmul.f32 %v2154_v24, %v856_v59  ;;  %v945_v59 = vmul.f32 %v2212_v11, %v1855_v3 }
  0x70   : > { %2460 = vst [vmem:[#allocation19_spill] sm:$0xff] %v2204_v4 }
  0x71   : > { %2461 = vst [vmem:[#allocation20_spill] sm:$0xff] %v2207_v57 }
 0x101   : > { %v1341_v17 = vpop.f32.mrb[0].mxu0  ;;  %v1357_v42 = vpop.f32.mrb[0].mxu1 }
 0x102   : > { %v895_v21 = vmul.f32 %v1341_v17, %v1845_v0  ;;  %v911_v52 = vmul.f32 %v1357_v42, %v1860_v5  ;;  %v508_v57 = vpop.f32.mrb[1].mxu0  ;;  %v572_v4 = vpop.f32.mrb[1].mxu1  ;;  %v930_v42 = vmul.f32 %v2212_v11, %v1884_v18 }
 0x103   : > { %v893_v3 = vmul.f32 %v1868_v9, %v508_v57  ;;  %v909_v0 = vmul.f32 %v1871_v12, %v572_v4  ;;  %v1342_v17 = vpop.f32.mrb[2].mxu0  ;;  %v1358_v5 = vpop.f32.mrb[2].mxu1 }
 0x104   : > { %v963_v47 = vadd.f32 %v931_v48, %v895_v21  ;;  %v979_v35 = vadd.f32 %v947_v44, %v911_v52  ;;  %v896_v13 = vmul.f32 %v1342_v17, %v1879_v15  ;;  %v912_v24 = vmul.f32 %v1358_v5, %v1892_v23  ;;  %v511_v6 = vpop.f32.mrb[3].mxu0  ;;  %v575_v31 = vpop.f32.mrb[3].mxu1 }
 0x105   : > { %v961_v9 = vadd.f32 %v929_v29, %v893_v3  ;;  %v977_v12 = vadd.f32 %v945_v59, %v909_v0  ;;  %v894_v18 = vmul.f32 %v1915_v25, %v511_v6  ;;  %v910_v20 = vmul.f32 %v1921_v26, %v575_v31 }
 0x106   : > { %v999_v15 = vadd.f32 %v2231_v1, %v963_v47  ;;  %v1015_v23 = vadd.f32 %v2231_v1, %v979_v35  ;;  %v964_v4 = vadd.f32 %v932_v60, %v896_v13  ;;  %v980_v57 = vadd.f32 %v948_v61, %v912_v24 }
 0x107   : > { %v997_v48 = vadd.f32 %v2231_v1, %v961_v9  ;;  %v1013_v44 = vadd.f32 %v2231_v1, %v977_v12  ;;  %v962_v21 = vadd.f32 %v930_v42, %v894_v18  ;;  %v978_v29 = vadd.f32 %v946_v7, %v910_v20 }
 0x108   : > { %1032 = vst.msk [vmem:[%s2246_s30 + $0x10] sm:$0xff] %vm1029_vm1, %v999_v15  ;;  %1048 = vst.msk [vmem:[%s2246_s30 + $0x90] sm:$0xff] %vm1029_vm1, %v1015_v23  ;;  %v1000_v25 = vadd.f32 %v2231_v1, %v964_v4  ;;  %v1016_v26 = vadd.f32 %v2231_v1, %v980_v57  ;;  %v935_v35 = vmul.f32 %v2212_v11, %v1929_v27 }
 0x109   : > { %v951_v6 = vmul.f32 %v2212_v11, %v1937_v30  ;;  %1030 = vst.msk [vmem:[%s2246_s30] sm:$0xff] %vm1029_vm1, %v997_v48  ;;  %1046 = vst.msk [vmem:[%s2246_s30 + $0x80] sm:$0xff] %vm1029_vm1, %v1013_v44  ;;  %v998_v24 = vadd.f32 %v2231_v1, %v962_v21  ;;  %v1014_v31 = vadd.f32 %v2231_v1, %v978_v29  ;;  %v1345_v47 = vpop.f32.mrb[4].mxu0  ;;  %v1361_v59 = vpop.f32.mrb[4].mxu1 }
 0x10a   : > { %v933_v52 = vmul.f32 %v2212_v11, %v1942_v32  ;;  %v949_v27 = vmul.f32 %v2212_v11, %v1957_v37  ;;  %1033 = vst.msk [vmem:[%s2246_s30 + $0x18] sm:$0xff] %vm1029_vm1, %v1000_v25  ;;  %1049 = vst.msk [vmem:[%s2246_s30 + $0x98] sm:$0xff] %vm1029_vm1, %v1016_v26  ;;  %v899_v30 = vmul.f32 %v1345_v47, %v1946_v36  ;;  %v524_v61 = vpop.f32.mrb[5].mxu0  ;;  %v588_v3 = vpop.f32.mrb[5].mxu1 }
 0x10b   : > { %v915_v60 = vmul.f32 %v1361_v59, %v1965_v40  ;;  %v936_v0 = vmul.f32 %v2212_v11, %v1962_v39  ;;  %v952_v17 = vmul.f32 %v2212_v11, %v1983_v46  ;;  %1031 = vst.msk [vmem:[%s2246_s30 + $0x8] sm:$0xff] %vm1029_vm1, %v998_v24  ;;  %1047 = vst.msk [vmem:[%s2246_s30 + $0x88] sm:$0xff] %vm1029_vm1, %v1014_v31  ;;  %v1346_v5 = vpop.f32.mrb[6].mxu0  ;;  %v1362_v36 = vpop.f32.mrb[6].mxu1 }
 0x10c   : > { %v897_v32 = vmul.f32 %v1968_v41, %v524_v61  ;;  %v913_v37 = vmul.f32 %v1977_v43, %v588_v3  ;;  %v934_v40 = vmul.f32 %v2212_v11, %v1988_v49  ;;  %v950_v42 = vmul.f32 %v2212_v11, %v2007_v54  ;;  %v527_v9 = vpop.f32.mrb[7].mxu0  ;;  %v591_v41 = vpop.f32.mrb[7].mxu1  ;;  %v2464_v3 = vld [vmem:[#allocation8_spill] sm:$0xff] }
 0x10d   : > { %v967_v39 = vadd.f32 %v935_v35, %v899_v30  ;;  %v983_v7 = vadd.f32 %v951_v6, %v915_v60  ;;  %v900_v46 = vmul.f32 %v1346_v5, %v1991_v51  ;;  %v916_v13 = vmul.f32 %v1362_v36, %v2004_v50 }
 0x10e   : > { %v965_v12 = vadd.f32 %v933_v52, %v897_v32  ;;  %v981_v43 = vadd.f32 %v949_v27, %v913_v37  ;;  %v898_v18 = vmul.f32 %v2068_v45, %v527_v9  ;;  %v914_v49 = vmul.f32 %v2081_v63, %v591_v41  ;;  %v2463_v52 = vld [vmem:[#allocation7_spill] sm:$0xff] }
 0x10f   : > { %v1003_v54 = vadd.f32 %v2231_v1, %v967_v39  ;;  %v1019_v20 = vadd.f32 %v2231_v1, %v983_v7  ;;  %v968_v15 = vadd.f32 %v936_v0, %v900_v46  ;;  %v984_v51 = vadd.f32 %v952_v17, %v916_v13  ;;  %v2465_v0 = vld [vmem:[#allocation9_spill] sm:$0xff]  ;;  %v2467_v39 = vld [vmem:[#allocation11_spill] sm:$0xff] }
 0x110   : > { %v1001_v23 = vadd.f32 %v2231_v1, %v965_v12  ;;  %v1017_v50 = vadd.f32 %v2231_v1, %v981_v43  ;;  %v966_v4 = vadd.f32 %v934_v40, %v898_v18  ;;  %v982_v57 = vadd.f32 %v950_v42, %v914_v49  ;;  %v2466_v40 = vld [vmem:[#allocation10_spill] sm:$0xff] }
 0x111   : > { %1036 = vst.msk [vmem:[%s2246_s30 + $0x30] sm:$0xff] %vm1029_vm1, %v1003_v54  ;;  %1052 = vst.msk [vmem:[%s2246_s30 + $0xb0] sm:$0xff] %vm1029_vm1, %v1019_v20  ;;  %v1004_v45 = vadd.f32 %v2231_v1, %v968_v15  ;;  %v1020_v63 = vadd.f32 %v2231_v1, %v984_v51  ;;  %v939_v48 = vmul.f32 %v2212_v11, %v2013_v56  ;;  %v1349_v25 = vpop.f32.mrb[8].mxu0  ;;  %v1365_v26 = vpop.f32.mrb[8].mxu1  ;;  %v2468_v54 = vld [vmem:[#allocation5_spill] sm:$0xff] }
 0x112   : > { %v955_v44 = vmul.f32 %v2212_v11, %v2020_v62  ;;  %1034 = vst.msk [vmem:[%s2246_s30 + $0x20] sm:$0xff] %vm1029_vm1, %v1001_v23  ;;  %1050 = vst.msk [vmem:[%s2246_s30 + $0xa0] sm:$0xff] %vm1029_vm1, %v1017_v50  ;;  %v1002_v21 = vadd.f32 %v2231_v1, %v966_v4  ;;  %v1018_v29 = vadd.f32 %v2231_v1, %v982_v57  ;;  %v540_v24 = vpop.f32.mrb[9].mxu0  ;;  %v604_v31 = vpop.f32.mrb[9].mxu1 }
 0x113   : > { %v937_v35 = vmul.f32 %v2212_v11, %v2023_v2  ;;  %v953_v56 = vmul.f32 %v2212_v11, %v2034_v10  ;;  %1037 = vst.msk [vmem:[%s2246_s30 + $0x38] sm:$0xff] %vm1029_vm1, %v1004_v45  ;;  %1053 = vst.msk [vmem:[%s2246_s30 + $0xb8] sm:$0xff] %vm1029_vm1, %v1020_v63  ;;  %v903_v62 = vmul.f32 %v1349_v25, %v2087_v8  ;;  %v2462_v2 = vld [vmem:[#allocation6_spill] sm:$0xff]  ;;  %v1350_v30 = vpop.f32.mrb[10].mxu0  ;;  %v1366_v8 = vpop.f32.mrb[10].mxu1 }
 0x114   : > { %v919_v6 = vmul.f32 %v1365_v26, %v2097_v28  ;;  %v940_v47 = vmul.f32 %v2212_v11, %v2041_v16  ;;  %v956_v59 = vmul.f32 %v2212_v11, %v2044_v19  ;;  %1035 = vst.msk [vmem:[%s2246_s30 + $0x28] sm:$0xff] %vm1029_vm1, %v1002_v21  ;;  %1051 = vst.msk [vmem:[%s2246_s30 + $0xa8] sm:$0xff] %vm1029_vm1, %v1018_v29  ;;  %v543_v32 = vpop.f32.mrb[11].mxu0  ;;  %v607_v37 = vpop.f32.mrb[11].mxu1 }
 0x115   : > { %v901_v10 = vmul.f32 %v2462_v2, %v540_v24  ;;  %v917_v27 = vmul.f32 %v2463_v52, %v604_v31  ;;  %v938_v28 = vmul.f32 %v2212_v11, %v2053_v22  ;;  %v954_v60 = vmul.f32 %v2212_v11, %v2061_v34  ;;  %v2473_v31 = vld [vmem:[#allocation13_spill] sm:$0xff] }
 0x116   : > { %v971_v16 = vadd.f32 %v939_v48, %v903_v62  ;;  %v987_v61 = vadd.f32 %v955_v44, %v919_v6  ;;  %v904_v19 = vmul.f32 %v1350_v30, %v2464_v3  ;;  %v920_v17 = vmul.f32 %v1366_v8, %v2465_v0  ;;  %v2470_v48 = vld [vmem:[#allocation15_spill] sm:$0xff]  ;;  %v2472_v6 = vld [vmem:[#allocation12_spill] sm:$0xff]  ;;  %v2474_v2 = vld [vmem:[#allocation17_spill] sm:$0xff] }
 0x117   : > { %v969_v5 = vadd.f32 %v937_v35, %v901_v10  ;;  %v985_v36 = vadd.f32 %v953_v56, %v917_v27  ;;  %v902_v42 = vmul.f32 %v2466_v40, %v543_v32  ;;  %v918_v22 = vmul.f32 %v2467_v39, %v607_v37  ;;  %v2475_v10 = vld [vmem:[#allocation18_spill] sm:$0xff] }
 0x118   : > { %v1007_v34 = vadd.f32 %v2231_v1, %v971_v16  ;;  %v1023_v7 = vadd.f32 %v2231_v1, %v987_v61  ;;  %v972_v46 = vadd.f32 %v940_v47, %v904_v19  ;;  %v988_v13 = vadd.f32 %v956_v59, %v920_v17  ;;  %v2477_v16 = vld [vmem:[#allocation20_spill] sm:$0xff] }
 0x119   : > { %v1005_v9 = vadd.f32 %v2231_v1, %v969_v5  ;;  %v1021_v41 = vadd.f32 %v2231_v1, %v985_v36  ;;  %v970_v12 = vadd.f32 %v938_v28, %v902_v42  ;;  %v986_v43 = vadd.f32 %v954_v60, %v918_v22  ;;  %v1353_v50 = vpop.f32.mrb[12].mxu0  ;;  %v1369_v4 = vpop.f32.mrb[12].mxu1  ;;  %v2476_v28 = vld [vmem:[#allocation19_spill] sm:$0xff] }
 0x11a   : > { %1040 = vst.msk [vmem:[%s2246_s30 + $0x50] sm:$0xff] %vm1029_vm1, %v1007_v34  ;;  %1056 = vst.msk [vmem:[%s2246_s30 + $0xd0] sm:$0xff] %vm1029_vm1, %v1023_v7  ;;  %v1008_v18 = vadd.f32 %v2231_v1, %v972_v46  ;;  %v1024_v49 = vadd.f32 %v2231_v1, %v988_v13  ;;  %v943_v20 = vmul.f32 %v2212_v11, %v2468_v54  ;;  %v556_v21 = vpop.f32.mrb[13].mxu0  ;;  %v620_v29 = vpop.f32.mrb[13].mxu1 }
 0x11b   : > { %v959_v15 = vmul.f32 %v2212_v11, %v2077_v55  ;;  %1038 = vst.msk [vmem:[%s2246_s30 + $0x40] sm:$0xff] %vm1029_vm1, %v1005_v9  ;;  %1054 = vst.msk [vmem:[%s2246_s30 + $0xc0] sm:$0xff] %vm1029_vm1, %v1021_v41  ;;  %v1006_v51 = vadd.f32 %v2231_v1, %v970_v12  ;;  %v1022_v23 = vadd.f32 %v2231_v1, %v986_v43  ;;  %v2469_v55 = vld [vmem:[#allocation14_spill] sm:$0xff]  ;;  %v1354_v56 = vpop.f32.mrb[14].mxu0  ;;  %v1370_v62 = vpop.f32.mrb[14].mxu1 }
 0x11c   : > { %v941_v57 = vmul.f32 %v2212_v11, %v2090_v14  ;;  %v957_v45 = vmul.f32 %v2212_v11, %v2100_v33  ;;  %1041 = vst.msk [vmem:[%s2246_s30 + $0x58] sm:$0xff] %vm1029_vm1, %v1008_v18  ;;  %1057 = vst.msk [vmem:[%s2246_s30 + $0xd8] sm:$0xff] %vm1029_vm1, %v1024_v49  ;;  %v907_v63 = vmul.f32 %v1353_v50, %v2469_v55  ;;  %v2471_v33 = vld [vmem:[#allocation16_spill] sm:$0xff]  ;;  %v559_v27 = vpop.f32.mrb[15].mxu0 }
 0x11d   : > { %v923_v44 = vmul.f32 %v1369_v4, %v2470_v48  ;;  %v944_v25 = vmul.f32 %v2212_v11, %v2113_v58  ;;  %v960_v26 = vmul.f32 %v2212_v11, %v2126_v38  ;;  %1039 = vst.msk [vmem:[%s2246_s30 + $0x48] sm:$0xff] %vm1029_vm1, %v1006_v51  ;;  %1055 = vst.msk [vmem:[%s2246_s30 + $0xc8] sm:$0xff] %vm1029_vm1, %v1022_v23 }
 0x11e   : > { %v905_v14 = vmul.f32 %v2192_v53, %v556_v21  ;;  %v921_v35 = vmul.f32 %v2471_v33, %v620_v29  ;;  %v942_v24 = vmul.f32 %v2212_v11, %v2472_v6  ;;  %v958_v47 = vmul.f32 %v2212_v11, %v2473_v31  ;;  %v623_v53 = vpop.f32.mrb[15].mxu1 }
 0x11f   : > { %v975_v58 = vadd.f32 %v943_v20, %v907_v63  ;;  %v991_v59 = vadd.f32 %v959_v15, %v923_v44  ;;  %v908_v38 = vmul.f32 %v1354_v56, %v2474_v2  ;;  %v924_v52 = vmul.f32 %v1370_v62, %v2475_v10 }
 0x120   : > { %v973_v30 = vadd.f32 %v941_v57, %v905_v14  ;;  %v989_v8 = vadd.f32 %v957_v45, %v921_v35  ;;  %v906_v60 = vmul.f32 %v2476_v28, %v559_v27  ;;  %v922_v61 = vmul.f32 %v2477_v16, %v623_v53 }
 0x121   : > { %v1011_v11 = vadd.f32 %v2231_v1, %v975_v58  ;;  %v1027_v3 = vadd.f32 %v2231_v1, %v991_v59  ;;  %v976_v19 = vadd.f32 %v944_v25, %v908_v38  ;;  %v992_v0 = vadd.f32 %v960_v26, %v924_v52 }
 0x122   : > { %v1009_v17 = vadd.f32 %v2231_v1, %v973_v30  ;;  %v1025_v32 = vadd.f32 %v2231_v1, %v989_v8  ;;  %v974_v37 = vadd.f32 %v942_v24, %v906_v60  ;;  %v990_v5 = vadd.f32 %v958_v47, %v922_v61 }
 0x123   : > { %1044 = vst.msk [vmem:[%s2246_s30 + $0x70] sm:$0xff] %vm1029_vm1, %v1011_v11  ;;  %1060 = vst.msk [vmem:[%s2246_s30 + $0xf0] sm:$0xff] %vm1029_vm1, %v1027_v3  ;;  %v1012_v36 = vadd.f32 %v2231_v1, %v976_v19  ;;  %v1028_v40 = vadd.f32 %v2231_v1, %v992_v0 }
 0x124   : > { %1042 = vst.msk [vmem:[%s2246_s30 + $0x60] sm:$0xff] %vm1029_vm1, %v1009_v17  ;;  %1058 = vst.msk [vmem:[%s2246_s30 + $0xe0] sm:$0xff] %vm1029_vm1, %v1025_v32  ;;  %v1010_v42 = vadd.f32 %v2231_v1, %v974_v37  ;;  %v1026_v39 = vadd.f32 %v2231_v1, %v990_v5 }
 0x125   : > { %1045 = vst.msk [vmem:[%s2246_s30 + $0x78] sm:$0xff] %vm1029_vm1, %v1012_v36  ;;  %1061 = vst.msk [vmem:[%s2246_s30 + $0xf8] sm:$0xff] %vm1029_vm1, %v1028_v40 }
 0x126   : > { %1043 = vst.msk [vmem:[%s2246_s30 + $0x68] sm:$0xff] %vm1029_vm1, %v1010_v42  ;;  %1059 = vst.msk [vmem:[%s2246_s30 + $0xe8] sm:$0xff] %vm1029_vm1, %v1026_v39 }
 0x127 PF: > { %p1389_p5 = scmp.ge.s32.totalorder %s1574_s21, 2  ;;  %s1140_s9 = sand.u32 1, %s1562_s18  }
 0x128   : > { %s1141_s6 = scalar_lea.sflag [#allocation3], %s1140_s9 }
 0x129   : > { %p1386_p1 = pnand %p1389_p5, %p1653_p6 }
 0x12b   : > { %1557 = dma.done.wait (!%p1386_p1), %s1141_s6, 4096  }
 0x12c   : > { %1559 = vsyncadd (!%p1386_p1), %s1141_s6, 4294963200  ;;  %p16_p2 = scmp.ge.s32.totalorder %s1636_s24, 4   ;;  %s2478_s18 = smov %s1566_s19 }
 0x12d   : > { %s2479_s19 = smov %s1570_s20  ;;  %s2480_s20 = smov %s1647_s27 }
 0x12e   : > { %s2481_s21 = smov %s1636_s24  ;;  %18 = sbr.rel (!%p16_p2) target bundleno = 3 (0x3), region = 86 }
 0x135   :  { %1146 = vsyncpa [#allocation3], 1 }
 0x136   :  { %1148 = vsyncpa [#allocation3 + $0x1], 1 }

</bundles_post_ra>
